<compile_context>
chip_gen: v7x
topology: tpu7x:2x2x1
jax: 0.10.0
libtpu: 0.0.40
codegen_flags: <defaults>
</compile_context>

<pallas_src>
import functools

import jax
import jax.numpy as jnp
from jax.experimental import pallas as pl
from jax.experimental.pallas import tpu as pltpu


_LANE = 128


def _round_up(n, m):
    return ((n + m - 1) // m) * m


def _pick_row_tile(rows, width, target=512):
    """Largest halving divisor of `rows` with tile*width output pixels <= target."""
    th = rows
    while th > 1 and th % 2 == 0 and th * width > target:
        th //= 2
    return th


# ----------------------------------------------------------------------------
# Fused kernel: (conv3x3 + BN + ReLU) -> (strided conv3x3 + BN + ReLU), one image.
# ----------------------------------------------------------------------------
def _conv_block_kernel(x_ref, w1_ref, s1_ref, b1_ref, w2_ref, s2_ref, b2_ref,
                       o_ref, ys_ref, *,
                       k, p, s, H1, W1, H2, W2, Wfull, woff, hq, th, pack_k):
    cin = x_ref.shape[-1]
    cop = o_ref.shape[-1]
    cdt = ys_ref.dtype
    wy = ys_ref.shape[2]

    # ---------------------------- layer 1: conv + folded BN + ReLU ----------------------
    if pack_k:
        # Small Cin: pack the k*k taps into the contraction dim -> single GEMM,
        # K = round_up(k*k*Cin, 128).  No 128-lane channel padding of the input in HBM.
        kp = w1_ref.shape[0]
        taps = [x_ref[0, kh:kh + H1, kw:kw + W1, :]
                for kh in range(k) for kw in range(k)]
        if kp > k * k * cin:
            taps.append(jnp.zeros((H1, W1, kp - k * k * cin), x_ref.dtype))
        patches = jnp.concatenate(taps, axis=-1).reshape(H1 * W1, kp)
        y1 = jnp.dot(patches, w1_ref[...], preferred_element_type=jnp.float32)
    else:
        # Large Cin: per-tap GEMMs with K = Cin (already lane sized).
        y1 = jnp.zeros((H1 * W1, cop), jnp.float32)
        for kh in range(k):
            for kw in range(k):
                patch = x_ref[0, kh:kh + H1, kw:kw + W1, :].reshape(H1 * W1, cin)
                y1 = y1 + jnp.dot(patch, w1_ref[kh * k + kw],
                                  preferred_element_type=jnp.float32)
    y1 = jnp.maximum(y1 * s1_ref[...] + b1_ref[...], 0.0)

    # ---- intermediate stays in VMEM, rows grouped by stride phase ----------------------
    # Zero only the halo COLUMN strips (interior + H-halo rows are fully rewritten below).
    # Done every step (not only step 0) so it is still correct if the 'parallel' batch
    # axis gets sharded across TensorCores with per-core scratch.
    ys_ref[:, :, :woff, :] = jnp.zeros((hq, s, woff, cop), cdt)
    ys_ref[:, :, woff + W1:, :] = jnp.zeros((hq, s, wy - woff - W1, cop), cdt)

    y1 = y1.reshape(H1, W1, cop).astype(cdt)
    pad_hi = hq * s - (H1 + p)
    parts = []
    if p:
        parts.append(jnp.zeros((p, W1, cop), cdt))
    parts.append(y1)
    if pad_hi:
        parts.append(jnp.zeros((pad_hi, W1, cop), cdt))
    y1p = jnp.concatenate(parts, axis=0) if len(parts) > 1 else y1
    # (hq*s, W1, C) -> (hq, s, W1, C) is a free leading-dim regroup; the interior write
    # lands at a sublane-aligned column offset -> unmasked store.
    ys_ref[:, :, woff:woff + W1, :] = y1p.reshape(hq, s, W1, cop)

    # ----------------------- layer 2: strided conv + folded BN + ReLU -------------------
    # Strided rows via phase lookup (contiguous leading-dim slices); columns computed at
    # stride 1 over Wfull = W2*s and subsampled with a reshape before the epilogue.
    c0 = woff - p
    for t in range(H2 // th):                     # M-tiled accumulation (static tiles)
        r0 = t * th
        acc = jnp.zeros((th * Wfull, cop), jnp.float32)
        for kh in range(k):
            g0, ph = kh // s, kh % s
            for kw in range(k):
                patch = ys_ref[r0 + g0:r0 + g0 + th, ph, c0 + kw:c0 + kw + Wfull, :]
                acc = acc + jnp.dot(patch.reshape(th * Wfull, cop),
                                    w2_ref[kh * k + kw],
                                    preferred_element_type=jnp.float32)
        out = jnp.maximum(acc * s2_ref[...] + b2_ref[...], 0.0)
        if s > 1:
            out = out.reshape(th * W2, s, cop)[:, 0, :]   # keep columns 0, s, 2s, ...
        o_ref[0, r0:r0 + th] = out.reshape(th, W2, cop).astype(o_ref.dtype)


def _fold_bn(bias, gamma, beta, mean, var, eps=1e-5):
    """Fold eval-mode BatchNorm (and the preceding conv bias) into scale / shift."""
    sc = gamma / jnp.sqrt(var + eps)
    return sc, (bias - mean) * sc + beta


@functools.partial(jax.jit, static_argnames=("stride", "padding", "compute_dtype"))
def conv_block_forward(x, params, *, stride=1, padding=1, compute_dtype=jnp.bfloat16):
    """Forward pass of `conv_block` (NCHW in, NCHW out)."""
    B, Cin, H, W = x.shape
    w1, w2 = params["w1"], params["w2"]
    Cout = w1.shape[0]
    k = w1.shape[-1]
    p, s = padding, stride

    Cop = _round_up(Cout, _LANE)
    # TODO(synk): on v6e/v7x with 128 < Cout <= 256, pad/tile the GEMM N dim to 256.

    H1, W1 = H + 2 * p - k + 1, W + 2 * p - k + 1        # layer-1 (stride 1) output
    H2 = (H1 + 2 * p - k) // s + 1                       # layer-2 strided output
    W2 = (W1 + 2 * p - k) // s + 1
    Wfull = W2 * s                                       # stride-1 compute width, layer 2

    itm = jnp.dtype(compute_dtype).itemsize
    sub_tile = 32 // itm                                 # 8 rows f32, 16 rows bf16
    woff = max(sub_tile, p)                              # aligned interior column offset
    assert woff >= p
    hq = (H1 + 2 * p + s - 1) // s                       # phase-grouped padded-row groups
    wy = _round_up(woff + max(W1 + 1, Wfull + k - 1 - p), sub_tile)
    th = _pick_row_tile(H2, Wfull)                       # M-tile: th*Wfull pixels per acc

    # ---- layout glue once at the block boundary: NCHW -> NHWC + spatial zero pad -------
    # (no 128-lane channel padding of the input; raw Cin is DMA'd as-is)
    x_nhwc = jnp.transpose(x, (0, 2, 3, 1)).astype(compute_dtype)
    x_pad = jnp.pad(x_nhwc, ((0, 0), (p, p), (p, p), (0, 0)))
    Hp, Wp = H + 2 * p, W + 2 * p

    pack_k = Cin < _LANE
    if pack_k:
        Kp = _round_up(k * k * Cin, _LANE)
        w1m = jnp.transpose(w1, (2, 3, 1, 0)).reshape(k * k * Cin, Cout)
        w1m = jnp.pad(w1m, ((0, Kp - k * k * Cin), (0, Cop - Cout))).astype(compute_dtype)
        w1_spec = pl.BlockSpec((Kp, Cop), lambda b: (0, 0))
        Cip, K1 = Cin, Kp
    else:
        Cip = _round_up(Cin, _LANE)
        w1m = jnp.transpose(w1, (2, 3, 1, 0)).reshape(k * k, Cin, Cout)
        w1m = jnp.pad(w1m, ((0, 0), (0, Cip - Cin), (0, Cop - Cout))).astype(compute_dtype)
        w1_spec = pl.BlockSpec((k * k, Cip, Cop), lambda b: (0, 0, 0))
        x_pad = jnp.pad(x_pad, ((0, 0), (0, 0), (0, 0), (0, Cip - Cin)))
        K1 = k * k * Cip

    w2m = jnp.transpose(w2, (2, 3, 1, 0)).reshape(k * k, Cout, Cout)
    w2m = jnp.pad(w2m, ((0, 0), (0, Cop - Cout), (0, Cop - Cout))).astype(compute_dtype)

    s1, sh1 = _fold_bn(params["b1"], params["bn1_gamma"], params["bn1_beta"],
                       params["bn1_mean"], params["bn1_var"])
    s2, sh2 = _fold_bn(params["b2"], params["bn2_gamma"], params["bn2_beta"],
                       params["bn2_mean"], params["bn2_var"])
    pad_c = (0, Cop - Cout)
    s1 = jnp.pad(s1, pad_c, constant_values=1.0).reshape(1, Cop).astype(jnp.float32)
    s2 = jnp.pad(s2, pad_c, constant_values=1.0).reshape(1, Cop).astype(jnp.float32)
    sh1 = jnp.pad(sh1, pad_c).reshape(1, Cop).astype(jnp.float32)
    sh2 = jnp.pad(sh2, pad_c).reshape(1, Cop).astype(jnp.float32)

    scratch = pltpu.VMEM((hq, s, wy, Cop), compute_dtype)

    flops = 2 * B * (K1 * H1 * W1 * Cop + k * k * H2 * Wfull * Cop * Cop)
    bytes_accessed = (B * Hp * Wp * Cip * itm
                      + (K1 + k * k * Cop) * Cop * itm
                      + 4 * Cop * 4
                      + B * H2 * W2 * Cop * itm)
    vmem_need = (2 * Hp * _round_up(Wp, 8) * max(Cip, _LANE) * itm       # input (2 bufs)
                 + 2 * (K1 + k * k * Cop) * Cop * itm                    # weights (2 bufs)
                 + 2 * H2 * W2 * Cop * itm                               # output (2 bufs)
                 + hq * s * wy * Cop * itm                               # intermediate
                 + H1 * W1 * max(K1, _LANE) * itm                        # layer-1 patches
                 + 2 * th * Wfull * Cop * 4)                             # live f32 acc
    try:
        vmem_cap = int(pltpu.get_tpu_info().vmem_capacity_bytes)
    except Exception:  # conservative fallback (v7x per-TC size)
        vmem_cap = 64 * 1024 * 1024
    vmem_limit = min(int(0.8 * vmem_cap), max(2 * vmem_need, 16 * 1024 * 1024))

    kernel = functools.partial(_conv_block_kernel, k=k, p=p, s=s, H1=H1, W1=W1,
                               H2=H2, W2=W2, Wfull=Wfull, woff=woff, hq=hq, th=th,
                               pack_k=pack_k)
    out = pl.pallas_call(
        kernel,
        out_shape=jax.ShapeDtypeStruct((B, H2, W2, Cop), compute_dtype),
        grid=(B,),
        in_specs=[
            pl.BlockSpec((1, Hp, Wp, Cip), lambda b: (b, 0, 0, 0)),
            w1_spec,
            pl.BlockSpec((1, Cop), lambda b: (0, 0)),
            pl.BlockSpec((1, Cop), lambda b: (0, 0)),
            pl.BlockSpec((k * k, Cop, Cop), lambda b: (0, 0, 0)),
            pl.BlockSpec((1, Cop), lambda b: (0, 0)),
            pl.BlockSpec((1, Cop), lambda b: (0, 0)),
        ],
        out_specs=pl.BlockSpec((1, H2, W2, Cop), lambda b: (b, 0, 0, 0)),
        scratch_shapes=[scratch],
        compiler_params=pltpu.CompilerParams(
            dimension_semantics=("parallel",),
            vmem_limit_bytes=int(vmem_limit)),
        cost_estimate=pl.CostEstimate(flops=int(flops), transcendentals=0,
                                      bytes_accessed=int(bytes_accessed)),
    )(x_pad, w1m, s1, sh1, w2m, s2, sh2)

    # Only the valid channels; NCHW at the block boundary (keep NHWC when chaining blocks).
    out = out[..., :Cout].astype(jnp.float32)
    return jnp.transpose(out, (0, 3, 1, 2))


# ----------------------------------------------------------------------------
# Parameters (PyTorch-default-style init; random eval-mode BN statistics).
# ----------------------------------------------------------------------------
def init_params(key, ch_in, ch_out, kernel_size=3):
    ks = jax.random.split(key, 12)
    kk = kernel_size * kernel_size

    def u(k_, shape, fan_in):
        b = 1.0 / jnp.sqrt(fan_in)
        return jax.random.uniform(k_, shape, jnp.float32, -b, b)

    return {
        "w1": u(ks[0], (ch_out, ch_in, kernel_size, kernel_size), ch_in * kk),
        "b1": u(ks[1], (ch_out,), ch_in * kk),
        "w2": u(ks[2], (ch_out, ch_out, kernel_size, kernel_size), ch_out * kk),
        "b2": u(ks[3], (ch_out,), ch_out * kk),
        "bn1_gamma": jax.random.uniform(ks[4], (ch_out,), jnp.float32, 0.5, 1.5),
        "bn1_beta": jax.random.uniform(ks[5], (ch_out,), jnp.float32, -0.5, 0.5),
        "bn1_mean": jax.random.uniform(ks[6], (ch_out,), jnp.float32, -0.5, 0.5),
        "bn1_var": jax.random.uniform(ks[7], (ch_out,), jnp.float32, 0.5, 1.5),
        "bn2_gamma": jax.random.uniform(ks[8], (ch_out,), jnp.float32, 0.5, 1.5),
        "bn2_beta": jax.random.uniform(ks[9], (ch_out,), jnp.float32, -0.5, 0.5),
        "bn2_mean": jax.random.uniform(ks[10], (ch_out,), jnp.float32, -0.5, 0.5),
        "bn2_var": jax.random.uniform(ks[11], (ch_out,), jnp.float32, 0.5, 1.5),
    }


# ----------------------------------------------------------------------------
# Pure-JAX reference (same math, XLA convs) for correctness checks.
# ----------------------------------------------------------------------------
def _ref_forward(x, p, stride=1, padding=1):
    pad = ((padding, padding), (padding, padding))

    def conv(x, w, b, st):
        y = jax.lax.conv_general_dilated(x, w, (st, st), pad,
                                         dimension_numbers=("NCHW", "OIHW", "NCHW"))
        return y + b[None, :, None, None]

    def bn_relu(x, g, bt, m, v, eps=1e-5):
        y = (x - m[None, :, None, None]) / jnp.sqrt(v[None, :, None, None] + eps)
        return jnp.maximum(y * g[None, :, None, None] + bt[None, :, None, None], 0.0)

    y = bn_relu(conv(x, p["w1"], p["b1"], 1),
                p["bn1_gamma"], p["bn1_beta"], p["bn1_mean"], p["bn1_var"])
    y = bn_relu(conv(y, p["w2"], p["b2"], stride),
                p["bn2_gamma"], p["bn2_beta"], p["bn2_mean"], p["bn2_var"])
    return y


if __name__ == "__main__":
    key = jax.random.PRNGKey(0)
    kx, kp = jax.random.split(key)
    ch_in, ch_out = 4, 8
    B, H, W = 2, 16, 16
    x = jax.random.normal(kx, (B, ch_in, H, W), jnp.float32)
    params = init_params(kp, ch_in, ch_out)

    ref = jax.block_until_ready(_ref_forward(x, params))

    # f32 MXU path: tight check against the XLA reference.
    out_f32 = jax.block_until_ready(conv_block_forward(x, params, compute_dtype=jnp.float32))
    assert out_f32.shape == (B, ch_out, H, W), out_f32.shape
    err = float(jnp.max(jnp.abs(out_f32 - ref)))
    assert bool(jnp.allclose(out_f32, ref, rtol=2e-3, atol=2e-3)), err

    # Default bf16 MXU path (half the DMA bytes + bf16 output writeback): looser check.
    out_bf16 = jax.block_until_ready(conv_block_forward(x, params))
    assert out_bf16.shape == (B, ch_out, H, W), out_bf16.shape
    assert bool(jnp.all(jnp.isfinite(out_bf16)))
    err = float(jnp.max(jnp.abs(out_bf16 - ref)))
    assert bool(jnp.allclose(out_bf16, ref, rtol=5e-2, atol=5e-2)), err

    # Strided second conv (the module's `stride` argument), now done inside the kernel.
    ref_s2 = jax.block_until_ready(_ref_forward(x, params, stride=2))
    out_s2 = jax.block_until_ready(conv_block_forward(x, params, stride=2,
                                                      compute_dtype=jnp.float32))
    assert out_s2.shape == ref_s2.shape == (B, ch_out, H // 2, W // 2), out_s2.shape
    err = float(jnp.max(jnp.abs(out_s2 - ref_s2)))
    assert bool(jnp.allclose(out_s2, ref_s2, rtol=2e-3, atol=2e-3)), err

    print("KERNEL_OK")
</pallas_src>

<mosaic_0001>
module attributes {stable_mosaic.version = 11 : i64} {
  func.func @_conv_block_kernel(%arg0: i32, %arg1: memref<1x18x18x4xf32, #tpu.memory_space<vmem>>, %arg2: memref<128x128xf32, #tpu.memory_space<vmem>>, %arg3: memref<1x128xf32, #tpu.memory_space<vmem>>, %arg4: memref<1x128xf32, #tpu.memory_space<vmem>>, %arg5: memref<9x128x128xf32, #tpu.memory_space<vmem>>, %arg6: memref<1x128xf32, #tpu.memory_space<vmem>>, %arg7: memref<1x128xf32, #tpu.memory_space<vmem>>, %arg8: memref<1x16x16x128xf32, #tpu.memory_space<vmem>>, %arg9: memref<18x1x32x128xf32, #tpu.memory_space<vmem>>) attributes {dimension_semantics = [#tpu.dimension_semantics<parallel>], iteration_bounds = array<i64: 2>, scalar_prefetch = 0 : i64, scratch_operands = 1 : i64, tpu.core_type = #tpu.core_type<tc>, window_params = [{transform_indices = @transform_0, window_bounds = array<i64: 1, 18, 18, 4>}, {pipeline_mode = #tpu.pipeline_mode<synchronous>, transform_indices = @transform_1, window_bounds = array<i64: 128, 128>}, {pipeline_mode = #tpu.pipeline_mode<synchronous>, transform_indices = @transform_2, window_bounds = array<i64: 1, 128>}, {pipeline_mode = #tpu.pipeline_mode<synchronous>, transform_indices = @transform_3, window_bounds = array<i64: 1, 128>}, {pipeline_mode = #tpu.pipeline_mode<synchronous>, transform_indices = @transform_4, window_bounds = array<i64: 9, 128, 128>}, {pipeline_mode = #tpu.pipeline_mode<synchronous>, transform_indices = @transform_5, window_bounds = array<i64: 1, 128>}, {pipeline_mode = #tpu.pipeline_mode<synchronous>, transform_indices = @transform_6, window_bounds = array<i64: 1, 128>}, {transform_indices = @transform_7, window_bounds = array<i64: 1, 16, 16, 128>}]} {
    %c0 = arith.constant 0 : index
    %c0_0 = arith.constant 0 : index
    %c0_1 = arith.constant 0 : index
    %c0_2 = arith.constant 0 : index
    %0 = vector.load %arg1[%c0, %c0_0, %c0_1, %c0_2] : memref<1x18x18x4xf32, #tpu.memory_space<vmem>>, vector<1x16x16x4xf32>
    %1 = vector.shape_cast %0 : vector<1x16x16x4xf32> to vector<16x16x4xf32>
    %c0_3 = arith.constant 0 : index
    %c0_4 = arith.constant 0 : index
    %c1 = arith.constant 1 : index
    %c0_5 = arith.constant 0 : index
    %2 = vector.load %arg1[%c0_3, %c0_4, %c1, %c0_5] : memref<1x18x18x4xf32, #tpu.memory_space<vmem>>, vector<1x16x16x4xf32>
    %3 = vector.shape_cast %2 : vector<1x16x16x4xf32> to vector<16x16x4xf32>
    %c0_6 = arith.constant 0 : index
    %c0_7 = arith.constant 0 : index
    %c2 = arith.constant 2 : index
    %c0_8 = arith.constant 0 : index
    %4 = vector.load %arg1[%c0_6, %c0_7, %c2, %c0_8] : memref<1x18x18x4xf32, #tpu.memory_space<vmem>>, vector<1x16x16x4xf32>
    %5 = vector.shape_cast %4 : vector<1x16x16x4xf32> to vector<16x16x4xf32>
    %c0_9 = arith.constant 0 : index
    %c1_10 = arith.constant 1 : index
    %c0_11 = arith.constant 0 : index
    %c0_12 = arith.constant 0 : index
    %6 = vector.load %arg1[%c0_9, %c1_10, %c0_11, %c0_12] : memref<1x18x18x4xf32, #tpu.memory_space<vmem>>, vector<1x16x16x4xf32>
    %7 = vector.shape_cast %6 : vector<1x16x16x4xf32> to vector<16x16x4xf32>
    %c0_13 = arith.constant 0 : index
    %c1_14 = arith.constant 1 : index
    %c1_15 = arith.constant 1 : index
    %c0_16 = arith.constant 0 : index
    %8 = vector.load %arg1[%c0_13, %c1_14, %c1_15, %c0_16] : memref<1x18x18x4xf32, #tpu.memory_space<vmem>>, vector<1x16x16x4xf32>
    %9 = vector.shape_cast %8 : vector<1x16x16x4xf32> to vector<16x16x4xf32>
    %c0_17 = arith.constant 0 : index
    %c1_18 = arith.constant 1 : index
    %c2_19 = arith.constant 2 : index
    %c0_20 = arith.constant 0 : index
    %10 = vector.load %arg1[%c0_17, %c1_18, %c2_19, %c0_20] : memref<1x18x18x4xf32, #tpu.memory_space<vmem>>, vector<1x16x16x4xf32>
    %11 = vector.shape_cast %10 : vector<1x16x16x4xf32> to vector<16x16x4xf32>
    %c0_21 = arith.constant 0 : index
    %c2_22 = arith.constant 2 : index
    %c0_23 = arith.constant 0 : index
    %c0_24 = arith.constant 0 : index
    %12 = vector.load %arg1[%c0_21, %c2_22, %c0_23, %c0_24] : memref<1x18x18x4xf32, #tpu.memory_space<vmem>>, vector<1x16x16x4xf32>
    %13 = vector.shape_cast %12 : vector<1x16x16x4xf32> to vector<16x16x4xf32>
    %c0_25 = arith.constant 0 : index
    %c2_26 = arith.constant 2 : index
    %c1_27 = arith.constant 1 : index
    %c0_28 = arith.constant 0 : index
    %14 = vector.load %arg1[%c0_25, %c2_26, %c1_27, %c0_28] : memref<1x18x18x4xf32, #tpu.memory_space<vmem>>, vector<1x16x16x4xf32>
    %15 = vector.shape_cast %14 : vector<1x16x16x4xf32> to vector<16x16x4xf32>
    %c0_29 = arith.constant 0 : index
    %c2_30 = arith.constant 2 : index
    %c2_31 = arith.constant 2 : index
    %c0_32 = arith.constant 0 : index
    %16 = vector.load %arg1[%c0_29, %c2_30, %c2_31, %c0_32] : memref<1x18x18x4xf32, #tpu.memory_space<vmem>>, vector<1x16x16x4xf32>
    %17 = vector.shape_cast %16 : vector<1x16x16x4xf32> to vector<16x16x4xf32>
    %cst = arith.constant 0.000000e+00 : f32
    %18 = vector.broadcast %cst : f32 to vector<16x16x92xf32>
    %19 = tpu.concatenate %1, %3, %5, %7, %9, %11, %13, %15, %17, %18 in 2 : vector<16x16x4xf32>, vector<16x16x4xf32>, vector<16x16x4xf32>, vector<16x16x4xf32>, vector<16x16x4xf32>, vector<16x16x4xf32>, vector<16x16x4xf32>, vector<16x16x4xf32>, vector<16x16x4xf32>, vector<16x16x92xf32> -> vector<16x16x128xf32>
    %20 = vector.shape_cast %19 : vector<16x16x128xf32> to vector<256x128xf32>
    %c0_33 = arith.constant 0 : index
    %c0_34 = arith.constant 0 : index
    %21 = vector.load %arg2[%c0_33, %c0_34] : memref<128x128xf32, #tpu.memory_space<vmem>>, vector<128x128xf32>
    %cst_35 = arith.constant dense<0.000000e+00> : vector<256x128xf32>
    %22 = tpu.matmul %20, %21, %cst_35 {dimension_numbers = #tpu.dot_dimension_numbers<[1], [0], [0], [1], [0, 0, 1, 1], [], []>} : vector<256x128xf32>, vector<128x128xf32>, vector<256x128xf32> -> vector<256x128xf32>
    %c0_36 = arith.constant 0 : index
    %c0_37 = arith.constant 0 : index
    %23 = vector.load %arg3[%c0_36, %c0_37] : memref<1x128xf32, #tpu.memory_space<vmem>>, vector<1x128xf32>
    %24 = vector.broadcast %23 : vector<1x128xf32> to vector<256x128xf32>
    %25 = arith.mulf %22, %24 : vector<256x128xf32>
    %c0_38 = arith.constant 0 : index
    %c0_39 = arith.constant 0 : index
    %26 = vector.load %arg4[%c0_38, %c0_39] : memref<1x128xf32, #tpu.memory_space<vmem>>, vector<1x128xf32>
    %27 = vector.broadcast %26 : vector<1x128xf32> to vector<256x128xf32>
    %28 = arith.addf %25, %27 : vector<256x128xf32>
    %cst_40 = arith.constant 0.000000e+00 : f32
    %29 = vector.broadcast %cst_40 : f32 to vector<256x128xf32>
    %30 = arith.maximumf %28, %29 : vector<256x128xf32>
    %cst_41 = arith.constant 0.000000e+00 : f32
    %31 = vector.broadcast %cst_41 : f32 to vector<18x1x8x128xf32>
    %c0_42 = arith.constant 0 : index
    %c0_43 = arith.constant 0 : index
    %c0_44 = arith.constant 0 : index
    %c0_45 = arith.constant 0 : index
    %32 = vector.load %arg9[%c0_42, %c0_43, %c0_44, %c0_45] : memref<18x1x32x128xf32, #tpu.memory_space<vmem>>, vector<18x1x8x128xf32>
    tpu.vector_store %arg9[%c0_42, %c0_43, %c0_44, %c0_45], %31 {strides = array<i32>} : memref<18x1x32x128xf32, #tpu.memory_space<vmem>>, vector<18x1x8x128xf32>,
    %cst_46 = arith.constant 0.000000e+00 : f32
    %33 = vector.broadcast %cst_46 : f32 to vector<18x1x8x128xf32>
    %c0_47 = arith.constant 0 : index
    %c0_48 = arith.constant 0 : index
    %c24 = arith.constant 24 : index
    %c0_49 = arith.constant 0 : index
    %34 = vector.load %arg9[%c0_47, %c0_48, %c24, %c0_49] : memref<18x1x32x128xf32, #tpu.memory_space<vmem>>, vector<18x1x8x128xf32>
    tpu.vector_store %arg9[%c0_47, %c0_48, %c24, %c0_49], %33 {strides = array<i32>} : memref<18x1x32x128xf32, #tpu.memory_space<vmem>>, vector<18x1x8x128xf32>,
    %35 = vector.shape_cast %30 : vector<256x128xf32> to vector<16x16x128xf32>
    %cst_50 = arith.constant 0.000000e+00 : f32
    %36 = vector.broadcast %cst_50 : f32 to vector<1x16x128xf32>
    %cst_51 = arith.constant 0.000000e+00 : f32
    %37 = vector.broadcast %cst_51 : f32 to vector<1x16x128xf32>
    %38 = tpu.concatenate %36, %35, %37 in 0 : vector<1x16x128xf32>, vector<16x16x128xf32>, vector<1x16x128xf32> -> vector<18x16x128xf32>
    %39 = vector.shape_cast %38 : vector<18x16x128xf32> to vector<18x1x16x128xf32>
    %c0_52 = arith.constant 0 : index
    %c0_53 = arith.constant 0 : index
    %c8 = arith.constant 8 : index
    %c0_54 = arith.constant 0 : index
    %40 = vector.load %arg9[%c0_52, %c0_53, %c8, %c0_54] : memref<18x1x32x128xf32, #tpu.memory_space<vmem>>, vector<18x1x16x128xf32>
    tpu.vector_store %arg9[%c0_52, %c0_53, %c8, %c0_54], %39 {strides = array<i32>} : memref<18x1x32x128xf32, #tpu.memory_space<vmem>>, vector<18x1x16x128xf32>,
    %cst_55 = arith.constant 0.000000e+00 : f32
    %41 = vector.broadcast %cst_55 : f32 to vector<256x128xf32>
    %c0_56 = arith.constant 0 : index
    %c0_57 = arith.constant 0 : index
    %c7 = arith.constant 7 : index
    %c0_58 = arith.constant 0 : index
    %42 = vector.load %arg9[%c0_56, %c0_57, %c7, %c0_58] : memref<18x1x32x128xf32, #tpu.memory_space<vmem>>, vector<16x1x16x128xf32>
    %43 = vector.shape_cast %42 : vector<16x1x16x128xf32> to vector<16x16x128xf32>
    %44 = vector.shape_cast %43 : vector<16x16x128xf32> to vector<256x128xf32>
    %c0_59 = arith.constant 0 : index
    %c0_60 = arith.constant 0 : index
    %c0_61 = arith.constant 0 : index
    %45 = vector.load %arg5[%c0_59, %c0_60, %c0_61] : memref<9x128x128xf32, #tpu.memory_space<vmem>>, vector<1x128x128xf32>
    %46 = vector.shape_cast %45 : vector<1x128x128xf32> to vector<128x128xf32>
    %cst_62 = arith.constant dense<0.000000e+00> : vector<256x128xf32>
    %47 = tpu.matmul %44, %46, %cst_62 {dimension_numbers = #tpu.dot_dimension_numbers<[1], [0], [0], [1], [0, 0, 1, 1], [], []>} : vector<256x128xf32>, vector<128x128xf32>, vector<256x128xf32> -> vector<256x128xf32>
    %48 = arith.addf %41, %47 : vector<256x128xf32>
    %c0_63 = arith.constant 0 : index
    %c0_64 = arith.constant 0 : index
    %c8_65 = arith.constant 8 : index
    %c0_66 = arith.constant 0 : index
    %49 = vector.load %arg9[%c0_63, %c0_64, %c8_65, %c0_66] : memref<18x1x32x128xf32, #tpu.memory_space<vmem>>, vector<16x1x16x128xf32>
    %50 = vector.shape_cast %49 : vector<16x1x16x128xf32> to vector<16x16x128xf32>
    %51 = vector.shape_cast %50 : vector<16x16x128xf32> to vector<256x128xf32>
    %c1_67 = arith.constant 1 : index
    %c0_68 = arith.constant 0 : index
    %c0_69 = arith.constant 0 : index
    %52 = vector.load %arg5[%c1_67, %c0_68, %c0_69] : memref<9x128x128xf32, #tpu.memory_space<vmem>>, vector<1x128x128xf32>
    %53 = vector.shape_cast %52 : vector<1x128x128xf32> to vector<128x128xf32>
    %cst_70 = arith.constant dense<0.000000e+00> : vector<256x128xf32>
    %54 = tpu.matmul %51, %53, %cst_70 {dimension_numbers = #tpu.dot_dimension_numbers<[1], [0], [0], [1], [0, 0, 1, 1], [], []>} : vector<256x128xf32>, vector<128x128xf32>, vector<256x128xf32> -> vector<256x128xf32>
    %55 = arith.addf %48, %54 : vector<256x128xf32>
    %c0_71 = arith.constant 0 : index
    %c0_72 = arith.constant 0 : index
    %c9 = arith.constant 9 : index
    %c0_73 = arith.constant 0 : index
    %56 = vector.load %arg9[%c0_71, %c0_72, %c9, %c0_73] : memref<18x1x32x128xf32, #tpu.memory_space<vmem>>, vector<16x1x16x128xf32>
    %57 = vector.shape_cast %56 : vector<16x1x16x128xf32> to vector<16x16x128xf32>
    %58 = vector.shape_cast %57 : vector<16x16x128xf32> to vector<256x128xf32>
    %c2_74 = arith.constant 2 : index
    %c0_75 = arith.constant 0 : index
    %c0_76 = arith.constant 0 : index
    %59 = vector.load %arg5[%c2_74, %c0_75, %c0_76] : memref<9x128x128xf32, #tpu.memory_space<vmem>>, vector<1x128x128xf32>
    %60 = vector.shape_cast %59 : vector<1x128x128xf32> to vector<128x128xf32>
    %cst_77 = arith.constant dense<0.000000e+00> : vector<256x128xf32>
    %61 = tpu.matmul %58, %60, %cst_77 {dimension_numbers = #tpu.dot_dimension_numbers<[1], [0], [0], [1], [0, 0, 1, 1], [], []>} : vector<256x128xf32>, vector<128x128xf32>, vector<256x128xf32> -> vector<256x128xf32>
    %62 = arith.addf %55, %61 : vector<256x128xf32>
    %c1_78 = arith.constant 1 : index
    %c0_79 = arith.constant 0 : index
    %c7_80 = arith.constant 7 : index
    %c0_81 = arith.constant 0 : index
    %63 = vector.load %arg9[%c1_78, %c0_79, %c7_80, %c0_81] : memref<18x1x32x128xf32, #tpu.memory_space<vmem>>, vector<16x1x16x128xf32>
    %64 = vector.shape_cast %63 : vector<16x1x16x128xf32> to vector<16x16x128xf32>
    %65 = vector.shape_cast %64 : vector<16x16x128xf32> to vector<256x128xf32>
    %c3 = arith.constant 3 : index
    %c0_82 = arith.constant 0 : index
    %c0_83 = arith.constant 0 : index
    %66 = vector.load %arg5[%c3, %c0_82, %c0_83] : memref<9x128x128xf32, #tpu.memory_space<vmem>>, vector<1x128x128xf32>
    %67 = vector.shape_cast %66 : vector<1x128x128xf32> to vector<128x128xf32>
    %cst_84 = arith.constant dense<0.000000e+00> : vector<256x128xf32>
    %68 = tpu.matmul %65, %67, %cst_84 {dimension_numbers = #tpu.dot_dimension_numbers<[1], [0], [0], [1], [0, 0, 1, 1], [], []>} : vector<256x128xf32>, vector<128x128xf32>, vector<256x128xf32> -> vector<256x128xf32>
    %69 = arith.addf %62, %68 : vector<256x128xf32>
    %c1_85 = arith.constant 1 : index
    %c0_86 = arith.constant 0 : index
    %c8_87 = arith.constant 8 : index
    %c0_88 = arith.constant 0 : index
    %70 = vector.load %arg9[%c1_85, %c0_86, %c8_87, %c0_88] : memref<18x1x32x128xf32, #tpu.memory_space<vmem>>, vector<16x1x16x128xf32>
    %71 = vector.shape_cast %70 : vector<16x1x16x128xf32> to vector<16x16x128xf32>
    %72 = vector.shape_cast %71 : vector<16x16x128xf32> to vector<256x128xf32>
    %c4 = arith.constant 4 : index
    %c0_89 = arith.constant 0 : index
    %c0_90 = arith.constant 0 : index
    %73 = vector.load %arg5[%c4, %c0_89, %c0_90] : memref<9x128x128xf32, #tpu.memory_space<vmem>>, vector<1x128x128xf32>
    %74 = vector.shape_cast %73 : vector<1x128x128xf32> to vector<128x128xf32>
    %cst_91 = arith.constant dense<0.000000e+00> : vector<256x128xf32>
    %75 = tpu.matmul %72, %74, %cst_91 {dimension_numbers = #tpu.dot_dimension_numbers<[1], [0], [0], [1], [0, 0, 1, 1], [], []>} : vector<256x128xf32>, vector<128x128xf32>, vector<256x128xf32> -> vector<256x128xf32>
    %76 = arith.addf %69, %75 : vector<256x128xf32>
    %c1_92 = arith.constant 1 : index
    %c0_93 = arith.constant 0 : index
    %c9_94 = arith.constant 9 : index
    %c0_95 = arith.constant 0 : index
    %77 = vector.load %arg9[%c1_92, %c0_93, %c9_94, %c0_95] : memref<18x1x32x128xf32, #tpu.memory_space<vmem>>, vector<16x1x16x128xf32>
    %78 = vector.shape_cast %77 : vector<16x1x16x128xf32> to vector<16x16x128xf32>
    %79 = vector.shape_cast %78 : vector<16x16x128xf32> to vector<256x128xf32>
    %c5 = arith.constant 5 : index
    %c0_96 = arith.constant 0 : index
    %c0_97 = arith.constant 0 : index
    %80 = vector.load %arg5[%c5, %c0_96, %c0_97] : memref<9x128x128xf32, #tpu.memory_space<vmem>>, vector<1x128x128xf32>
    %81 = vector.shape_cast %80 : vector<1x128x128xf32> to vector<128x128xf32>
    %cst_98 = arith.constant dense<0.000000e+00> : vector<256x128xf32>
    %82 = tpu.matmul %79, %81, %cst_98 {dimension_numbers = #tpu.dot_dimension_numbers<[1], [0], [0], [1], [0, 0, 1, 1], [], []>} : vector<256x128xf32>, vector<128x128xf32>, vector<256x128xf32> -> vector<256x128xf32>
    %83 = arith.addf %76, %82 : vector<256x128xf32>
    %c2_99 = arith.constant 2 : index
    %c0_100 = arith.constant 0 : index
    %c7_101 = arith.constant 7 : index
    %c0_102 = arith.constant 0 : index
    %84 = vector.load %arg9[%c2_99, %c0_100, %c7_101, %c0_102] : memref<18x1x32x128xf32, #tpu.memory_space<vmem>>, vector<16x1x16x128xf32>
    %85 = vector.shape_cast %84 : vector<16x1x16x128xf32> to vector<16x16x128xf32>
    %86 = vector.shape_cast %85 : vector<16x16x128xf32> to vector<256x128xf32>
    %c6 = arith.constant 6 : index
    %c0_103 = arith.constant 0 : index
    %c0_104 = arith.constant 0 : index
    %87 = vector.load %arg5[%c6, %c0_103, %c0_104] : memref<9x128x128xf32, #tpu.memory_space<vmem>>, vector<1x128x128xf32>
    %88 = vector.shape_cast %87 : vector<1x128x128xf32> to vector<128x128xf32>
    %cst_105 = arith.constant dense<0.000000e+00> : vector<256x128xf32>
    %89 = tpu.matmul %86, %88, %cst_105 {dimension_numbers = #tpu.dot_dimension_numbers<[1], [0], [0], [1], [0, 0, 1, 1], [], []>} : vector<256x128xf32>, vector<128x128xf32>, vector<256x128xf32> -> vector<256x128xf32>
    %90 = arith.addf %83, %89 : vector<256x128xf32>
    %c2_106 = arith.constant 2 : index
    %c0_107 = arith.constant 0 : index
    %c8_108 = arith.constant 8 : index
    %c0_109 = arith.constant 0 : index
    %91 = vector.load %arg9[%c2_106, %c0_107, %c8_108, %c0_109] : memref<18x1x32x128xf32, #tpu.memory_space<vmem>>, vector<16x1x16x128xf32>
    %92 = vector.shape_cast %91 : vector<16x1x16x128xf32> to vector<16x16x128xf32>
    %93 = vector.shape_cast %92 : vector<16x16x128xf32> to vector<256x128xf32>
    %c7_110 = arith.constant 7 : index
    %c0_111 = arith.constant 0 : index
    %c0_112 = arith.constant 0 : index
    %94 = vector.load %arg5[%c7_110, %c0_111, %c0_112] : memref<9x128x128xf32, #tpu.memory_space<vmem>>, vector<1x128x128xf32>
    %95 = vector.shape_cast %94 : vector<1x128x128xf32> to vector<128x128xf32>
    %cst_113 = arith.constant dense<0.000000e+00> : vector<256x128xf32>
    %96 = tpu.matmul %93, %95, %cst_113 {dimension_numbers = #tpu.dot_dimension_numbers<[1], [0], [0], [1], [0, 0, 1, 1], [], []>} : vector<256x128xf32>, vector<128x128xf32>, vector<256x128xf32> -> vector<256x128xf32>
    %97 = arith.addf %90, %96 : vector<256x128xf32>
    %c2_114 = arith.constant 2 : index
    %c0_115 = arith.constant 0 : index
    %c9_116 = arith.constant 9 : index
    %c0_117 = arith.constant 0 : index
    %98 = vector.load %arg9[%c2_114, %c0_115, %c9_116, %c0_117] : memref<18x1x32x128xf32, #tpu.memory_space<vmem>>, vector<16x1x16x128xf32>
    %99 = vector.shape_cast %98 : vector<16x1x16x128xf32> to vector<16x16x128xf32>
    %100 = vector.shape_cast %99 : vector<16x16x128xf32> to vector<256x128xf32>
    %c8_118 = arith.constant 8 : index
    %c0_119 = arith.constant 0 : index
    %c0_120 = arith.constant 0 : index
    %101 = vector.load %arg5[%c8_118, %c0_119, %c0_120] : memref<9x128x128xf32, #tpu.memory_space<vmem>>, vector<1x128x128xf32>
    %102 = vector.shape_cast %101 : vector<1x128x128xf32> to vector<128x128xf32>
    %cst_121 = arith.constant dense<0.000000e+00> : vector<256x128xf32>
    %103 = tpu.matmul %100, %102, %cst_121 {dimension_numbers = #tpu.dot_dimension_numbers<[1], [0], [0], [1], [0, 0, 1, 1], [], []>} : vector<256x128xf32>, vector<128x128xf32>, vector<256x128xf32> -> vector<256x128xf32>
    %104 = arith.addf %97, %103 : vector<256x128xf32>
    %c0_122 = arith.constant 0 : index
    %c0_123 = arith.constant 0 : index
    %105 = vector.load %arg6[%c0_122, %c0_123] : memref<1x128xf32, #tpu.memory_space<vmem>>, vector<1x128xf32>
    %106 = vector.broadcast %105 : vector<1x128xf32> to vector<256x128xf32>
    %107 = arith.mulf %104, %106 : vector<256x128xf32>
    %c0_124 = arith.constant 0 : index
    %c0_125 = arith.constant 0 : index
    %108 = vector.load %arg7[%c0_124, %c0_125] : memref<1x128xf32, #tpu.memory_space<vmem>>, vector<1x128xf32>
    %109 = vector.broadcast %108 : vector<1x128xf32> to vector<256x128xf32>
    %110 = arith.addf %107, %109 : vector<256x128xf32>
    %cst_126 = arith.constant 0.000000e+00 : f32
    %111 = vector.broadcast %cst_126 : f32 to vector<256x128xf32>
    %112 = arith.maximumf %110, %111 : vector<256x128xf32>
    %113 = vector.shape_cast %112 : vector<256x128xf32> to vector<16x16x128xf32>
    %c0_127 = arith.constant 0 : index
    %c0_128 = arith.constant 0 : index
    %c0_129 = arith.constant 0 : index
    %c0_130 = arith.constant 0 : index
    %114 = vector.load %arg8[%c0_127, %c0_128, %c0_129, %c0_130] : memref<1x16x16x128xf32, #tpu.memory_space<vmem>>, vector<1x16x16x128xf32>
    %115 = vector.shape_cast %114 : vector<1x16x16x128xf32> to vector<16x16x128xf32>
    %116 = vector.shape_cast %113 : vector<16x16x128xf32> to vector<1x16x16x128xf32>
    tpu.vector_store %arg8[%c0_127, %c0_128, %c0_129, %c0_130], %116 {strides = array<i32>} : memref<1x16x16x128xf32, #tpu.memory_space<vmem>>, vector<1x16x16x128xf32>,
    return
  }
  func.func @transform_0(%arg0: i32) -> (i32, i32, i32, i32) {
    %c0_i32 = arith.constant 0 : i32
    %c0_i32_0 = arith.constant 0 : i32
    %c0_i32_1 = arith.constant 0 : i32
    %c0_i32_2 = arith.constant 0 : i32
    return %arg0, %c0_i32, %c0_i32_0, %c0_i32_1 : i32, i32, i32, i32
  }
  func.func @transform_1(%arg0: i32) -> (i32, i32) {
    %c0_i32 = arith.constant 0 : i32
    %c0_i32_0 = arith.constant 0 : i32
    %c0_i32_1 = arith.constant 0 : i32
    return %c0_i32, %c0_i32_0 : i32, i32
  }
  func.func @transform_2(%arg0: i32) -> (i32, i32) {
    %c0_i32 = arith.constant 0 : i32
    %c0_i32_0 = arith.constant 0 : i32
    %c0_i32_1 = arith.constant 0 : i32
    return %c0_i32, %c0_i32_0 : i32, i32
  }
  func.func @transform_3(%arg0: i32) -> (i32, i32) {
    %c0_i32 = arith.constant 0 : i32
    %c0_i32_0 = arith.constant 0 : i32
    %c0_i32_1 = arith.constant 0 : i32
    return %c0_i32, %c0_i32_0 : i32, i32
  }
  func.func @transform_4(%arg0: i32) -> (i32, i32, i32) {
    %c0_i32 = arith.constant 0 : i32
    %c0_i32_0 = arith.constant 0 : i32
    %c0_i32_1 = arith.constant 0 : i32
    %c0_i32_2 = arith.constant 0 : i32
    return %c0_i32, %c0_i32_0, %c0_i32_1 : i32, i32, i32
  }
  func.func @transform_5(%arg0: i32) -> (i32, i32) {
    %c0_i32 = arith.constant 0 : i32
    %c0_i32_0 = arith.constant 0 : i32
    %c0_i32_1 = arith.constant 0 : i32
    return %c0_i32, %c0_i32_0 : i32, i32
  }
  func.func @transform_6(%arg0: i32) -> (i32, i32) {
    %c0_i32 = arith.constant 0 : i32
    %c0_i32_0 = arith.constant 0 : i32
    %c0_i32_1 = arith.constant 0 : i32
    return %c0_i32, %c0_i32_0 : i32, i32
  }
  func.func @transform_7(%arg0: i32) -> (i32, i32, i32, i32) {
    %c0_i32 = arith.constant 0 : i32
    %c0_i32_0 = arith.constant 0 : i32
    %c0_i32_1 = arith.constant 0 : i32
    %c0_i32_2 = arith.constant 0 : i32
    return %arg0, %c0_i32, %c0_i32_0, %c0_i32_1 : i32, i32, i32, i32
  }
}

</mosaic_0001>

<bundles_post_ra>
// kernel: conv_block_forward.1
= control target key start
LH: loop header
LB: loop body
LE: loop exit
PB: predicated region body
PF: predicated region fallthrough
CT: control target
= control target key end

     0   :  { %s7503_s24 = smov 0   ;;  %s9751_s0 = inlined_call_operand.vmem [shape: f32[2,18,18,4], index: 0, kind: input, shape index: {}]   ;;  %s9752_s1 = inlined_call_operand.vmem [shape: f32[128,128], index: 1, kind: input, shape index: {}]   ;;  %s9753_s2 = inlined_call_operand.vmem [shape: f32[1,128], index: 2, kind: input, shape index: {}]   ;;  %s9754_s3 = inlined_call_operand.vmem [shape: f32[1,128], index: 3, kind: input, shape index: {}]   ;;  %s9755_s4 = inlined_call_operand.vmem [shape: f32[9,128,128], index: 4, kind: input, shape index: {}]   ;;  %s9756_s5 = inlined_call_operand.vmem [shape: f32[1,128], index: 5, kind: input, shape index: {}]   ;;  %s9757_s6 = inlined_call_operand.vmem [shape: f32[1,128], index: 6, kind: input, shape index: {}]   ;;  %s9758_s7 = inlined_call_operand.vmem [shape: f32[2,16,16,128], index: 7, kind: output, shape index: {}]  }
   0x1 LB: > { %s5201_s25 = sadd.s32 4294967295, %s7452_s24   ;;  %p5205_p0 = scmp.ge.s32.totalorder %s7452_s24, 1  ;;  %s7452_s24 = sphi %s7503_s24, %s17_s24  }
   0x2   : > { %p237_p1 = scmp.lt.s32.totalorder %s7452_s24, 3 }
   0x4   : > { %p238_p2 = pnand %p5205_p0, %p237_p1 }
   0x6   : > { %241 = sbr.rel (%p238_p2) target bundleno = 1344 (0x540), region = 48 }
   0xd   : > { %p269_p3 = scmp.lt.s32.totalorder %s5201_s25, 1  ;;  %s7454_s30 = smov 8   ;;  %v1890_v7 = vld [vmem:[%s9752_s1] sm:$0xff]  ;;  %v1891_v8 = vld [vmem:[%s9752_s1 + $0x8] sm:$0xff]  ;;  %v1892_v9 = vld [vmem:[%s9752_s1 + $0x10] sm:$0xff]  ;;  %vm1593_vm0 = vcmask 31744  }
   0xe   : > { %s7455_s8 = smov 4   ;;  %s7456_s9 = smov 12   ;;  %v6848_v10 = vpack.c.bf16 %v1891_v8, %v1890_v7  ;;  %v1893_v11 = vld [vmem:[%s9752_s1 + $0x18] sm:$0xff]  ;;  %v1894_v15 = vld [vmem:[%s9752_s1 + $0x20] sm:$0xff]  ;;  %v1895_v16 = vld [vmem:[%s9752_s1 + $0x28] sm:$0xff]  ;;  %vm1626_vm1 = vcmask 64512  }
   0xf   : > { %s9775_s25 = smov (!%p269_p3, %s5201_s25), 1  ;;  %s7457_s16 = smov 16   ;;  %v6852_v14 = vpack.c.bf16 %v1893_v11, %v1892_v9  ;;  %v6856_v17 = vpack.c.bf16 %v1895_v16, %v1894_v15  ;;  %v1896_v18 = vld [vmem:[%s9752_s1 + $0x30] sm:$0xff]  ;;  %v1897_v19 = vld [vmem:[%s9752_s1 + $0x38] sm:$0xff]  ;;  %v1898_v23 = vld [vmem:[%s9752_s1 + $0x40] sm:$0xff]  ;;  %vm1659_vm2 = vcmask 97280  }
  0x10   : > { %s7424_s26 = smul.u32 432, %s9775_s25  ;;  %6849 = vmatprep.subr.bf16.mxu0 %v6848_v10  ;;  %s7458_s23 = smov 20   ;;  %v6860_v22 = vpack.c.bf16 %v1897_v19, %v1896_v18  ;;  %v1899_v24 = vld [vmem:[%s9752_s1 + $0x48] sm:$0xff]  ;;  %v1900_v26 = vld [vmem:[%s9752_s1 + $0x50] sm:$0xff]  ;;  %v1901_v27 = vld [vmem:[%s9752_s1 + $0x58] sm:$0xff]  ;;  %vm1692_vm3 = vcmask 130048  }
  0x11   : > { %6851 = vmatpush3.bf16.msra.mxu0 %v6848_v10  ;;  %s7459_s15 = smov 24   ;;  %v6864_v25 = vpack.c.bf16 %v1899_v24, %v1898_v23  ;;  %v6868_v30 = vpack.c.bf16 %v1901_v27, %v1900_v26  ;;  %v1902_v31 = vld [vmem:[%s9752_s1 + $0x60] sm:$0xff]  ;;  %v1903_v32 = vld [vmem:[%s9752_s1 + $0x68] sm:$0xff]  ;;  %s7460_s28 = smov 28   ;;  %v1904_v34 = vld [vmem:[%s9752_s1 + $0x70] sm:$0xff]  ;;  %vm1725_vm4 = vcmask 162816  }
  0x12   : > { %s7517_s29 = scalar_lea.vmem %s9751_s0, %s7424_s26  ;;  %6853 = vmatprep.subr.bf16.mxu0 %v6852_v14  ;;  %v6872_v33 = vpack.c.bf16 %v1903_v32, %v1902_v31  ;;  %v1905_v35 = vld [vmem:[%s9752_s1 + $0x78] sm:$0xff]  ;;  %s7461_s14 = smov 32   ;;  %vm1758_vm5 = vcmask 195584   ;;  %vm1791_vm6 = vcmask 228352   ;;  %vm1824_vm7 = vcmask 261120  }
  0x13   : > { %v343_v0 = vld [vmem:[%s7517_s29 + $0x2] sm:$0xff]  ;;  %v344_v2 = vld [vmem:[%s7517_s29 + $0xa] sm:$0xff]  ;;  %v7531_v5 = vld [vmem:[%s7517_s29 + $0x18] sm:$0xff]  ;;  %v6876_v38 = vpack.c.bf16 %v1905_v35, %v1904_v34  ;;  %vm1857_vm8 = vcmask 293888  }
  0x14   : > { %v311_v1 = vld [vmem:[%s7517_s29 + $0x1] sm:$0xff]  ;;  %729 = vrot.lane.b32.xlu1 %v343_v0, %s7454_s30  ;;  %v312_v3 = vld [vmem:[%s7517_s29 + $0x9] sm:$0xff]  ;;  %v313_v6 = vld [vmem:[%s7517_s29 + $0x19] sm:$0xff] }
  0x15   : > { %601 = vrot.lane.b32.xlu0 %v311_v1, %s7455_s8  ;;  %v7528_v4 = vld [vmem:[%s7517_s29 + $0x20] sm:$0xff]  ;;  %6855 = vmatpush3.bf16.msra.mxu0 %v6852_v14  ;;  %v7571_v20 = vld [vmem:[%s7517_s29 + $0x30] sm:$0xff]  ;;  %v7594_v29 = vld [vmem:[%s7517_s29 + $0x38] sm:$0xff] }
  0x16   : > { %v5273_v12 = vld [vmem:[%s7517_s29 + $0x1a] sm:$0xff]  ;;  %v5274_v21 = vld [vmem:[%s7517_s29 + $0x22] sm:$0xff]  ;;  %6857 = vmatprep.subr.bf16.mxu0 %v6856_v17  ;;  %v5337_v28 = vld [vmem:[%s7517_s29 + $0x31] sm:$0xff] }
  0x17   : > { %v5242_v13 = vld [vmem:[%s7517_s29 + $0x21] sm:$0xff]  ;;  %v5369_v36 = vld [vmem:[%s7517_s29 + $0x32] sm:$0xff]  ;;  %v5339_v41 = vld [vmem:[%s7517_s29 + $0x49] sm:$0xff] }
  0x18   : > { %731 = vrot.lane.b32.xlu1 %v344_v2, %s7454_s30  ;;  %v5338_v37 = vld [vmem:[%s7517_s29 + $0x39] sm:$0xff]  ;;  %v7626_v40 = vld [vmem:[%s7517_s29 + $0x48] sm:$0xff]  ;;  %v7636_v42 = vld [vmem:[%s7517_s29 + $0x50] sm:$0xff] }
  0x19   : > { %603 = vrot.lane.b32.xlu0 %v312_v3, %s7455_s8  ;;  %6859 = vmatpush3.bf16.msra.mxu0 %v6856_v17  ;;  %v5370_v39 = vld [vmem:[%s7517_s29 + $0x3a] sm:$0xff]  ;;  %v5371_v43 = vld [vmem:[%s7517_s29 + $0x4a] sm:$0xff]  ;;  %v5372_v45 = vld [vmem:[%s7517_s29 + $0x52] sm:$0xff] }
  0x1a   : > { %6861 = vmatprep.subr.bf16.mxu0 %v6860_v22  ;;  %v5340_v44 = vld [vmem:[%s7517_s29 + $0x51] sm:$0xff]  ;;  %v7656_v46 = vld [vmem:[%s7517_s29 + $0x60] sm:$0xff]  ;;  %v7666_v48 = vld [vmem:[%s7517_s29 + $0x68] sm:$0xff] }
  0x1b   : > { %v5341_v47 = vld [vmem:[%s7517_s29 + $0x61] sm:$0xff]  ;;  %v5342_v50 = vld [vmem:[%s7517_s29 + $0x69] sm:$0xff]  ;;  %v7686_v54 = vld [vmem:[%s7517_s29 + $0x78] sm:$0xff] }
  0x1c   : > { %859 = vrot.lane.b32.xlu1 %v7528_v4, %s7456_s9  ;;  %v5373_v49 = vld [vmem:[%s7517_s29 + $0x62] sm:$0xff]  ;;  %v5374_v51 = vld [vmem:[%s7517_s29 + $0x6a] sm:$0xff]  ;;  %v5343_v59 = vld [vmem:[%s7517_s29 + $0x79] sm:$0xff] }
  0x1d   : > { %857 = vrot.lane.b32.xlu0 %v7531_v5, %s7456_s9  ;;  %6863 = vmatpush3.bf16.msra.mxu0 %v6860_v22  ;;  %v7700_v60 = vld [vmem:[%s7517_s29 + $0x80] sm:$0xff]  ;;  %v7733_v17 = vld [vmem:[%s7517_s29 + $0x90] sm:$0xff]  ;;  %v280_v22 = vld [vmem:[%s7517_s29 + $0x8] sm:$0xff] }
  0x1e   : > { %6865 = vmatprep.subr.bf16.mxu0 %v6864_v25  ;;  %v5375_v1 = vld [vmem:[%s7517_s29 + $0x7a] sm:$0xff]  ;;  %v5376_v9 = vld [vmem:[%s7517_s29 + $0x82] sm:$0xff] }
  0x1f   : > { %v5344_v2 = vld [vmem:[%s7517_s29 + $0x81] sm:$0xff]  ;;  %v7758_v34 = vld [vmem:[%s7517_s29 + $0x98] sm:$0xff] }
  0x20   : > { %605 = vrot.lane.b32.xlu1 %v313_v6, %s7455_s8 }
  0x21   : > { %985 = vrot.lane.b32.xlu0 %v313_v6, %s7457_s16  ;;  %6867 = vmatpush3.bf16.msra.mxu0 %v6864_v25 }
  0x22   : > { %6869 = vmatprep.subr.bf16.mxu0 %v6868_v30 }
  0x24   : > { %1113 = vrot.lane.b32.xlu1 %v5273_v12, %s7458_s23 }
  0x25   : > { %987 = vrot.lane.b32.xlu0 %v5242_v13, %s7457_s16  ;;  %6871 = vmatpush3.bf16.msra.mxu0 %v6868_v30 }
  0x26   : > { %6873 = vmatprep.subr.bf16.mxu0 %v6872_v33 }
  0x28   : > { %733 = vrot.lane.b32.xlu1 %v5273_v12, %s7454_s30  ;;  %v279_v12 = vld [vmem:[%s7517_s29] sm:$0xff] }
  0x29   : > { %607 = vrot.lane.b32.xlu0 %v5242_v13, %s7455_s8  ;;  %6875 = vmatpush3.bf16.msra.mxu0 %v6872_v33  ;;  %v5345_v33 = vld [vmem:[%s7517_s29 + $0x91] sm:$0xff] }
  0x2a   : > { %6877 = vmatprep.subr.bf16.mxu0 %v6876_v38 }
  0x2c   : > { %1241 = vrot.lane.b32.xlu1 %v7571_v20, %s7459_s15 }
  0x2d   : > { %1115 = vrot.lane.b32.xlu0 %v5274_v21, %s7458_s23  ;;  %6879 = vmatpush3.bf16.msra.mxu0 %v6876_v38 }
  0x30   : > { %861 = vrot.lane.b32.xlu1 %v7571_v20, %s7456_s9 }
  0x31   : > { %735 = vrot.lane.b32.xlu0 %v5274_v21, %s7454_s30 }
  0x34   : > { %1369 = vrot.lane.b32.xlu1 %v5337_v28, %s7460_s28 }
  0x35   : > { %1243 = vrot.lane.b32.xlu0 %v7594_v29, %s7459_s15 }
  0x38   : > { %989 = vrot.lane.b32.xlu1 %v5337_v28, %s7457_s16 }
  0x39   : > { %863 = vrot.lane.b32.xlu0 %v7594_v29, %s7456_s9 }
  0x3c   : > { %1497 = vrot.lane.b32.xlu1 %v5369_v36, %s7461_s14 }
  0x3d   : > { %1371 = vrot.lane.b32.xlu0 %v5338_v37, %s7460_s28 }
  0x40   : > { %991 = vrot.lane.b32.xlu1 %v5338_v37, %s7457_s16 }
  0x41   : > { %609 = vrot.lane.b32.xlu0 %v5337_v28, %s7455_s8 }
  0x44   : > { %1499 = vrot.lane.b32.xlu1 %v5370_v39, %s7461_s14 }
  0x45   : > { %1117 = vrot.lane.b32.xlu0 %v5369_v36, %s7458_s23 }
  0x48   : > { %737 = vrot.lane.b32.xlu1 %v5369_v36, %s7454_s30 }
  0x49   : > { %611 = vrot.lane.b32.xlu0 %v5338_v37, %s7455_s8 }
  0x4c   : > { %1245 = vrot.lane.b32.xlu1 %v7626_v40, %s7459_s15 }
  0x4d   : > { %1119 = vrot.lane.b32.xlu0 %v5370_v39, %s7458_s23 }
  0x50   : > { %865 = vrot.lane.b32.xlu1 %v7626_v40, %s7456_s9 }
  0x51   : > { %739 = vrot.lane.b32.xlu0 %v5370_v39, %s7454_s30 }
  0x54   : > { %1373 = vrot.lane.b32.xlu1 %v5339_v41, %s7460_s28 }
  0x55   : > { %1247 = vrot.lane.b32.xlu0 %v7636_v42, %s7459_s15 }
  0x58   : > { %993 = vrot.lane.b32.xlu1 %v5339_v41, %s7457_s16 }
  0x59   : > { %867 = vrot.lane.b32.xlu0 %v7636_v42, %s7456_s9 }
  0x5c   : > { %1501 = vrot.lane.b32.xlu1 %v5371_v43, %s7461_s14 }
  0x5d   : > { %1375 = vrot.lane.b32.xlu0 %v5340_v44, %s7460_s28 }
  0x60   : > { %995 = vrot.lane.b32.xlu1 %v5340_v44, %s7457_s16 }
  0x61   : > { %613 = vrot.lane.b32.xlu0 %v5339_v41, %s7455_s8 }
  0x64   : > { %1503 = vrot.lane.b32.xlu1 %v5372_v45, %s7461_s14 }
  0x65   : > { %1121 = vrot.lane.b32.xlu0 %v5371_v43, %s7458_s23 }
  0x68   : > { %741 = vrot.lane.b32.xlu1 %v5371_v43, %s7454_s30 }
  0x69   : > { %615 = vrot.lane.b32.xlu0 %v5340_v44, %s7455_s8 }
  0x6c   : > { %1249 = vrot.lane.b32.xlu1 %v7656_v46, %s7459_s15 }
  0x6d   : > { %1123 = vrot.lane.b32.xlu0 %v5372_v45, %s7458_s23 }
  0x70   : > { %869 = vrot.lane.b32.xlu1 %v7656_v46, %s7456_s9 }
  0x71   : > { %743 = vrot.lane.b32.xlu0 %v5372_v45, %s7454_s30 }
  0x74   : > { %1377 = vrot.lane.b32.xlu1 %v5341_v47, %s7460_s28 }
  0x75   : > { %1251 = vrot.lane.b32.xlu0 %v7666_v48, %s7459_s15 }
  0x78   : > { %997 = vrot.lane.b32.xlu1 %v5341_v47, %s7457_s16 }
  0x79   : > { %871 = vrot.lane.b32.xlu0 %v7666_v48, %s7456_s9 }
  0x7c   : > { %1505 = vrot.lane.b32.xlu1 %v5373_v49, %s7461_s14 }
  0x7d   : > { %1379 = vrot.lane.b32.xlu0 %v5342_v50, %s7460_s28 }
  0x80   : > { %999 = vrot.lane.b32.xlu1 %v5342_v50, %s7457_s16 }
  0x81   : > { %617 = vrot.lane.b32.xlu0 %v5341_v47, %s7455_s8 }
  0x84   : > { %1507 = vrot.lane.b32.xlu1 %v5374_v51, %s7461_s14 }
  0x85   : > { %1125 = vrot.lane.b32.xlu0 %v5373_v49, %s7458_s23 }
  0x86   : > { %v730_v52 = vpop.permute.xlu1 %729 }
  0x87   : > { %v602_v53 = vpop.permute.xlu0 %601 }
  0x88   : > { %745 = vrot.lane.b32.xlu1 %v5373_v49, %s7454_s30  ;;  %v1594_v13 = vsel %vm1593_vm0, %v279_v12, %v602_v53  ;;  %v5377_v49 = vld [vmem:[%s7517_s29 + $0x92] sm:$0xff] }
  0x89   : > { %619 = vrot.lane.b32.xlu0 %v5342_v50, %s7455_s8  ;;  %v1627_v16 = vsel %vm1626_vm1, %v1594_v13, %v730_v52  ;;  %v5346_v50 = vld [vmem:[%s7517_s29 + $0x99] sm:$0xff] }
  0x8a   : > { %v7688_v55 = vpop.permute.xlu1 %731 }
  0x8b   : > { %v604_v56 = vpop.permute.xlu0 %603 }
  0x8c   : > { %1253 = vrot.lane.b32.xlu1 %v7686_v54, %s7459_s15  ;;  %v1595_v26 = vsel %vm1593_vm0, %v280_v22, %v604_v56  ;;  %v5378_v56 = vld [vmem:[%s7517_s29 + $0x9a] sm:$0xff] }
  0x8d   : > { %1127 = vrot.lane.b32.xlu0 %v5374_v51, %s7458_s23  ;;  %v1628_v32 = vsel %vm1626_vm1, %v1595_v26, %v7688_v55 }
  0x8e   : > { %v7693_v57 = vpop.permute.xlu1 %859 }
  0x8f   : > { %v858_v58 = vpop.permute.xlu0 %857  ;;  %v1661_v35 = vsel %vm1659_vm2, %v1628_v32, %v7693_v57 }
  0x90   : > { %873 = vrot.lane.b32.xlu1 %v7686_v54, %s7456_s9  ;;  %v1660_v18 = vsel %vm1659_vm2, %v1627_v16, %v858_v58  ;;  %v5347_v16 = vld [vmem:[%s7517_s29 + $0xa9] sm:$0xff] }
  0x91   : > { %747 = vrot.lane.b32.xlu0 %v5374_v51, %s7454_s30 }
  0x92   : > { %v7702_v61 = vpop.permute.xlu1 %605 }
  0x93   : > { %v986_v62 = vpop.permute.xlu0 %985 }
  0x94   : > { %1381 = vrot.lane.b32.xlu1 %v5343_v59, %s7460_s28  ;;  %v1693_v23 = vsel %vm1692_vm3, %v1660_v18, %v986_v62  ;;  %v7827_v18 = vld [vmem:[%s7517_s29 + $0xb0] sm:$0xff] }
  0x95   : > { %1255 = vrot.lane.b32.xlu0 %v7700_v60, %s7459_s15 }
  0x96   : > { %v1114_v63 = vpop.permute.xlu1 %1113 }
  0x97   : > { %v988_v0 = vpop.permute.xlu0 %987  ;;  %v1726_v24 = vsel %vm1725_vm4, %v1693_v23, %v1114_v63  ;;  %v1596_v63 = vsel %vm1593_vm0, %v7531_v5, %v7702_v61 }
  0x98   : > { %1001 = vrot.lane.b32.xlu1 %v5343_v59, %s7457_s16  ;;  %v1694_v38 = vsel %vm1692_vm3, %v1661_v35, %v988_v0  ;;  %v5380_v35 = vld [vmem:[%s7517_s29 + $0xb2] sm:$0xff] }
  0x99   : > { %875 = vrot.lane.b32.xlu0 %v7700_v60, %s7456_s9 }
  0x9a   : > { %v7712_v3 = vpop.permute.xlu1 %733 }
  0x9b   : > { %v7714_v6 = vpop.permute.xlu0 %607  ;;  %v1629_v0 = vsel %vm1626_vm1, %v1596_v63, %v7712_v3  ;;  %v5349_v63 = vld [vmem:[%s7517_s29 + $0xc1] sm:$0xff] }
  0x9c   : > { %1509 = vrot.lane.b32.xlu1 %v5375_v1, %s7461_s14 }
  0x9d   : > { %1383 = vrot.lane.b32.xlu0 %v5344_v2, %s7460_s28 }
  0x9e   : > { %v1242_v7 = vpop.permute.xlu1 %1241 }
  0x9f   : > { %v1116_v8 = vpop.permute.xlu0 %1115  ;;  %v1759_v25 = vsel %vm1758_vm5, %v1726_v24, %v1242_v7 }
  0xa0   : > { %1003 = vrot.lane.b32.xlu1 %v5344_v2, %s7457_s16  ;;  %v1727_v39 = vsel %vm1725_vm4, %v1694_v38, %v1116_v8 }
  0xa1   : > { %621 = vrot.lane.b32.xlu0 %v5343_v59, %s7455_s8 }
  0xa2   : > { %v7721_v10 = vpop.permute.xlu1 %861 }
  0xa3   : > { %v7723_v11 = vpop.permute.xlu0 %735 }
  0xa4   : > { %1511 = vrot.lane.b32.xlu1 %v5376_v9, %s7461_s14 }
  0xa5   : > { %1129 = vrot.lane.b32.xlu0 %v5375_v1, %s7458_s23 }
  0xa6   : > { %v1370_v14 = vpop.permute.xlu1 %1369 }
  0xa7   : > { %v1244_v15 = vpop.permute.xlu0 %1243  ;;  %v1792_v27 = vsel %vm1791_vm6, %v1759_v25, %v1370_v14  ;;  %v1597_v14 = vsel %vm1593_vm0, %v7528_v4, %v7714_v6 }
  0xa8   : > { %749 = vrot.lane.b32.xlu1 %v5375_v1, %s7454_s30  ;;  %v1760_v41 = vsel %vm1758_vm5, %v1727_v39, %v1244_v15  ;;  %v7801_v1 = vld [vmem:[%s7517_s29 + $0xa8] sm:$0xff]  ;;  %v1630_v15 = vsel %vm1626_vm1, %v1597_v14, %v7723_v11  ;;  %v5486_v14 = vld [vmem:[%s9755_s4 + $0x218] sm:$0xff] }
  0xa9   : > { %623 = vrot.lane.b32.xlu0 %v5344_v2, %s7455_s8  ;;  %v1662_v2 = vsel %vm1659_vm2, %v1629_v0, %v7721_v10  ;;  %v7897_v0 = vld [vmem:[%s7517_s29 + $0xc8] sm:$0xff] }
  0xaa   : > { %v7736_v19 = vpop.permute.xlu1 %989 }
  0xab   : > { %v7738_v21 = vpop.permute.xlu0 %863  ;;  %v1695_v5 = vsel %vm1692_vm3, %v1662_v2, %v7736_v19 }
  0xac   : > { %1257 = vrot.lane.b32.xlu1 %v7733_v17, %s7459_s15  ;;  %v1663_v19 = vsel %vm1659_vm2, %v1630_v15, %v7738_v21 }
  0xad   : > { %1131 = vrot.lane.b32.xlu0 %v5376_v9, %s7458_s23 }
  0xae   : > { %v1498_v28 = vpop.permute.xlu1 %1497 }
  0xaf   : > { %v1372_v30 = vpop.permute.xlu0 %1371  ;;  %v1825_v31 = vsel %vm1824_vm7, %v1792_v27, %v1498_v28  ;;  %v5379_v27 = vld [vmem:[%s7517_s29 + $0xaa] sm:$0xff] }
  0xb0   : > { %877 = vrot.lane.b32.xlu1 %v7733_v17, %s7456_s9  ;;  %6080 = vmatprep.mubr.msk.f32.mxu0 %vm1857_vm8, %v1825_v31  ;;  %v1793_v43 = vsel %vm1791_vm6, %v1760_v41, %v1372_v30  ;;  %v5348_v28 = vld [vmem:[%s7517_s29 + $0xb1] sm:$0xff] }
  0xb1   : > { %751 = vrot.lane.b32.xlu0 %v5376_v9, %s7454_s30 }
  0xb2   : > { %v992_v36 = vpop.permute.xlu1 %991 }
  0xb3   : > { %v7762_v37 = vpop.permute.xlu0 %609  ;;  %v1696_v6 = vsel %vm1692_vm3, %v1663_v19, %v992_v36  ;;  %v5381_v19 = vld [vmem:[%s7517_s29 + $0xc2] sm:$0xff] }
  0xb4   : > { %1385 = vrot.lane.b32.xlu1 %v5345_v33, %s7460_s28 }
  0xb5   : > { %1259 = vrot.lane.b32.xlu0 %v7758_v34, %s7459_s15 }
  0xb6   : > { %v1500_v44 = vpop.permute.xlu1 %1499 }
  0xb7   : > { %v1118_v45 = vpop.permute.xlu0 %1117  ;;  %v1826_v47 = vsel %vm1824_vm7, %v1793_v43, %v1500_v44  ;;  %v1598_v43 = vsel %vm1593_vm0, %v7571_v20, %v7762_v37 }
  0xb8   : > { %1005 = vrot.lane.b32.xlu1 %v5345_v33, %s7457_s16  ;;  %6081 = vmatmul.mubr.msk.f32.vlgmr.msra.gmra.mrb[0].mxu0 %vm1857_vm8, %v1826_v47  ;;  %v1728_v61 = vsel %vm1725_vm4, %v1695_v5, %v1118_v45  ;;  %v7870_v45 = vld [vmem:[%s7517_s29 + $0xc0] sm:$0xff] }
  0xb9   : > { %879 = vrot.lane.b32.xlu0 %v7758_v34, %s7456_s9 }
  0xba   : > { %v7778_v51 = vpop.permute.xlu1 %737 }
  0xbb   : > { %v7780_v52 = vpop.permute.xlu0 %611  ;;  %v1631_v44 = vsel %vm1626_vm1, %v1598_v43, %v7778_v51  ;;  %v5492_v43 = vld [vmem:[%s9755_s4 + $0x248] sm:$0xff] }
  0xbc   : > { %1513 = vrot.lane.b32.xlu1 %v5377_v49, %s7461_s14 }
  0xbd   : > { %1387 = vrot.lane.b32.xlu0 %v5346_v50, %s7460_s28 }
  0xbe   : > { %v1246_v53 = vpop.permute.xlu1 %1245 }
  0xbf   : > { %v1120_v55 = vpop.permute.xlu0 %1119  ;;  %v1761_v3 = vsel %vm1758_vm5, %v1728_v61, %v1246_v53 }
  0xc0   : > { %1007 = vrot.lane.b32.xlu1 %v5346_v50, %s7457_s16  ;;  %v1729_v23 = vsel %vm1725_vm4, %v1696_v6, %v1120_v55 }
  0xc1   : > { %625 = vrot.lane.b32.xlu0 %v5345_v33, %s7455_s8 }
  0xc2   : > { %v7787_v57 = vpop.permute.xlu1 %865 }
  0xc3   : > { %v7789_v58 = vpop.permute.xlu0 %739  ;;  %v1664_v47 = vsel %vm1659_vm2, %v1631_v44, %v7787_v57 }
  0xc4   : > { %1515 = vrot.lane.b32.xlu1 %v5378_v56, %s7461_s14 }
  0xc5   : > { %1133 = vrot.lane.b32.xlu0 %v5377_v49, %s7458_s23 }
  0xc6   : > { %v1374_v59 = vpop.permute.xlu1 %1373 }
  0xc7   : > { %v1248_v62 = vpop.permute.xlu0 %1247  ;;  %v1794_v9 = vsel %vm1791_vm6, %v1761_v3, %v1374_v59  ;;  %v1599_v59 = vsel %vm1593_vm0, %v7594_v29, %v7780_v52  ;;  %v5483_v29 = vld [vmem:[%s9755_s4 + $0x200] sm:$0xff]  ;;  %v5484_v52 = vld [vmem:[%s9755_s4 + $0x208] sm:$0xff] }
  0xc8   : > { %753 = vrot.lane.b32.xlu1 %v5377_v49, %s7454_s30  ;;  %v1762_v11 = vsel %vm1758_vm5, %v1729_v23, %v1248_v62  ;;  %v1632_v62 = vsel %vm1626_vm1, %v1599_v59, %v7789_v58  ;;  %v7008_v61 = vpack.c.bf16 %v5484_v52, %v5483_v29 }
  0xc9   : > { %627 = vrot.lane.b32.xlu0 %v5346_v50, %s7455_s8 }
  0xca   : > { %v994_v7 = vpop.permute.xlu1 %993  ;;  %7009 = vmatprep.subr.bf16.mxu1 %v7008_v61 }
  0xcb   : > { %v7805_v8 = vpop.permute.xlu0 %867  ;;  %v1697_v20 = vsel %vm1692_vm3, %v1664_v47, %v994_v7  ;;  %7011 = vmatpush3.bf16.msra.mxu1 %v7008_v61 }
  0xcc   : > { %1261 = vrot.lane.b32.xlu1 %v7801_v1, %s7459_s15  ;;  %v1665_v2 = vsel %vm1659_vm2, %v1632_v62, %v7805_v8 }
  0xcd   : > { %1135 = vrot.lane.b32.xlu0 %v5378_v56, %s7458_s23 }
  0xce   : > { %v1502_v10 = vpop.permute.xlu1 %1501 }
  0xcf   : > { %v1376_v12 = vpop.permute.xlu0 %1375  ;;  %v1827_v13 = vsel %vm1824_vm7, %v1794_v9, %v1502_v10 }
  0xd0   : > { %881 = vrot.lane.b32.xlu1 %v7801_v1, %s7456_s9  ;;  %6083 = vmatprep.mubr.msk.f32.mxu0 %vm1857_vm8, %v1827_v13  ;;  %v1795_v24 = vsel %vm1791_vm6, %v1762_v11, %v1376_v12  ;;  %v5485_v13 = vld [vmem:[%s9755_s4 + $0x210] sm:$0xff]  ;;  %v5487_v11 = vld [vmem:[%s9755_s4 + $0x220] sm:$0xff] }
  0xd1   : > { %755 = vrot.lane.b32.xlu0 %v5378_v56, %s7454_s30 }
  0xd2   : > { %v996_v22 = vpop.permute.xlu1 %995 }
  0xd3   : > { %v7831_v4 = vpop.permute.xlu0 %613  ;;  %v1698_v58 = vsel %vm1692_vm3, %v1665_v2, %v996_v22  ;;  %v5350_v22 = vld [vmem:[%s7517_s29 + $0xc9] sm:$0xff] }
  0xd4   : > { %1389 = vrot.lane.b32.xlu1 %v5347_v16, %s7460_s28 }
  0xd5   : > { %1263 = vrot.lane.b32.xlu0 %v7827_v18, %s7459_s15 }
  0xd6   : > { %v1504_v25 = vpop.permute.xlu1 %1503 }
  0xd7   : > { %v1122_v21 = vpop.permute.xlu0 %1121  ;;  %v1828_v26 = vsel %vm1824_vm7, %v1795_v24, %v1504_v25  ;;  %v5488_v24 = vld [vmem:[%s9755_s4 + $0x228] sm:$0xff] }
  0xd8   : > { %1009 = vrot.lane.b32.xlu1 %v5347_v16, %s7457_s16  ;;  %6084 = vmatmul.mubr.msk.f32.gmra.mrb[2].mxu0 %vm1857_vm8, %v1828_v26  ;;  %v1730_v37 = vsel %vm1725_vm4, %v1697_v20, %v1122_v21  ;;  %v7016_v25 = vpack.c.bf16 %v5488_v24, %v5487_v11 }
  0xd9   : > { %883 = vrot.lane.b32.xlu0 %v7827_v18, %s7456_s9 }
  0xda   : > { %v7847_v30 = vpop.permute.xlu1 %741 }
  0xdb   : > { %v7849_v31 = vpop.permute.xlu0 %615 }
  0xdc   : > { %1517 = vrot.lane.b32.xlu1 %v5379_v27, %s7461_s14 }
  0xdd   : > { %1391 = vrot.lane.b32.xlu0 %v5348_v28, %s7460_s28 }
  0xde   : > { %v1250_v32 = vpop.permute.xlu1 %1249 }
  0xdf   : > { %v1124_v33 = vpop.permute.xlu0 %1123  ;;  %v1763_v51 = vsel %vm1758_vm5, %v1730_v37, %v1250_v32  ;;  %v5493_v37 = vld [vmem:[%s9755_s4 + $0x250] sm:$0xff] }
  0xe0   : > { %1011 = vrot.lane.b32.xlu1 %v5348_v28, %s7457_s16  ;;  %v1731_v3 = vsel %vm1725_vm4, %v1698_v58, %v1124_v33  ;;  %v5382_v33 = vld [vmem:[%s7517_s29 + $0xca] sm:$0xff] }
  0xe1   : > { %629 = vrot.lane.b32.xlu0 %v5347_v16, %s7455_s8  ;;  %v7012_v16 = vpack.c.bf16 %v5486_v14, %v5485_v13  ;;  %v8023_v13 = vld [vmem:[%s7517_s29 + $0xd9] sm:$0xff] }
  0xe2   : > { %v7856_v36 = vpop.permute.xlu1 %869  ;;  %v8026_v14 = vld [vmem:[%s7517_s29 + $0xe0] sm:$0xff] }
  0xe3   : > { %v7858_v38 = vpop.permute.xlu0 %743  ;;  %7013 = vmatprep.subr.bf16.mxu1 %v7012_v16 }
  0xe4   : > { %1519 = vrot.lane.b32.xlu1 %v5380_v35, %s7461_s14  ;;  %7015 = vmatpush3.bf16.msra.mxu1 %v7012_v16 }
  0xe5   : > { %1137 = vrot.lane.b32.xlu0 %v5379_v27, %s7458_s23  ;;  %7017 = vmatprep.subr.bf16.mxu1 %v7016_v25 }
  0xe6   : > { %v1378_v39 = vpop.permute.xlu1 %1377 }
  0xe7   : > { %v1252_v41 = vpop.permute.xlu0 %1251  ;;  %v1796_v53 = vsel %vm1791_vm6, %v1763_v51, %v1378_v39  ;;  %v5494_v51 = vld [vmem:[%s9755_s4 + $0x258] sm:$0xff] }
  0xe8   : > { %757 = vrot.lane.b32.xlu1 %v5379_v27, %s7454_s30  ;;  %v1764_v8 = vsel %vm1758_vm5, %v1731_v3, %v1252_v41  ;;  %7019 = vmatpush3.bf16.msra.mxu1 %v7016_v25  ;;  %v5489_v27 = vld [vmem:[%s9755_s4 + $0x230] sm:$0xff]  ;;  %v5491_v41 = vld [vmem:[%s9755_s4 + $0x240] sm:$0xff]  ;;  %v5498_v3 = vld [vmem:[%s9755_s4 + $0x278] sm:$0xff] }
  0xe9   : > { %631 = vrot.lane.b32.xlu0 %v5348_v28, %s7455_s8  ;;  %v5490_v28 = vld [vmem:[%s9755_s4 + $0x238] sm:$0xff]  ;;  %v7024_v44 = vpack.c.bf16 %v5492_v43, %v5491_v41 }
  0xea   : > { %v7874_v49 = vpop.permute.xlu1 %997  ;;  %v7020_v32 = vpack.c.bf16 %v5490_v28, %v5489_v27  ;;  %v5383_v25 = vld [vmem:[%s7517_s29 + $0xda] sm:$0xff] }
  0xeb   : > { %v7876_v50 = vpop.permute.xlu0 %871 }
  0xec   : > { %1265 = vrot.lane.b32.xlu1 %v7870_v45, %s7459_s15  ;;  %7021 = vmatprep.subr.bf16.mxu1 %v7020_v32 }
  0xed   : > { %1139 = vrot.lane.b32.xlu0 %v5380_v35, %s7458_s23  ;;  %7023 = vmatpush3.bf16.msra.mxu1 %v7020_v32 }
  0xee   : > { %v1506_v55 = vpop.permute.xlu1 %1505  ;;  %7025 = vmatprep.subr.bf16.mxu1 %v7024_v44 }
  0xef   : > { %v1380_v56 = vpop.permute.xlu0 %1379  ;;  %v1829_v57 = vsel %vm1824_vm7, %v1796_v53, %v1506_v55  ;;  %v7028_v53 = vpack.c.bf16 %v5494_v51, %v5493_v37  ;;  %v1600_v55 = vsel %vm1593_vm0, %v7626_v40, %v7831_v4  ;;  %v5495_v40 = vld [vmem:[%s9755_s4 + $0x260] sm:$0xff]  ;;  %v5496_v4 = vld [vmem:[%s9755_s4 + $0x268] sm:$0xff]  ;;  %v8078_v51 = vld [vmem:[%s7517_s29 + $0xf0] sm:$0xff] }
  0xf0   : > { %885 = vrot.lane.b32.xlu1 %v7870_v45, %s7456_s9  ;;  %6086 = vmatprep.mubr.msk.f32.mxu0 %vm1857_vm8, %v1829_v57  ;;  %v1797_v9 = vsel %vm1791_vm6, %v1764_v8, %v1380_v56  ;;  %v1633_v56 = vsel %vm1626_vm1, %v1600_v55, %v7847_v30  ;;  %v7982_v57 = vld [vmem:[%s7517_s29 + $0xd8] sm:$0xff]  ;;  %v7032_v2 = vpack.c.bf16 %v5496_v4, %v5495_v40 }
  0xf1   : > { %759 = vrot.lane.b32.xlu0 %v5380_v35, %s7454_s30  ;;  %7027 = vmatpush3.bf16.msra.mxu1 %v7024_v44  ;;  %v1666_v59 = vsel %vm1659_vm2, %v1633_v56, %v7856_v36 }
  0xf2   : > { %v7901_v7 = vpop.permute.xlu1 %999  ;;  %7029 = vmatprep.subr.bf16.mxu1 %v7028_v53  ;;  %v1699_v30 = vsel %vm1692_vm3, %v1666_v59, %v7874_v49  ;;  %v5497_v49 = vld [vmem:[%s9755_s4 + $0x270] sm:$0xff] }
  0xf3   : > { %v7903_v5 = vpop.permute.xlu0 %617 }
  0xf4   : > { %1393 = vrot.lane.b32.xlu1 %v5349_v63, %s7460_s28 }
  0xf5   : > { %1267 = vrot.lane.b32.xlu0 %v7897_v0, %s7459_s15  ;;  %7031 = vmatpush3.bf16.msra.mxu1 %v7028_v53 }
  0xf6   : > { %v1508_v10 = vpop.permute.xlu1 %1507  ;;  %7033 = vmatprep.subr.bf16.mxu1 %v7032_v2 }
  0xf7   : > { %v1126_v12 = vpop.permute.xlu0 %1125  ;;  %v1830_v15 = vsel %vm1824_vm7, %v1797_v9, %v1508_v10  ;;  %v7036_v9 = vpack.c.bf16 %v5498_v3, %v5497_v49  ;;  %v1601_v10 = vsel %vm1593_vm0, %v7636_v42, %v7849_v31 }
  0xf8   : > { %1013 = vrot.lane.b32.xlu1 %v5349_v63, %s7457_s16  ;;  %6087 = vmatmul.mubr.msk.f32.gmra.mrb[4].mxu0 %vm1857_vm8, %v1830_v15  ;;  %v1732_v29 = vsel %vm1725_vm4, %v1699_v30, %v1126_v12  ;;  %v1634_v12 = vsel %vm1626_vm1, %v1601_v10, %v7858_v38 }
  0xf9   : > { %887 = vrot.lane.b32.xlu0 %v7897_v0, %s7456_s9  ;;  %7035 = vmatpush3.bf16.msra.mxu1 %v7032_v2  ;;  %v1667_v15 = vsel %vm1659_vm2, %v1634_v12, %v7876_v50  ;;  %v5353_v2 = vld [vmem:[%s7517_s29 + $0xf1] sm:$0xff] }
  0xfa   : > { %v7931_v6 = vpop.permute.xlu1 %745  ;;  %7037 = vmatprep.subr.bf16.mxu1 %v7036_v9  ;;  %v1700_v31 = vsel %vm1692_vm3, %v1667_v15, %v7901_v7 }
  0xfb   : > { %v7933_v23 = vpop.permute.xlu0 %619 }
  0xfc   : > { %1521 = vrot.lane.b32.xlu1 %v5381_v19, %s7461_s14  ;;  %v1603_v30 = vsel %vm1593_vm0, %v7666_v48, %v7933_v23 }
  0xfd   : > { %1395 = vrot.lane.b32.xlu0 %v5350_v22, %s7460_s28  ;;  %7039 = vmatpush3.bf16.msra.mxu1 %v7036_v9  ;;  %v5354_v9 = vld [vmem:[%s7517_s29 + $0xf9] sm:$0xff] }
  0xfe   : > { %v1254_v21 = vpop.permute.xlu1 %1253 }
  0xff   : > { %v7943_v26 = vpop.permute.xlu0 %1127  ;;  %v1765_v36 = vsel %vm1758_vm5, %v1732_v29, %v1254_v21  ;;  %v5352_v21 = vld [vmem:[%s7517_s29 + $0xe1] sm:$0xff]  ;;  %v8104_v29 = vld [vmem:[%s7517_s29 + $0xf8] sm:$0xff] }
 0x100   : > { %1015 = vrot.lane.b32.xlu1 %v5350_v22, %s7457_s16  ;;  %v1733_v38 = vsel %vm1725_vm4, %v1700_v31, %v7943_v26 }
 0x101   : > { %633 = vrot.lane.b32.xlu0 %v5349_v63, %s7455_s8 }
 0x102   : > { %v7954_v35 = vpop.permute.xlu1 %873 }
 0x103   : > { %v7956_v39 = vpop.permute.xlu0 %747 }
 0x104   : > { %1523 = vrot.lane.b32.xlu1 %v5382_v33, %s7461_s14 }
 0x105   : > { %1141 = vrot.lane.b32.xlu0 %v5381_v19, %s7458_s23 }
 0x106   : > { %v1382_v47 = vpop.permute.xlu1 %1381 }
 0x107   : > { %v7966_v20 = vpop.permute.xlu0 %1255  ;;  %v1798_v52 = vsel %vm1791_vm6, %v1765_v36, %v1382_v47 }
 0x108   : > { %761 = vrot.lane.b32.xlu1 %v5381_v19, %s7454_s30  ;;  %v7462_v19 = vmov 0.0   ;;  %v1766_v50 = vsel %vm1758_vm5, %v1733_v38, %v7966_v20  ;;  %v1602_v20 = vsel %vm1593_vm0, %v7656_v46, %v7903_v5 }
 0x109   : > { %635 = vrot.lane.b32.xlu0 %v5350_v22, %s7455_s8  ;;  %2277 = vst [vmem:[#allocation2 + $0x8] sm:$0xff] %v7462_v19  ;;  %2241 = vst [vmem:[#allocation2] sm:$0xff] %v7462_v19  ;;  %v1635_v37 = vsel %vm1626_vm1, %v1602_v20, %v7931_v6  ;;  %v5355_v20 = vld [vmem:[%s7517_s29 + $0x109] sm:$0xff] }
 0x10a   : > { %v7986_v62 = vpop.permute.xlu1 %1001  ;;  %2242 = vst [vmem:[#allocation2 + $0x20] sm:$0xff] %v7462_v19  ;;  %2243 = vst [vmem:[#allocation2 + $0x40] sm:$0xff] %v7462_v19  ;;  %v1668_v53 = vsel %vm1659_vm2, %v1635_v37, %v7954_v35  ;;  %v8173_v37 = vld [vmem:[%s7517_s29 + $0x110] sm:$0xff] }
 0x10b   : > { %v7988_v63 = vpop.permute.xlu0 %875  ;;  %2244 = vst [vmem:[#allocation2 + $0x60] sm:$0xff] %v7462_v19  ;;  %2245 = vst [vmem:[#allocation2 + $0x80] sm:$0xff] %v7462_v19  ;;  %v1701_v46 = vsel %vm1692_vm3, %v1668_v53, %v7986_v62  ;;  %v1636_v62 = vsel %vm1626_vm1, %v1603_v30, %v7956_v39 }
 0x10c   : > { %1269 = vrot.lane.b32.xlu1 %v7982_v57, %s7459_s15  ;;  %2246 = vst [vmem:[#allocation2 + $0xa0] sm:$0xff] %v7462_v19  ;;  %2247 = vst [vmem:[#allocation2 + $0xc0] sm:$0xff] %v7462_v19  ;;  %v1669_v36 = vsel %vm1659_vm2, %v1636_v62, %v7988_v63 }
 0x10d   : > { %1143 = vrot.lane.b32.xlu0 %v5382_v33, %s7458_s23  ;;  %2248 = vst [vmem:[#allocation2 + $0xe0] sm:$0xff] %v7462_v19  ;;  %2249 = vst [vmem:[#allocation2 + $0x100] sm:$0xff] %v7462_v19 }
 0x10e   : > { %v1510_v58 = vpop.permute.xlu1 %1509  ;;  %2250 = vst [vmem:[#allocation2 + $0x120] sm:$0xff] %v7462_v19  ;;  %2251 = vst [vmem:[#allocation2 + $0x140] sm:$0xff] %v7462_v19 }
 0x10f   : > { %v8004_v61 = vpop.permute.xlu0 %1383  ;;  %v1831_v8 = vsel %vm1824_vm7, %v1798_v52, %v1510_v58  ;;  %2252 = vst [vmem:[#allocation2 + $0x160] sm:$0xff] %v7462_v19  ;;  %2253 = vst [vmem:[#allocation2 + $0x180] sm:$0xff] %v7462_v19 }
 0x110   : > { %889 = vrot.lane.b32.xlu1 %v7982_v57, %s7456_s9  ;;  %6089 = vmatprep.mubr.msk.f32.mxu0 %vm1857_vm8, %v1831_v8  ;;  %2254 = vst [vmem:[#allocation2 + $0x1a0] sm:$0xff] %v7462_v19  ;;  %2255 = vst [vmem:[#allocation2 + $0x1c0] sm:$0xff] %v7462_v19  ;;  %v1799_v7 = vsel %vm1791_vm6, %v1766_v50, %v8004_v61  ;;  %v5385_v8 = vld [vmem:[%s7517_s29 + $0xf2] sm:$0xff] }
 0x111   : > { %763 = vrot.lane.b32.xlu0 %v5382_v33, %s7454_s30  ;;  %2256 = vst [vmem:[#allocation2 + $0x1e0] sm:$0xff] %v7462_v19  ;;  %2257 = vst [vmem:[#allocation2 + $0x200] sm:$0xff] %v7462_v19  ;;  %v5384_v33 = vld [vmem:[%s7517_s29 + $0xe2] sm:$0xff] }
 0x112   : > { %v8030_v16 = vpop.permute.xlu1 %1003  ;;  %2258 = vst [vmem:[#allocation2 + $0x220] sm:$0xff] %v7462_v19  ;;  %2259 = vst [vmem:[#allocation2 + $0x18] sm:$0xff] %v7462_v19 }
 0x113   : > { %v8032_v42 = vpop.permute.xlu0 %621  ;;  %2260 = vst [vmem:[#allocation2 + $0x38] sm:$0xff] %v7462_v19  ;;  %2261 = vst [vmem:[#allocation2 + $0x58] sm:$0xff] %v7462_v19  ;;  %v1702_v23 = vsel %vm1692_vm3, %v1669_v36, %v8030_v16  ;;  %v5386_v16 = vld [vmem:[%s7517_s29 + $0xfa] sm:$0xff]  ;;  %v5388_v36 = vld [vmem:[%s7517_s29 + $0x112] sm:$0xff] }
 0x114   : > { %1397 = vrot.lane.b32.xlu1 %v8023_v13, %s7460_s28  ;;  %2262 = vst [vmem:[#allocation2 + $0x78] sm:$0xff] %v7462_v19  ;;  %2263 = vst [vmem:[#allocation2 + $0x98] sm:$0xff] %v7462_v19 }
 0x115   : > { %1271 = vrot.lane.b32.xlu0 %v8026_v14, %s7459_s15  ;;  %2264 = vst [vmem:[#allocation2 + $0xb8] sm:$0xff] %v7462_v19  ;;  %2265 = vst [vmem:[#allocation2 + $0xd8] sm:$0xff] %v7462_v19 }
 0x116   : > { %2266 = vst [vmem:[#allocation2 + $0xf8] sm:$0xff] %v7462_v19  ;;  %2267 = vst [vmem:[#allocation2 + $0x118] sm:$0xff] %v7462_v19  ;;  %v1512_v22 = vpop.permute.xlu1 %1511 }
 0x117   : > { %2268 = vst [vmem:[#allocation2 + $0x138] sm:$0xff] %v7462_v19  ;;  %2269 = vst [vmem:[#allocation2 + $0x158] sm:$0xff] %v7462_v19  ;;  %v1130_v11 = vpop.permute.xlu0 %1129  ;;  %v1832_v24 = vsel %vm1824_vm7, %v1799_v7, %v1512_v22  ;;  %v1604_v7 = vsel %vm1593_vm0, %v7686_v54, %v8032_v42 }
 0x118   : > { %2270 = vst [vmem:[#allocation2 + $0x178] sm:$0xff] %v7462_v19  ;;  %2271 = vst [vmem:[#allocation2 + $0x198] sm:$0xff] %v7462_v19  ;;  %1017 = vrot.lane.b32.xlu1 %v8023_v13, %s7457_s16  ;;  %6090 = vmatmul.mubr.msk.f32.gmra.mrb[6].mxu0 %vm1857_vm8, %v1832_v24  ;;  %v1734_v5 = vsel %vm1725_vm4, %v1701_v46, %v1130_v11  ;;  %v8148_v11 = vld [vmem:[%s7517_s29 + $0x108] sm:$0xff] }
 0x119   : > { %2272 = vst [vmem:[#allocation2 + $0x1b8] sm:$0xff] %v7462_v19  ;;  %2273 = vst [vmem:[#allocation2 + $0x1d8] sm:$0xff] %v7462_v19  ;;  %891 = vrot.lane.b32.xlu0 %v8026_v14, %s7456_s9 }
 0x11a   : > { %2274 = vst [vmem:[#allocation2 + $0x1f8] sm:$0xff] %v7462_v19  ;;  %2275 = vst [vmem:[#allocation2 + $0x218] sm:$0xff] %v7462_v19  ;;  %v8054_v26 = vpop.permute.xlu1 %749 }
 0x11b   : > { %2276 = vst [vmem:[#allocation2 + $0x238] sm:$0xff] %v7462_v19  ;;  %2278 = vst [vmem:[#allocation2 + $0x10] sm:$0xff] %v7462_v19  ;;  %v8056_v27 = vpop.permute.xlu0 %623  ;;  %v1637_v22 = vsel %vm1626_vm1, %v1604_v7, %v8054_v26  ;;  %v5357_v7 = vld [vmem:[%s7517_s29 + $0x121] sm:$0xff] }
 0x11c   : > { %2311 = vst [vmem:[#allocation2 + $0x228] sm:$0xff] %v7462_v19  ;;  %2312 = vst [vmem:[#allocation2 + $0x230] sm:$0xff] %v7462_v19  ;;  %1525 = vrot.lane.b32.xlu1 %v5383_v25, %s7461_s14 }
 0x11d   : > { %1399 = vrot.lane.b32.xlu0 %v5352_v21, %s7460_s28 }
 0x11e   : > { %v1258_v28 = vpop.permute.xlu1 %1257 }
 0x11f   : > { %v1132_v32 = vpop.permute.xlu0 %1131  ;;  %v1767_v6 = vsel %vm1758_vm5, %v1734_v5, %v1258_v28 }
 0x120   : > { %1019 = vrot.lane.b32.xlu1 %v5352_v21, %s7457_s16  ;;  %v1735_v58 = vsel %vm1725_vm4, %v1702_v23, %v1132_v32 }
 0x121   : > { %637 = vrot.lane.b32.xlu0 %v8023_v13, %s7455_s8 }
 0x122   : > { %v8064_v41 = vpop.permute.xlu1 %877 }
 0x123   : > { %v8066_v43 = vpop.permute.xlu0 %751  ;;  %v1670_v24 = vsel %vm1659_vm2, %v1637_v22, %v8064_v41  ;;  %v8241_v22 = vld [vmem:[%s7517_s29 + $0x128] sm:$0xff] }
 0x124   : > { %1527 = vrot.lane.b32.xlu1 %v5384_v33, %s7461_s14 }
 0x125   : > { %1145 = vrot.lane.b32.xlu0 %v5383_v25, %s7458_s23 }
 0x126   : > { %v1386_v44 = vpop.permute.xlu1 %1385 }
 0x127   : > { %v1260_v47 = vpop.permute.xlu0 %1259  ;;  %v1800_v59 = vsel %vm1791_vm6, %v1767_v6, %v1386_v44  ;;  %v1605_v44 = vsel %vm1593_vm0, %v7700_v60, %v8056_v27 }
 0x128   : > { %765 = vrot.lane.b32.xlu1 %v5383_v25, %s7454_s30  ;;  %v1768_v39 = vsel %vm1758_vm5, %v1735_v58, %v1260_v47  ;;  %v1638_v47 = vsel %vm1626_vm1, %v1605_v44, %v8066_v43 }
 0x129   : > { %639 = vrot.lane.b32.xlu0 %v5352_v21, %s7455_s8 }
 0x12a   : > { %v1006_v55 = vpop.permute.xlu1 %1005 }
 0x12b   : > { %v8082_v56 = vpop.permute.xlu0 %879  ;;  %v1703_v28 = vsel %vm1692_vm3, %v1670_v24, %v1006_v55 }
 0x12c   : > { %1273 = vrot.lane.b32.xlu1 %v8078_v51, %s7459_s15  ;;  %v1671_v53 = vsel %vm1659_vm2, %v1638_v47, %v8082_v56 }
 0x12d   : > { %1147 = vrot.lane.b32.xlu0 %v5384_v33, %s7458_s23 }
 0x12e   : > { %v1514_v35 = vpop.permute.xlu1 %1513 }
 0x12f   : > { %v1388_v40 = vpop.permute.xlu0 %1387  ;;  %v1833_v4 = vsel %vm1824_vm7, %v1800_v59, %v1514_v35  ;;  %v5387_v35 = vld [vmem:[%s7517_s29 + $0x10a] sm:$0xff] }
 0x130   : > { %893 = vrot.lane.b32.xlu1 %v8078_v51, %s7456_s9  ;;  %6092 = vmatprep.mubr.msk.f32.mxu0 %vm1857_vm8, %v1833_v4  ;;  %v1801_v61 = vsel %vm1791_vm6, %v1768_v39, %v1388_v40  ;;  %v5356_v40 = vld [vmem:[%s7517_s29 + $0x111] sm:$0xff] }
 0x131   : > { %767 = vrot.lane.b32.xlu0 %v5384_v33, %s7454_s30 }
 0x132   : > { %v1008_v52 = vpop.permute.xlu1 %1007 }
 0x133   : > { %v8108_v48 = vpop.permute.xlu0 %625  ;;  %v1704_v27 = vsel %vm1692_vm3, %v1671_v53, %v1008_v52  ;;  %v5390_v53 = vld [vmem:[%s7517_s29 + $0x12a] sm:$0xff] }
 0x134   : > { %1401 = vrot.lane.b32.xlu1 %v5353_v2, %s7460_s28 }
 0x135   : > { %1275 = vrot.lane.b32.xlu0 %v8104_v29, %s7459_s15 }
 0x136   : > { %v1516_v49 = vpop.permute.xlu1 %1515 }
 0x137   : > { %v1134_v63 = vpop.permute.xlu0 %1133  ;;  %v1834_v3 = vsel %vm1824_vm7, %v1801_v61, %v1516_v49  ;;  %v1606_v61 = vsel %vm1593_vm0, %v7733_v17, %v8108_v48 }
 0x138   : > { %1021 = vrot.lane.b32.xlu1 %v5353_v2, %s7457_s16  ;;  %6093 = vmatmul.mubr.msk.f32.gmra.mrb[8].mxu0 %vm1857_vm8, %v1834_v3  ;;  %v1736_v54 = vsel %vm1725_vm4, %v1703_v28, %v1134_v63  ;;  %v8216_v63 = vld [vmem:[%s7517_s29 + $0x120] sm:$0xff] }
 0x139   : > { %895 = vrot.lane.b32.xlu0 %v8104_v29, %s7456_s9 }
 0x13a   : > { %v8125_v10 = vpop.permute.xlu1 %753 }
 0x13b   : > { %v8127_v12 = vpop.permute.xlu0 %627  ;;  %v1639_v49 = vsel %vm1626_vm1, %v1606_v61, %v8125_v10 }
 0x13c   : > { %1529 = vrot.lane.b32.xlu1 %v5385_v8, %s7461_s14 }
 0x13d   : > { %1403 = vrot.lane.b32.xlu0 %v5354_v9, %s7460_s28 }
 0x13e   : > { %v1262_v13 = vpop.permute.xlu1 %1261 }
 0x13f   : > { %v1136_v15 = vpop.permute.xlu0 %1135  ;;  %v1769_v42 = vsel %vm1758_vm5, %v1736_v54, %v1262_v13 }
 0x140   : > { %1023 = vrot.lane.b32.xlu1 %v5354_v9, %s7457_s16  ;;  %v1737_v46 = vsel %vm1725_vm4, %v1704_v27, %v1136_v15 }
 0x141   : > { %641 = vrot.lane.b32.xlu0 %v5353_v2, %s7455_s8 }
 0x142   : > { %v8134_v31 = vpop.permute.xlu1 %881 }
 0x143   : > { %v8136_v38 = vpop.permute.xlu0 %755  ;;  %v1672_v3 = vsel %vm1659_vm2, %v1639_v49, %v8134_v31 }
 0x144   : > { %1531 = vrot.lane.b32.xlu1 %v5386_v16, %s7461_s14 }
 0x145   : > { %1149 = vrot.lane.b32.xlu0 %v5385_v8, %s7458_s23 }
 0x146   : > { %v1390_v19 = vpop.permute.xlu1 %1389 }
 0x147   : > { %v1264_v50 = vpop.permute.xlu0 %1263  ;;  %v1802_v26 = vsel %vm1791_vm6, %v1769_v42, %v1390_v19  ;;  %v1607_v19 = vsel %vm1593_vm0, %v7758_v34, %v8127_v12 }
 0x148   : > { %769 = vrot.lane.b32.xlu1 %v5385_v8, %s7454_s30  ;;  %v1770_v43 = vsel %vm1758_vm5, %v1737_v46, %v1264_v50  ;;  %v1640_v50 = vsel %vm1626_vm1, %v1607_v19, %v8136_v38 }
 0x149   : > { %643 = vrot.lane.b32.xlu0 %v5354_v9, %s7455_s8 }
 0x14a   : > { %v1010_v25 = vpop.permute.xlu1 %1009 }
 0x14b   : > { %v8152_v21 = vpop.permute.xlu0 %883  ;;  %v1705_v13 = vsel %vm1692_vm3, %v1672_v3, %v1010_v25 }
 0x14c   : > { %1277 = vrot.lane.b32.xlu1 %v8148_v11, %s7459_s15  ;;  %v1673_v24 = vsel %vm1659_vm2, %v1640_v50, %v8152_v21 }
 0x14d   : > { %1151 = vrot.lane.b32.xlu0 %v5386_v16, %s7458_s23 }
 0x14e   : > { %v1518_v32 = vpop.permute.xlu1 %1517 }
 0x14f   : > { %v1392_v33 = vpop.permute.xlu0 %1391  ;;  %v1835_v41 = vsel %vm1824_vm7, %v1802_v26, %v1518_v32  ;;  %v5389_v32 = vld [vmem:[%s7517_s29 + $0x122] sm:$0xff] }
 0x150   : > { %897 = vrot.lane.b32.xlu1 %v8148_v11, %s7456_s9  ;;  %6095 = vmatprep.mubr.msk.f32.mxu0 %vm1857_vm8, %v1835_v41  ;;  %v1803_v5 = vsel %vm1791_vm6, %v1770_v43, %v1392_v33  ;;  %v5358_v33 = vld [vmem:[%s7517_s29 + $0x129] sm:$0xff] }
 0x151   : > { %771 = vrot.lane.b32.xlu0 %v5386_v16, %s7454_s30 }
 0x152   : > { %v1012_v55 = vpop.permute.xlu1 %1011 }
 0x153   : > { %v8177_v60 = vpop.permute.xlu0 %629  ;;  %v1706_v12 = vsel %vm1692_vm3, %v1673_v24, %v1012_v55 }
 0x154   : > { %1405 = vrot.lane.b32.xlu1 %v5355_v20, %s7460_s28 }
 0x155   : > { %1279 = vrot.lane.b32.xlu0 %v8173_v37, %s7459_s15 }
 0x156   : > { %v1520_v6 = vpop.permute.xlu1 %1519 }
 0x157   : > { %v1138_v56 = vpop.permute.xlu0 %1137  ;;  %v1836_v59 = vsel %vm1824_vm7, %v1803_v5, %v1520_v6  ;;  %v1608_v5 = vsel %vm1593_vm0, %v7801_v1, %v8177_v60  ;;  %v8297_v1 = vld [vmem:[%s9753_s2] ss:$0 sm:$0xff] }
 0x158   : > { %1025 = vrot.lane.b32.xlu1 %v5355_v20, %s7457_s16  ;;  %6096 = vmatmul.mubr.msk.f32.gmra.mrb[10].mxu0 %vm1857_vm8, %v1836_v59  ;;  %v1738_v17 = vsel %vm1725_vm4, %v1705_v13, %v1138_v56  ;;  %v8286_v56 = vld [vmem:[%s7517_s29 + $0x138] sm:$0xff] }
 0x159   : > { %899 = vrot.lane.b32.xlu0 %v8173_v37, %s7456_s9 }
 0x15a   : > { %v8193_v4 = vpop.permute.xlu1 %757 }
 0x15b   : > { %v8195_v30 = vpop.permute.xlu0 %631  ;;  %v1641_v6 = vsel %vm1626_vm1, %v1608_v5, %v8193_v4  ;;  %v8304_v4 = vld [vmem:[%s9754_s3] ss:$0 sm:$0xff] }
 0x15c   : > { %1533 = vrot.lane.b32.xlu1 %v5387_v35, %s7461_s14 }
 0x15d   : > { %1407 = vrot.lane.b32.xlu0 %v5356_v40, %s7460_s28 }
 0x15e   : > { %v1266_v62 = vpop.permute.xlu1 %1265 }
 0x15f   : > { %v1140_v2 = vpop.permute.xlu0 %1139  ;;  %v1771_v48 = vsel %vm1758_vm5, %v1738_v17, %v1266_v62  ;;  %v1609_v17 = vsel %vm1593_vm0, %v7827_v18, %v8195_v30 }
 0x160   : > { %1027 = vrot.lane.b32.xlu1 %v5356_v40, %s7457_s16  ;;  %v1739_v28 = vsel %vm1725_vm4, %v1706_v12, %v1140_v2 }
 0x161   : > { %645 = vrot.lane.b32.xlu0 %v5355_v20, %s7455_s8 }
 0x162   : > { %v8202_v52 = vpop.permute.xlu1 %885 }
 0x163   : > { %v8204_v23 = vpop.permute.xlu0 %759  ;;  %v1674_v59 = vsel %vm1659_vm2, %v1641_v6, %v8202_v52  ;;  %v8373_v6 = vld [vmem:[%s7517_s29 + $0x150] sm:$0xff] }
 0x164   : > { %1535 = vrot.lane.b32.xlu1 %v5388_v36, %s7461_s14 }
 0x165   : > { %1153 = vrot.lane.b32.xlu0 %v5387_v35, %s7458_s23 }
 0x166   : > { %v1394_v58 = vpop.permute.xlu1 %1393 }
 0x167   : > { %v1268_v39 = vpop.permute.xlu0 %1267  ;;  %v1804_v10 = vsel %vm1791_vm6, %v1771_v48, %v1394_v58 }
 0x168   : > { %773 = vrot.lane.b32.xlu1 %v5387_v35, %s7454_s30  ;;  %v1772_v38 = vsel %vm1758_vm5, %v1739_v28, %v1268_v39 }
 0x169   : > { %647 = vrot.lane.b32.xlu0 %v5356_v40, %s7455_s8 }
 0x16a   : > { %v1014_v8 = vpop.permute.xlu1 %1013 }
 0x16b   : > { %v8220_v9 = vpop.permute.xlu0 %887  ;;  %v1707_v60 = vsel %vm1692_vm3, %v1674_v59, %v1014_v8 }
 0x16c   : > { %1281 = vrot.lane.b32.xlu1 %v8216_v63, %s7459_s15 }
 0x16d   : > { %1155 = vrot.lane.b32.xlu0 %v5388_v36, %s7458_s23 }
 0x16e   : > { %v1522_v15 = vpop.permute.xlu1 %1521 }
 0x16f   : > { %v1396_v16 = vpop.permute.xlu0 %1395  ;;  %v1837_v31 = vsel %vm1824_vm7, %v1804_v10, %v1522_v15  ;;  %v1642_v10 = vsel %vm1626_vm1, %v1609_v17, %v8204_v23 }
 0x170   : > { %901 = vrot.lane.b32.xlu1 %v8216_v63, %s7456_s9  ;;  %6098 = vmatprep.mubr.msk.f32.mxu0 %vm1857_vm8, %v1837_v31  ;;  %v1805_v54 = vsel %vm1791_vm6, %v1772_v38, %v1396_v16  ;;  %v5359_v16 = vld [vmem:[%s7517_s29 + $0x139] sm:$0xff]  ;;  %v1675_v19 = vsel %vm1659_vm2, %v1642_v10, %v8220_v9 }
 0x171   : > { %775 = vrot.lane.b32.xlu0 %v5388_v36, %s7454_s30  ;;  %v8327_v31 = vld [vmem:[%s7517_s29 + $0x140] sm:$0xff]  ;;  %v8405_v10 = vld [vmem:[%s7517_s29 + $0x158] sm:$0xff] }
 0x172   : > { %v8245_v25 = vpop.permute.xlu1 %1015  ;;  %v5391_v38 = vld [vmem:[%s7517_s29 + $0x13a] sm:$0xff] }
 0x173   : > { %v8247_v34 = vpop.permute.xlu0 %633 }
 0x174   : > { %1409 = vrot.lane.b32.xlu1 %v5357_v7, %s7460_s28 }
 0x175   : > { %1283 = vrot.lane.b32.xlu0 %v8241_v22, %s7459_s15 }
 0x176   : > { %v1524_v42 = vpop.permute.xlu1 %1523 }
 0x177   : > { %v1142_v21 = vpop.permute.xlu0 %1141  ;;  %v1838_v26 = vsel %vm1824_vm7, %v1805_v54, %v1524_v42  ;;  %v5360_v54 = vld [vmem:[%s7517_s29 + $0x141] sm:$0xff] }
 0x178   : > { %1029 = vrot.lane.b32.xlu1 %v5357_v7, %s7457_s16  ;;  %6099 = vmatmul.mubr.msk.f32.gmra.mrb[12].mxu0 %vm1857_vm8, %v1838_v26  ;;  %v1740_v62 = vsel %vm1725_vm4, %v1707_v60, %v1142_v21 }
 0x179   : > { %903 = vrot.lane.b32.xlu0 %v8241_v22, %s7456_s9 }
 0x17a   : > { %v8263_v41 = vpop.permute.xlu1 %761 }
 0x17b   : > { %v8265_v44 = vpop.permute.xlu0 %635 }
 0x17c   : > { %1537 = vrot.lane.b32.xlu1 %v5389_v32, %s7461_s14 }
 0x17d   : > { %1411 = vrot.lane.b32.xlu0 %v5358_v33, %s7460_s28 }
 0x17e   : > { %v1270_v47 = vpop.permute.xlu1 %1269 }
 0x17f   : > { %v1144_v20 = vpop.permute.xlu0 %1143  ;;  %v1773_v36 = vsel %vm1758_vm5, %v1740_v62, %v1270_v47 }
 0x180   : > { %1031 = vrot.lane.b32.xlu1 %v5358_v33, %s7457_s16 }
 0x181   : > { %649 = vrot.lane.b32.xlu0 %v5357_v7, %s7455_s8  ;;  %v1708_v7 = vsel %vm1692_vm3, %v1675_v19, %v8245_v25 }
 0x182   : > { %v8272_v55 = vpop.permute.xlu1 %889  ;;  %v1741_v23 = vsel %vm1725_vm4, %v1708_v7, %v1144_v20 }
 0x183   : > { %v8274_v27 = vpop.permute.xlu0 %763 }
 0x184   : > { %1539 = vrot.lane.b32.xlu1 %v5390_v53, %s7461_s14 }
 0x185   : > { %1157 = vrot.lane.b32.xlu0 %v5389_v32, %s7458_s23 }
 0x186   : > { %v1398_v46 = vpop.permute.xlu1 %1397 }
 0x187   : > { %v1272_v43 = vpop.permute.xlu0 %1271  ;;  %v1806_v39 = vsel %vm1791_vm6, %v1773_v36, %v1398_v46 }
 0x188   : > { %777 = vrot.lane.b32.xlu1 %v5389_v32, %s7454_s30  ;;  %v1774_v9 = vsel %vm1758_vm5, %v1741_v23, %v1272_v43  ;;  %v1610_v43 = vsel %vm1593_vm0, %v7870_v45, %v8247_v34 }
 0x189   : > { %651 = vrot.lane.b32.xlu0 %v5358_v33, %s7455_s8  ;;  %v5392_v33 = vld [vmem:[%s7517_s29 + $0x142] sm:$0xff]  ;;  %v1643_v5 = vsel %vm1626_vm1, %v1610_v43, %v8263_v41 }
 0x18a   : > { %v8290_v35 = vpop.permute.xlu1 %1017  ;;  %v1676_v59 = vsel %vm1659_vm2, %v1643_v5, %v8272_v55  ;;  %v8451_v5 = vld [vmem:[%s7517_s29 + $0x168] sm:$0xff] }
 0x18b   : > { %v8292_v40 = vpop.permute.xlu0 %891  ;;  %v6082_v2 = vpop.f32.mrb[0].mxu0 }
 0x18c   : > { %1285 = vrot.lane.b32.xlu1 %v8286_v56, %s7459_s15  ;;  %v2139_v52 = vmul.f32 %v6082_v2, %v8297_v1  ;;  %v1972_v58 = vpop.f32.mrb[1].mxu0  ;;  %v1709_v2 = vsel %vm1692_vm3, %v1676_v59, %v8290_v35 }
 0x18d   : > { %1159 = vrot.lane.b32.xlu0 %v5390_v53, %s7458_s23  ;;  %v2138_v61 = vmul.f32 %v8297_v1, %v1972_v58 }
 0x18e   : > { %v1526_v49 = vpop.permute.xlu1 %1525  ;;  %v2178_v8 = vadd.f32 %v8304_v4, %v2139_v52 }
 0x18f   : > { %v1400_v3 = vpop.permute.xlu0 %1399  ;;  %v1839_v13 = vsel %vm1824_vm7, %v1806_v39, %v1526_v49  ;;  %v2177_v48 = vadd.f32 %v8304_v4, %v2138_v61 }
 0x190   : > { %905 = vrot.lane.b32.xlu1 %v8286_v56, %s7456_s9  ;;  %v2210_v15 = vmax.f32 %v2178_v8, 0.0  ;;  %6101 = vmatprep.mubr.msk.f32.mxu0 %vm1857_vm8, %v1839_v13  ;;  %v1807_v24 = vsel %vm1791_vm6, %v1774_v9, %v1400_v3  ;;  %v1611_v3 = vsel %vm1593_vm0, %v7897_v0, %v8265_v44  ;;  %v5393_v9 = vld [vmem:[%s7517_s29 + $0x152] sm:$0xff] }
 0x191   : > { %779 = vrot.lane.b32.xlu0 %v5390_v53, %s7454_s30  ;;  %v2209_v18 = vmax.f32 %v2177_v48, 0.0  ;;  %v1644_v13 = vsel %vm1626_vm1, %v1611_v3, %v8274_v27  ;;  %v5361_v48 = vld [vmem:[%s7517_s29 + $0x151] sm:$0xff] }
 0x192   : > { %v8331_v30 = vpop.permute.xlu1 %1019  ;;  %2280 = vst [vmem:[#allocation2 + $0x30] sm:$0xff] %v2210_v15 }
 0x193   : > { %v8333_v50 = vpop.permute.xlu0 %637  ;;  %2279 = vst [vmem:[#allocation2 + $0x28] sm:$0xff] %v2209_v18  ;;  %6480 = vmatprep.mubr.f32.mxu1 %v2209_v18 }
 0x194   : > { %1413 = vrot.lane.b32.xlu1 %v5359_v16, %s7460_s28  ;;  %6481 = vmatmul.mubr.f32.vlgmr.msra.gmra.mrb[0].mxu1 %v2210_v15  ;;  %v1677_v15 = vsel %vm1659_vm2, %v1644_v13, %v8292_v40  ;;  %v8485_v13 = vld [vmem:[%s7517_s29 + $0x170] sm:$0xff] }
 0x195   : > { %1287 = vrot.lane.b32.xlu0 %v8327_v31, %s7459_s15  ;;  %v1710_v19 = vsel %vm1692_vm3, %v1677_v15, %v8331_v30 }
 0x196   : > { %v1528_v12 = vpop.permute.xlu1 %1527 }
 0x197   : > { %v1146_v28 = vpop.permute.xlu0 %1145  ;;  %v1840_v25 = vsel %vm1824_vm7, %v1807_v24, %v1528_v12  ;;  %v5362_v24 = vld [vmem:[%s7517_s29 + $0x159] sm:$0xff] }
 0x198   : > { %1033 = vrot.lane.b32.xlu1 %v5359_v16, %s7457_s16  ;;  %6102 = vmatmul.mubr.msk.f32.gmra.mrb[14].mxu0 %vm1857_vm8, %v1840_v25  ;;  %v1742_v45 = vsel %vm1725_vm4, %v1709_v2, %v1146_v28 }
 0x199   : > { %907 = vrot.lane.b32.xlu0 %v8327_v31, %s7456_s9 }
 0x19a   : > { %v8350_v42 = vpop.permute.xlu1 %765 }
 0x19b   : > { %v8352_v21 = vpop.permute.xlu0 %639 }
 0x19c   : > { %1541 = vrot.lane.b32.xlu1 %v5391_v38, %s7461_s14 }
 0x19d   : > { %1415 = vrot.lane.b32.xlu0 %v5360_v54, %s7460_s28 }
 0x19e   : > { %v1274_v26 = vpop.permute.xlu1 %1273 }
 0x19f   : > { %v1148_v32 = vpop.permute.xlu0 %1147  ;;  %v1775_v41 = vsel %vm1758_vm5, %v1742_v45, %v1274_v26 }
 0x1a0   : > { %1035 = vrot.lane.b32.xlu1 %v5360_v54, %s7457_s16  ;;  %v1743_v27 = vsel %vm1725_vm4, %v1710_v19, %v1148_v32 }
 0x1a1   : > { %653 = vrot.lane.b32.xlu0 %v5359_v16, %s7455_s8 }
 0x1a2   : > { %v8359_v47 = vpop.permute.xlu1 %893 }
 0x1a3   : > { %v8361_v20 = vpop.permute.xlu0 %767 }
 0x1a4   : > { %1543 = vrot.lane.b32.xlu1 %v5392_v33, %s7461_s14 }
 0x1a5   : > { %1161 = vrot.lane.b32.xlu0 %v5391_v38, %s7458_s23 }
 0x1a6   : > { %v1402_v53 = vpop.permute.xlu1 %1401 }
 0x1a7   : > { %v1276_v46 = vpop.permute.xlu0 %1275  ;;  %v1808_v52 = vsel %vm1791_vm6, %v1775_v41, %v1402_v53 }
 0x1a8   : > { %781 = vrot.lane.b32.xlu1 %v5391_v38, %s7454_s30  ;;  %v1776_v40 = vsel %vm1758_vm5, %v1743_v27, %v1276_v46  ;;  %v1612_v46 = vsel %vm1593_vm0, %v7982_v57, %v8333_v50 }
 0x1a9   : > { %655 = vrot.lane.b32.xlu0 %v5360_v54, %s7455_s8  ;;  %v5394_v54 = vld [vmem:[%s7517_s29 + $0x15a] sm:$0xff]  ;;  %v1645_v43 = vsel %vm1626_vm1, %v1612_v46, %v8350_v42  ;;  %v5436_v46 = vld [vmem:[%s9755_s4 + $0x88] sm:$0xff] }
 0x1aa   : > { %v8377_v60 = vpop.permute.xlu1 %1021  ;;  %v1678_v59 = vsel %vm1659_vm2, %v1645_v43, %v8359_v47 }
 0x1ab   : > { %v8379_v62 = vpop.permute.xlu0 %895  ;;  %v6085_v34 = vpop.f32.mrb[2].mxu0 }
 0x1ac   : > { %1289 = vrot.lane.b32.xlu1 %v8373_v6, %s7459_s15  ;;  %v2141_v55 = vmul.f32 %v6085_v34, %v8297_v1  ;;  %v1982_v36 = vpop.f32.mrb[3].mxu0  ;;  %v1711_v34 = vsel %vm1692_vm3, %v1678_v59, %v8377_v60 }
 0x1ad   : > { %1163 = vrot.lane.b32.xlu0 %v5392_v33, %s7458_s23  ;;  %v2140_v58 = vmul.f32 %v8297_v1, %v1982_v36 }
 0x1ae   : > { %v1530_v35 = vpop.permute.xlu1 %1529  ;;  %v2180_v61 = vadd.f32 %v8304_v4, %v2141_v55 }
 0x1af   : > { %v1404_v39 = vpop.permute.xlu0 %1403  ;;  %v1841_v49 = vsel %vm1824_vm7, %v1808_v52, %v1530_v35  ;;  %v2179_v8 = vadd.f32 %v8304_v4, %v2140_v58 }
 0x1b0   : > { %909 = vrot.lane.b32.xlu1 %v8373_v6, %s7456_s9  ;;  %v2212_v17 = vmax.f32 %v2180_v61, 0.0  ;;  %6104 = vmatprep.mubr.msk.f32.mxu0 %vm1857_vm8, %v1841_v49  ;;  %v1809_v18 = vsel %vm1791_vm6, %v1776_v40, %v1404_v39  ;;  %v1613_v39 = vsel %vm1593_vm0, %v8026_v14, %v8352_v21  ;;  %v5395_v40 = vld [vmem:[%s7517_s29 + $0x16a] sm:$0xff] }
 0x1b1   : > { %783 = vrot.lane.b32.xlu0 %v5392_v33, %s7454_s30  ;;  %v2211_v0 = vmax.f32 %v2179_v8, 0.0  ;;  %v1646_v49 = vsel %vm1626_vm1, %v1613_v39, %v8361_v20  ;;  %v5363_v8 = vld [vmem:[%s7517_s29 + $0x169] sm:$0xff] }
 0x1b2   : > { %v8409_v44 = vpop.permute.xlu1 %1023  ;;  %2282 = vst [vmem:[#allocation2 + $0x50] sm:$0xff] %v2212_v17  ;;  %v1679_v14 = vsel %vm1659_vm2, %v1646_v49, %v8379_v62 }
 0x1b3   : > { %v8411_v16 = vpop.permute.xlu0 %641  ;;  %2281 = vst [vmem:[#allocation2 + $0x48] sm:$0xff] %v2211_v0  ;;  %6483 = vmatprep.mubr.f32.mxu1 %v2211_v0  ;;  %v1712_v15 = vsel %vm1692_vm3, %v1679_v14, %v8409_v44 }
 0x1b4   : > { %1417 = vrot.lane.b32.xlu1 %v5361_v48, %s7460_s28  ;;  %6484 = vmatmul.mubr.f32.gmra.mrb[2].mxu1 %v2212_v17  ;;  %v1614_v43 = vsel %vm1593_vm0, %v8078_v51, %v8411_v16 }
 0x1b5   : > { %1291 = vrot.lane.b32.xlu0 %v8405_v10, %s7459_s15 }
 0x1b6   : > { %v1532_v7 = vpop.permute.xlu1 %1531 }
 0x1b7   : > { %v1150_v23 = vpop.permute.xlu0 %1149  ;;  %v1842_v30 = vsel %vm1824_vm7, %v1809_v18, %v1532_v7  ;;  %v5364_v18 = vld [vmem:[%s7517_s29 + $0x171] sm:$0xff] }
 0x1b8   : > { %1037 = vrot.lane.b32.xlu1 %v5361_v48, %s7457_s16  ;;  %6105 = vmatmul.mubr.msk.f32.gmra.mrb[16].mxu0 %vm1857_vm8, %v1842_v30  ;;  %v1744_v57 = vsel %vm1725_vm4, %v1711_v34, %v1150_v23 }
 0x1b9   : > { %911 = vrot.lane.b32.xlu0 %v8405_v10, %s7456_s9 }
 0x1ba   : > { %v8428_v12 = vpop.permute.xlu1 %769 }
 0x1bb   : > { %v8430_v28 = vpop.permute.xlu0 %643  ;;  %v1647_v34 = vsel %vm1626_vm1, %v1614_v43, %v8428_v12  ;;  %v5437_v12 = vld [vmem:[%s9755_s4 + $0x90] sm:$0xff] }
 0x1bc   : > { %1545 = vrot.lane.b32.xlu1 %v5393_v9, %s7461_s14 }
 0x1bd   : > { %1419 = vrot.lane.b32.xlu0 %v5362_v24, %s7460_s28 }
 0x1be   : > { %v1278_v25 = vpop.permute.xlu1 %1277 }
 0x1bf   : > { %v1152_v38 = vpop.permute.xlu0 %1151  ;;  %v1777_v42 = vsel %vm1758_vm5, %v1744_v57, %v1278_v25  ;;  %v5333_v57 = vld [vmem:[%s7517_s29 + $0x180] sm:$0xff] }
 0x1c0   : > { %1039 = vrot.lane.b32.xlu1 %v5362_v24, %s7457_s16  ;;  %v1745_v20 = vsel %vm1725_vm4, %v1712_v15, %v1152_v38  ;;  %v5439_v15 = vld [vmem:[%s9755_s4 + $0xa0] sm:$0xff] }
 0x1c1   : > { %657 = vrot.lane.b32.xlu0 %v5361_v48, %s7455_s8 }
 0x1c2   : > { %v8437_v26 = vpop.permute.xlu1 %897 }
 0x1c3   : > { %v8439_v32 = vpop.permute.xlu0 %771 }
 0x1c4   : > { %1547 = vrot.lane.b32.xlu1 %v5394_v54, %s7461_s14 }
 0x1c5   : > { %1165 = vrot.lane.b32.xlu0 %v5393_v9, %s7458_s23 }
 0x1c6   : > { %v1406_v33 = vpop.permute.xlu1 %1405 }
 0x1c7   : > { %v1280_v53 = vpop.permute.xlu0 %1279  ;;  %v1810_v55 = vsel %vm1791_vm6, %v1777_v42, %v1406_v33 }
 0x1c8   : > { %785 = vrot.lane.b32.xlu1 %v5393_v9, %s7454_s30  ;;  %v1778_v62 = vsel %vm1758_vm5, %v1745_v20, %v1280_v53  ;;  %v5435_v53 = vld [vmem:[%s9755_s4 + $0x80] sm:$0xff]  ;;  %v5440_v20 = vld [vmem:[%s9755_s4 + $0xa8] sm:$0xff] }
 0x1c9   : > { %659 = vrot.lane.b32.xlu0 %v5362_v24, %s7455_s8  ;;  %v5396_v24 = vld [vmem:[%s7517_s29 + $0x172] sm:$0xff]  ;;  %v6880_v59 = vpack.c.bf16 %v5436_v46, %v5435_v53 }
 0x1ca   : > { %v8455_v2 = vpop.permute.xlu1 %1025 }
 0x1cb   : > { %v8457_v45 = vpop.permute.xlu0 %899  ;;  %v6088_v50 = vpop.f32.mrb[4].mxu0  ;;  %6881 = vmatprep.subr.bf16.mxu0 %v6880_v59 }
 0x1cc   : > { %1293 = vrot.lane.b32.xlu1 %v8451_v5, %s7459_s15  ;;  %v2143_v47 = vmul.f32 %v6088_v50, %v8297_v1  ;;  %v1992_v41 = vpop.f32.mrb[5].mxu0  ;;  %v1680_v50 = vsel %vm1659_vm2, %v1647_v34, %v8437_v26  ;;  %6883 = vmatpush3.bf16.msra.mxu0 %v6880_v59  ;;  %v5438_v26 = vld [vmem:[%s9755_s4 + $0x98] sm:$0xff]  ;;  %v5444_v59 = vld [vmem:[%s9755_s4 + $0xc8] sm:$0xff] }
 0x1cd   : > { %1167 = vrot.lane.b32.xlu0 %v5394_v54, %s7458_s23  ;;  %v2142_v36 = vmul.f32 %v8297_v1, %v1992_v41  ;;  %v1713_v51 = vsel %vm1692_vm3, %v1680_v50, %v8455_v2  ;;  %v5397_v34 = vld [vmem:[%s7517_s29 + $0x182] sm:$0xff] }
 0x1ce   : > { %v1534_v60 = vpop.permute.xlu1 %1533  ;;  %v2182_v58 = vadd.f32 %v8304_v4, %v2143_v47 }
 0x1cf   : > { %v1408_v52 = vpop.permute.xlu0 %1407  ;;  %v1843_v35 = vsel %vm1824_vm7, %v1810_v55, %v1534_v60  ;;  %v2181_v61 = vadd.f32 %v8304_v4, %v2142_v36  ;;  %v6884_v60 = vpack.c.bf16 %v5438_v26, %v5437_v12  ;;  %v5446_v12 = vld [vmem:[%s9755_s4 + $0xd8] sm:$0xff] }
 0x1d0   : > { %913 = vrot.lane.b32.xlu1 %v8451_v5, %s7456_s9  ;;  %v8480_v3 = vmax.f32 %v2182_v58, 0.0  ;;  %6107 = vmatprep.mubr.msk.f32.mxu0 %vm1857_vm8, %v1843_v35  ;;  %v1811_v0 = vsel %vm1791_vm6, %v1778_v62, %v1408_v52 }
 0x1d1   : > { %787 = vrot.lane.b32.xlu0 %v5394_v54, %s7454_s30  ;;  %v8489_v21 = vmax.f32 %v2181_v61, 0.0  ;;  %6885 = vmatprep.subr.bf16.mxu0 %v6884_v60 }
 0x1d2   : > { %v8491_v17 = vpop.permute.xlu1 %1027  ;;  %2284 = vst [vmem:[#allocation2 + $0x70] sm:$0xff] %v8480_v3  ;;  %6887 = vmatpush3.bf16.msra.mxu0 %v6884_v60  ;;  %v5448_v60 = vld [vmem:[%s9755_s4 + $0xe8] sm:$0xff] }
 0x1d3   : > { %v8493_v48 = vpop.permute.xlu0 %645  ;;  %2283 = vst [vmem:[#allocation2 + $0x68] sm:$0xff] %v8489_v21  ;;  %6486 = vmatprep.mubr.f32.mxu1 %v8489_v21 }
 0x1d4   : > { %1421 = vrot.lane.b32.xlu1 %v5363_v8, %s7460_s28  ;;  %6487 = vmatmul.mubr.f32.gmra.mrb[4].mxu1 %v8480_v3 }
 0x1d5   : > { %1295 = vrot.lane.b32.xlu0 %v8485_v13, %s7459_s15 }
 0x1d6   : > { %v1536_v44 = vpop.permute.xlu1 %1535 }
 0x1d7   : > { %v1154_v19 = vpop.permute.xlu0 %1153  ;;  %v1844_v27 = vsel %vm1824_vm7, %v1811_v0, %v1536_v44  ;;  %v6888_v44 = vpack.c.bf16 %v5440_v20, %v5439_v15 }
 0x1d8   : > { %1041 = vrot.lane.b32.xlu1 %v5363_v8, %s7457_s16  ;;  %6108 = vmatmul.mubr.msk.f32.gmra.mrb[18].mxu0 %vm1857_vm8, %v1844_v27  ;;  %v1746_v16 = vsel %vm1725_vm4, %v1713_v51, %v1154_v19 }
 0x1d9   : > { %915 = vrot.lane.b32.xlu0 %v8485_v13, %s7456_s9  ;;  %6889 = vmatprep.subr.bf16.mxu0 %v6888_v44 }
 0x1da   : > { %v8514_v7 = vpop.permute.xlu1 %773  ;;  %6891 = vmatpush3.bf16.msra.mxu0 %v6888_v44  ;;  %v5368_v44 = vld [vmem:[%s7517_s29 + $0x1a1] sm:$0xff] }
 0x1db   : > { %v8516_v23 = vpop.permute.xlu0 %647 }
 0x1dc   : > { %1549 = vrot.lane.b32.xlu1 %v5395_v40, %s7461_s14 }
 0x1dd   : > { %1423 = vrot.lane.b32.xlu0 %v5364_v18, %s7460_s28 }
 0x1de   : > { %v1282_v30 = vpop.permute.xlu1 %1281 }
 0x1df   : > { %v1156_v9 = vpop.permute.xlu0 %1155  ;;  %v1779_v55 = vsel %vm1758_vm5, %v1746_v16, %v1282_v30 }
 0x1e0   : > { %1043 = vrot.lane.b32.xlu1 %v5364_v18, %s7457_s16 }
 0x1e1   : > { %661 = vrot.lane.b32.xlu0 %v5363_v8, %s7455_s8  ;;  %v1615_v8 = vsel %vm1593_vm0, %v8104_v29, %v8430_v28  ;;  %v5365_v29 = vld [vmem:[%s7517_s29 + $0x181] sm:$0xff] }
 0x1e2   : > { %v8523_v25 = vpop.permute.xlu1 %901  ;;  %v1648_v62 = vsel %vm1626_vm1, %v1615_v8, %v8439_v32  ;;  %v5334_v28 = vld [vmem:[%s7517_s29 + $0x188] sm:$0xff]  ;;  %v5336_v8 = vld [vmem:[%s7517_s29 + $0x1a0] sm:$0xff] }
 0x1e3   : > { %v8525_v38 = vpop.permute.xlu0 %775  ;;  %v1681_v19 = vsel %vm1659_vm2, %v1648_v62, %v8457_v45  ;;  %v5441_v45 = vld [vmem:[%s9755_s4 + $0xb0] sm:$0xff] }
 0x1e4   : > { %1551 = vrot.lane.b32.xlu1 %v5396_v24, %s7461_s14  ;;  %v1714_v32 = vsel %vm1692_vm3, %v1681_v19, %v8491_v17  ;;  %v5367_v19 = vld [vmem:[%s7517_s29 + $0x199] sm:$0xff] }
 0x1e5   : > { %1169 = vrot.lane.b32.xlu0 %v5395_v40, %s7458_s23  ;;  %v1747_v30 = vsel %vm1725_vm4, %v1714_v32, %v1156_v9 }
 0x1e6   : > { %v1410_v54 = vpop.permute.xlu1 %1409 }
 0x1e7   : > { %v1284_v33 = vpop.permute.xlu0 %1283  ;;  %v1812_v52 = vsel %vm1791_vm6, %v1779_v55, %v1410_v54 }
 0x1e8   : > { %789 = vrot.lane.b32.xlu1 %v5395_v40, %s7454_s30  ;;  %v1780_v17 = vsel %vm1758_vm5, %v1747_v30, %v1284_v33  ;;  %v5443_v33 = vld [vmem:[%s9755_s4 + $0xc0] sm:$0xff] }
 0x1e9   : > { %663 = vrot.lane.b32.xlu0 %v5364_v18, %s7455_s8  ;;  %v6896_v50 = vpack.c.bf16 %v5444_v59, %v5443_v33 }
 0x1ea   : > { %v8545_v42 = vpop.permute.xlu1 %1029 }
 0x1eb   : > { %v8547_v47 = vpop.permute.xlu0 %903  ;;  %v6091_v41 = vpop.f32.mrb[6].mxu0 }
 0x1ec   : > { %1297 = vrot.lane.b32.xlu1 %v5333_v57, %s7459_s15  ;;  %v2145_v2 = vmul.f32 %v6091_v41, %v8297_v1  ;;  %v2002_v36 = vpop.f32.mrb[7].mxu0  ;;  %v5445_v41 = vld [vmem:[%s9755_s4 + $0xd0] sm:$0xff] }
 0x1ed   : > { %1171 = vrot.lane.b32.xlu0 %v5396_v24, %s7458_s23  ;;  %v2144_v58 = vmul.f32 %v8297_v1, %v2002_v36  ;;  %v6900_v26 = vpack.c.bf16 %v5446_v12, %v5445_v41  ;;  %v5447_v36 = vld [vmem:[%s9755_s4 + $0xe0] sm:$0xff] }
 0x1ee   : > { %v1538_v35 = vpop.permute.xlu1 %1537  ;;  %v2184_v61 = vadd.f32 %v8304_v4, %v2145_v2 }
 0x1ef   : > { %v1412_v39 = vpop.permute.xlu0 %1411  ;;  %v1845_v49 = vsel %vm1824_vm7, %v1812_v52, %v1538_v35  ;;  %v2183_v14 = vadd.f32 %v8304_v4, %v2144_v58  ;;  %v6904_v52 = vpack.c.bf16 %v5448_v60, %v5447_v36  ;;  %v5304_v58 = vld [vmem:[%s7517_s29 + $0x18a] sm:$0xff] }
 0x1f0   : > { %917 = vrot.lane.b32.xlu1 %v5333_v57, %s7456_s9  ;;  %v8580_v0 = vmax.f32 %v2184_v61, 0.0  ;;  %6110 = vmatprep.mubr.msk.f32.mxu0 %vm1857_vm8, %v1845_v49  ;;  %v1813_v54 = vsel %vm1791_vm6, %v1780_v17, %v1412_v39  ;;  %v5366_v57 = vld [vmem:[%s7517_s29 + $0x189] sm:$0xff]  ;;  %v5450_v49 = vld [vmem:[%s9755_s4 + $0xf8] sm:$0xff] }
 0x1f1   : > { %791 = vrot.lane.b32.xlu0 %v5396_v24, %s7454_s30  ;;  %v8587_v27 = vmax.f32 %v2183_v14, 0.0  ;;  %v5442_v24 = vld [vmem:[%s9755_s4 + $0xb8] sm:$0xff]  ;;  %v5449_v61 = vld [vmem:[%s9755_s4 + $0xf0] sm:$0xff] }
 0x1f2   : > { %v8589_v40 = vpop.permute.xlu1 %1031  ;;  %2286 = vst [vmem:[#allocation2 + $0x90] sm:$0xff] %v8580_v0  ;;  %v6892_v9 = vpack.c.bf16 %v5442_v24, %v5441_v45  ;;  %v5335_v14 = vld [vmem:[%s7517_s29 + $0x198] sm:$0xff]  ;;  %v6908_v15 = vpack.c.bf16 %v5450_v49, %v5449_v61 }
 0x1f3   : > { %v8591_v18 = vpop.permute.xlu0 %649  ;;  %2285 = vst [vmem:[#allocation2 + $0x88] sm:$0xff] %v8587_v27  ;;  %6489 = vmatprep.mubr.f32.mxu1 %v8587_v27 }
 0x1f4   : > { %1425 = vrot.lane.b32.xlu1 %v5365_v29, %s7460_s28  ;;  %6490 = vmatmul.mubr.f32.gmra.mrb[6].mxu1 %v8580_v0 }
 0x1f5   : > { %1299 = vrot.lane.b32.xlu0 %v5334_v28, %s7459_s15  ;;  %6893 = vmatprep.subr.bf16.mxu0 %v6892_v9 }
 0x1f6   : > { %v1540_v53 = vpop.permute.xlu1 %1539  ;;  %6895 = vmatpush3.bf16.msra.mxu0 %v6892_v9 }
 0x1f7   : > { %v1158_v46 = vpop.permute.xlu0 %1157  ;;  %v1846_v43 = vsel %vm1824_vm7, %v1813_v54, %v1540_v53  ;;  %6897 = vmatprep.subr.bf16.mxu0 %v6896_v50  ;;  %v5399_v54 = vld [vmem:[%s7517_s29 + $0x19a] sm:$0xff] }
 0x1f8   : > { %1045 = vrot.lane.b32.xlu1 %v5365_v29, %s7457_s16  ;;  %6111 = vmatmul.mubr.msk.f32.gmra.mrb[20].mxu0 %vm1857_vm8, %v1846_v43  ;;  %v1616_v29 = vsel %vm1593_vm0, %v8148_v11, %v8493_v48 }
 0x1f9   : > { %919 = vrot.lane.b32.xlu0 %v5334_v28, %s7456_s9  ;;  %v1649_v28 = vsel %vm1626_vm1, %v1616_v29, %v8514_v7 }
 0x1fa   : > { %v8622_v51 = vpop.permute.xlu1 %777  ;;  %6899 = vmatpush3.bf16.msra.mxu0 %v6896_v50  ;;  %v1682_v32 = vsel %vm1659_vm2, %v1649_v28, %v8523_v25  ;;  %v5400_v25 = vld [vmem:[%s7517_s29 + $0x1a2] sm:$0xff] }
 0x1fb   : > { %v8624_v16 = vpop.permute.xlu0 %651  ;;  %6901 = vmatprep.subr.bf16.mxu0 %v6900_v26  ;;  %v1715_v11 = vsel %vm1692_vm3, %v1682_v32, %v8545_v42 }
 0x1fc   : > { %1553 = vrot.lane.b32.xlu1 %v5397_v34, %s7461_s14  ;;  %v1748_v48 = vsel %vm1725_vm4, %v1715_v11, %v1158_v46 }
 0x1fd   : > { %1427 = vrot.lane.b32.xlu0 %v5366_v57, %s7460_s28 }
 0x1fe   : > { %v1286_v55 = vpop.permute.xlu1 %1285  ;;  %6903 = vmatpush3.bf16.msra.mxu0 %v6900_v26 }
 0x1ff   : > { %v8634_v2 = vpop.permute.xlu0 %1159  ;;  %6905 = vmatprep.subr.bf16.mxu0 %v6904_v52  ;;  %v1781_v7 = vsel %vm1758_vm5, %v1748_v48, %v1286_v55 }
 0x200   : > { %1173 = vrot.lane.b32.xlu1 %v5397_v34, %s7458_s23  ;;  %v1617_v34 = vsel %vm1593_vm0, %v8173_v37, %v8516_v23 }
 0x201   : > { %1047 = vrot.lane.b32.xlu0 %v5366_v57, %s7457_s16  ;;  %v1650_v50 = vsel %vm1626_vm1, %v1617_v34, %v8525_v38 }
 0x202   : > { %v8645_v35 = vpop.permute.xlu1 %905  ;;  %6907 = vmatpush3.bf16.msra.mxu0 %v6904_v52  ;;  %v1683_v12 = vsel %vm1659_vm2, %v1650_v50, %v8547_v47 }
 0x203   : > { %v8647_v39 = vpop.permute.xlu0 %779  ;;  %6909 = vmatprep.subr.bf16.mxu0 %v6908_v15  ;;  %v1716_v23 = vsel %vm1692_vm3, %v1683_v12, %v8589_v40 }
 0x204   : > { %1175 = vrot.lane.b32.xlu1 %v5304_v58, %s7458_s23  ;;  %v1749_v38 = vsel %vm1725_vm4, %v1716_v23, %v8634_v2  ;;  %s5567_s23 = sshll.u32 %s9775_s25, 8 }
 0x205   : > { %1555 = vrot.lane.b32.xlu0 %v5304_v58, %s7461_s14 }
 0x206   : > { %v1414_v20 = vpop.permute.xlu1 %1413  ;;  %6911 = vmatpush3.bf16.msra.mxu0 %v6908_v15 }
 0x207   : > { %v1288_v62 = vpop.permute.xlu0 %1287  ;;  %v1814_v53 = vsel %vm1791_vm6, %v1781_v7, %v1414_v20 }
 0x208   : > { %1303 = vrot.lane.b32.xlu1 %v5336_v8, %s7459_s15  ;;  %v1782_v36 = vsel %vm1758_vm5, %v1749_v38, %v1288_v62  ;;  %v1618_v62 = vsel %vm1593_vm0, %v8216_v63, %v8591_v18 }
 0x209   : > { %1301 = vrot.lane.b32.xlu0 %v5335_v14, %s7459_s15  ;;  %v1651_v29 = vsel %vm1626_vm1, %v1618_v62, %v8622_v51 }
 0x20a   : > { %v1034_v30 = vpop.permute.xlu1 %1033  ;;  %v1684_v28 = vsel %vm1659_vm2, %v1651_v29, %v8645_v35 }
 0x20b   : > { %v8670_v45 = vpop.permute.xlu0 %907  ;;  %v6094_v24 = vpop.f32.mrb[8].mxu0  ;;  %v1717_v32 = vsel %vm1692_vm3, %v1684_v28, %v1034_v30  ;;  %v1619_v30 = vsel %vm1593_vm0, %v8241_v22, %v8624_v16 }
 0x20c   : > { %1431 = vrot.lane.b32.xlu1 %v5368_v44, %s7460_s28  ;;  %v2147_v17 = vmul.f32 %v6094_v24, %v8297_v1  ;;  %v2012_v9 = vpop.f32.mrb[9].mxu0 }
 0x20d   : > { %1429 = vrot.lane.b32.xlu0 %v5367_v19, %s7460_s28  ;;  %v2146_v43 = vmul.f32 %v8297_v1, %v2012_v9 }
 0x20e   : > { %v1542_v33 = vpop.permute.xlu1 %1541  ;;  %v2186_v46 = vadd.f32 %v8304_v4, %v2147_v17 }
 0x20f   : > { %v1416_v42 = vpop.permute.xlu0 %1415  ;;  %v1847_v59 = vsel %vm1824_vm7, %v1814_v53, %v1542_v33  ;;  %v2185_v57 = vadd.f32 %v8304_v4, %v2146_v43  ;;  %v1652_v53 = vsel %vm1626_vm1, %v1619_v30, %v8647_v39 }
 0x210   : > { %1559 = vrot.lane.b32.xlu1 %v5400_v25, %s7461_s14  ;;  %v8693_v41 = vmax.f32 %v2186_v46, 0.0  ;;  %6113 = vmatprep.mubr.msk.f32.mxu0 %vm1857_vm8, %v1847_v59  ;;  %v1815_v47 = vsel %vm1791_vm6, %v1782_v36, %v1416_v42  ;;  %v1685_v33 = vsel %vm1659_vm2, %v1652_v53, %v8670_v45 }
 0x211   : > { %1557 = vrot.lane.b32.xlu0 %v5399_v54, %s7461_s14  ;;  %v8698_v26 = vmax.f32 %v2185_v57, 0.0  ;;  %s9628_s14 = scalar_lea.vmem %s9758_s7, %s5567_s23 }
 0x212   : > { %v1036_v55 = vpop.permute.xlu1 %1035  ;;  %2288 = vst [vmem:[#allocation2 + $0xb0] sm:$0xff] %v8693_v41 }
 0x213   : > { %v8700_v37 = vpop.permute.xlu0 %653  ;;  %2287 = vst [vmem:[#allocation2 + $0xa8] sm:$0xff] %v8698_v26  ;;  %6492 = vmatprep.mubr.f32.mxu1 %v8698_v26  ;;  %v1718_v34 = vsel %vm1692_vm3, %v1685_v33, %v1036_v55 }
 0x214   : > { %6493 = vmatmul.mubr.f32.gmra.mrb[8].mxu1 %v8693_v41 }
 0x216   : > { %v1544_v60 = vpop.permute.xlu1 %1543 }
 0x217   : > { %v1162_v52 = vpop.permute.xlu0 %1161  ;;  %v1848_v58 = vsel %vm1824_vm7, %v1815_v47, %v1544_v60 }
 0x218   : > { %6114 = vmatmul.mubr.msk.f32.gmra.mrb[22].mxu0 %vm1857_vm8, %v1848_v58  ;;  %v1750_v11 = vsel %vm1725_vm4, %v1717_v32, %v1162_v52  ;;  %v1620_v58 = vsel %vm1593_vm0, %v8286_v56, %v8700_v37 }
 0x21a   : > { %v782_v40 = vpop.permute.xlu1 %781 }
 0x21b   : > { %v8714_v61 = vpop.permute.xlu0 %655 }
 0x21e   : > { %v1290_v2 = vpop.permute.xlu1 %1289 }
 0x21f   : > { %v1164_v49 = vpop.permute.xlu0 %1163  ;;  %v1783_v24 = vsel %vm1758_vm5, %v1750_v11, %v1290_v2  ;;  %v1653_v2 = vsel %vm1626_vm1, %v1620_v58, %v782_v40 }
 0x220   : > { %v1751_v22 = vsel %vm1725_vm4, %v1718_v34, %v1164_v49 }
 0x222   : > { %v910_v8 = vpop.permute.xlu1 %909 }
 0x223   : > { %v8716_v14 = vpop.permute.xlu0 %783  ;;  %v1686_v49 = vsel %vm1659_vm2, %v1653_v2, %v910_v8 }
 0x226   : > { %v1418_v15 = vpop.permute.xlu1 %1417 }
 0x227   : > { %v1292_v20 = vpop.permute.xlu0 %1291  ;;  %v1816_v63 = vsel %vm1791_vm6, %v1783_v24, %v1418_v15 }
 0x228   : > { %v1784_v16 = vsel %vm1758_vm5, %v1751_v22, %v1292_v20 }
 0x22a   : > { %v1038_v44 = vpop.permute.xlu1 %1037 }
 0x22b   : > { %v8725_v19 = vpop.permute.xlu0 %911  ;;  %v6097_v48 = vpop.f32.mrb[10].mxu0  ;;  %v1719_v62 = vsel %vm1692_vm3, %v1686_v49, %v1038_v44  ;;  %v1621_v44 = vsel %vm1593_vm0, %v8327_v31, %v8714_v61 }
 0x22c   : > { %v2149_v7 = vmul.f32 %v6097_v48, %v8297_v1  ;;  %v2022_v17 = vpop.f32.mrb[11].mxu0 }
 0x22d   : > { %v2148_v18 = vmul.f32 %v8297_v1, %v2022_v17 }
 0x22e   : > { %v1546_v51 = vpop.permute.xlu1 %1545  ;;  %v2188_v35 = vadd.f32 %v8304_v4, %v2149_v7 }
 0x22f   : > { %v1420_v9 = vpop.permute.xlu0 %1419  ;;  %v1849_v25 = vsel %vm1824_vm7, %v1816_v63, %v1546_v51  ;;  %v2187_v54 = vadd.f32 %v8304_v4, %v2148_v18  ;;  %v1654_v63 = vsel %vm1626_vm1, %v1621_v44, %v8716_v14 }
 0x230   : > { %6116 = vmatprep.mubr.msk.f32.mxu0 %vm1857_vm8, %v1849_v25  ;;  %v8742_v43 = vmax.f32 %v2188_v35, 0.0  ;;  %v1817_v39 = vsel %vm1791_vm6, %v1784_v16, %v1420_v9  ;;  %v1687_v51 = vsel %vm1659_vm2, %v1654_v63, %v8725_v19 }
 0x231   : > { %v8746_v42 = vmax.f32 %v2187_v54, 0.0 }
 0x232   : > { %v1040_v46 = vpop.permute.xlu1 %1039  ;;  %2290 = vst [vmem:[#allocation2 + $0xd0] sm:$0xff] %v8742_v43 }
 0x233   : > { %v8748_v59 = vpop.permute.xlu0 %657  ;;  %2289 = vst [vmem:[#allocation2 + $0xc8] sm:$0xff] %v8746_v42  ;;  %6495 = vmatprep.mubr.f32.mxu1 %v8746_v42  ;;  %v1720_v30 = vsel %vm1692_vm3, %v1687_v51, %v1040_v46 }
 0x234   : > { %6496 = vmatmul.mubr.f32.gmra.mrb[10].mxu1 %v8742_v43 }
 0x236   : > { %v1548_v45 = vpop.permute.xlu1 %1547 }
 0x237   : > { %v1166_v57 = vpop.permute.xlu0 %1165  ;;  %v1850_v50 = vsel %vm1824_vm7, %v1817_v39, %v1548_v45 }
 0x238   : > { %6117 = vmatmul.mubr.msk.f32.gmra.mrb[24].mxu0 %vm1857_vm8, %v1850_v50  ;;  %v1752_v29 = vsel %vm1725_vm4, %v1719_v62, %v1166_v57  ;;  %v1622_v50 = vsel %vm1593_vm0, %v8373_v6, %v8748_v59 }
 0x23a   : > { %v786_v12 = vpop.permute.xlu1 %785 }
 0x23b   : > { %v8760_v55 = vpop.permute.xlu0 %659 }
 0x23e   : > { %v1294_v23 = vpop.permute.xlu1 %1293 }
 0x23f   : > { %v1168_v38 = vpop.permute.xlu0 %1167  ;;  %v1785_v32 = vsel %vm1758_vm5, %v1752_v29, %v1294_v23  ;;  %v1655_v23 = vsel %vm1626_vm1, %v1622_v50, %v786_v12  ;;  %v7442_v50 = vld [vmem:[#allocation2 + $0x8] sm:$0xff] }
 0x240   : > { %v1753_v31 = vsel %vm1725_vm4, %v1720_v30, %v1168_v38 }
 0x242   : > { %v914_v36 = vpop.permute.xlu1 %913 }
 0x243   : > { %v8762_v47 = vpop.permute.xlu0 %787  ;;  %v1688_v38 = vsel %vm1659_vm2, %v1655_v23, %v914_v36  ;;  %v2363_v23 = vld [vmem:[#allocation2 + $0x28] sm:$0xff] }
 0x246   : > { %v1422_v60 = vpop.permute.xlu1 %1421 }
 0x247   : > { %v1296_v52 = vpop.permute.xlu0 %1295  ;;  %v1818_v24 = vsel %vm1791_vm6, %v1785_v32, %v1422_v60 }
 0x248   : > { %v1786_v61 = vsel %vm1758_vm5, %v1753_v31, %v1296_v52 }
 0x24a   : > { %v1042_v15 = vpop.permute.xlu1 %1041 }
 0x24b   : > { %v8769_v20 = vpop.permute.xlu0 %915  ;;  %v6100_v28 = vpop.f32.mrb[12].mxu0  ;;  %v1721_v58 = vsel %vm1692_vm3, %v1688_v38, %v1042_v15  ;;  %v1623_v15 = vsel %vm1593_vm0, %v8405_v10, %v8760_v55 }
 0x24c   : > { %v2151_v11 = vmul.f32 %v6100_v28, %v8297_v1  ;;  %v2032_v48 = vpop.f32.mrb[13].mxu0 }
 0x24d   : > { %v2150_v56 = vmul.f32 %v8297_v1, %v2032_v48 }
 0x24e   : > { %v1550_v37 = vpop.permute.xlu1 %1549  ;;  %v2190_v8 = vadd.f32 %v8304_v4, %v2151_v11 }
 0x24f   : > { %v1424_v40 = vpop.permute.xlu0 %1423  ;;  %v1851_v7 = vsel %vm1824_vm7, %v1818_v24, %v1550_v37  ;;  %v2189_v17 = vadd.f32 %v8304_v4, %v2150_v56  ;;  %v1656_v24 = vsel %vm1626_vm1, %v1623_v15, %v8762_v47  ;;  %v5502_v15 = vld [vmem:[%s9755_s4 + $0x298] sm:$0xff] }
 0x250   : > { %6119 = vmatprep.mubr.msk.f32.mxu0 %vm1857_vm8, %v1851_v7  ;;  %v8786_v18 = vmax.f32 %v2190_v8, 0.0  ;;  %v1819_v14 = vsel %vm1791_vm6, %v1786_v61, %v1424_v40 }
 0x251   : > { %v8790_v9 = vmax.f32 %v2189_v17, 0.0 }
 0x252   : > { %v1044_v35 = vpop.permute.xlu1 %1043  ;;  %2292 = vst [vmem:[#allocation2 + $0xf0] sm:$0xff] %v8786_v18 }
 0x253   : > { %v662_v25 = vpop.permute.xlu0 %661  ;;  %2291 = vst [vmem:[#allocation2 + $0xe8] sm:$0xff] %v8790_v9  ;;  %6498 = vmatprep.mubr.f32.mxu1 %v8790_v9 }
 0x254   : > { %6499 = vmatmul.mubr.f32.gmra.mrb[12].mxu1 %v8786_v18  ;;  %v1624_v51 = vsel %vm1593_vm0, %v8451_v5, %v662_v25 }
 0x256   : > { %v1552_v19 = vpop.permute.xlu1 %1551 }
 0x257   : > { %v1170_v54 = vpop.permute.xlu0 %1169  ;;  %v1852_v53 = vsel %vm1824_vm7, %v1819_v14, %v1552_v19 }
 0x258   : > { %6120 = vmatmul.mubr.msk.f32.gmra.mrb[26].mxu0 %vm1857_vm8, %v1852_v53  ;;  %v1754_v2 = vsel %vm1725_vm4, %v1721_v58, %v1170_v54 }
 0x25a   : > { %v790_v33 = vpop.permute.xlu1 %789 }
 0x25b   : > { %v664_v46 = vpop.permute.xlu0 %663  ;;  %v1657_v30 = vsel %vm1626_vm1, %v1624_v51, %v790_v33  ;;  %v2351_v51 = vld [vmem:[%s9755_s4 + $0x30] sm:$0xff] }
 0x25e   : > { %v1298_v34 = vpop.permute.xlu1 %1297 }
 0x25f   : > { %v1172_v22 = vpop.permute.xlu0 %1171  ;;  %v1787_v62 = vsel %vm1758_vm5, %v1754_v2, %v1298_v34 }
 0x262   : > { %v918_v16 = vpop.permute.xlu1 %917 }
 0x263   : > { %v792_v39 = vpop.permute.xlu0 %791  ;;  %v1690_v61 = vsel %vm1659_vm2, %v1657_v30, %v918_v16 }
 0x266   : > { %v1426_v45 = vpop.permute.xlu1 %1425 }
 0x267   : > { %v1300_v57 = vpop.permute.xlu0 %1299  ;;  %v1820_v32 = vsel %vm1791_vm6, %v1787_v62, %v1426_v45 }
 0x26a   : > { %v1046_v60 = vpop.permute.xlu1 %1045 }
 0x26b   : > { %v920_v52 = vpop.permute.xlu0 %919  ;;  %v6103_v49 = vpop.f32.mrb[14].mxu0  ;;  %v1723_v53 = vsel %vm1692_vm3, %v1690_v61, %v1046_v60  ;;  %v2364_v60 = vld [vmem:[#allocation2 + $0x30] sm:$0xff]  ;;  %v2354_v61 = vld [vmem:[%s9755_s4 + $0x48] sm:$0xff] }
 0x26c   : > { %v2153_v29 = vmul.f32 %v6103_v49, %v8297_v1  ;;  %v2042_v28 = vpop.f32.mrb[15].mxu0  ;;  %v2365_v49 = vld [vmem:[#allocation2 + $0x48] sm:$0xff] }
 0x26d   : > { %v2152_v6 = vmul.f32 %v8297_v1, %v2042_v28  ;;  %v1689_v1 = vsel %vm1659_vm2, %v1656_v24, %v8769_v20  ;;  %v5504_v24 = vld [vmem:[%s9755_s4 + $0x2a8] sm:$0xff] }
 0x26e   : > { %v1554_v59 = vpop.permute.xlu1 %1553  ;;  %v2192_v36 = vadd.f32 %v8304_v4, %v2153_v29  ;;  %v1722_v7 = vsel %vm1692_vm3, %v1689_v1, %v1044_v35  ;;  %v1625_v35 = vsel %vm1593_vm0, %v8485_v13, %v664_v46  ;;  %v8868_v29 = vld [vmem:[%s9754_s3] ss:$0 sm:$0xff] }
 0x26f   : > { %v1428_v12 = vpop.permute.xlu0 %1427  ;;  %v1853_v11 = vsel %vm1824_vm7, %v1820_v32, %v1554_v59  ;;  %v2191_v48 = vadd.f32 %v8304_v4, %v2152_v6  ;;  %v1755_v4 = vsel %vm1725_vm4, %v1722_v7, %v1172_v22  ;;  %v1658_v31 = vsel %vm1626_vm1, %v1625_v35, %v792_v39  ;;  %v2366_v6 = vld [vmem:[#allocation2 + $0x50] sm:$0xff]  ;;  %v2345_v1 = vld [vmem:[%s9755_s4] sm:$0xff]  ;;  %v2348_v7 = vld [vmem:[%s9755_s4 + $0x18] sm:$0xff] }
 0x270   : > { %6122 = vmatprep.mubr.msk.f32.mxu0 %vm1857_vm8, %v1853_v11  ;;  %v8822_v56 = vmax.f32 %v2192_v36, 0.0  ;;  %v1788_v10 = vsel %vm1758_vm5, %v1755_v4, %v1300_v57  ;;  %v1691_v14 = vsel %vm1659_vm2, %v1658_v31, %v920_v52  ;;  %v8861_v52 = vld [vmem:[%s9753_s2] ss:$0 sm:$0xff]  ;;  %v5501_v36 = vld [vmem:[%s9755_s4 + $0x290] sm:$0xff]  ;;  %v2352_v35 = vld [vmem:[%s9755_s4 + $0x38] sm:$0xff] }
 0x271   : > { %v8826_v37 = vmax.f32 %v2191_v48, 0.0  ;;  %v1821_v55 = vsel %vm1791_vm6, %v1788_v10, %v1428_v12  ;;  %v5503_v48 = vld [vmem:[%s9755_s4 + $0x2a0] sm:$0xff]  ;;  %v6924_v30 = vpack.c.bf16 %v2352_v35, %v2351_v51 }
 0x272   : > { %v1174_v40 = vpop.permute.xlu1 %1173  ;;  %2294 = vst [vmem:[#allocation2 + $0x110] sm:$0xff] %v8822_v56  ;;  %v2349_v10 = vld [vmem:[%s9755_s4 + $0x20] sm:$0xff] }
 0x273   : > { %v1048_v8 = vpop.permute.xlu0 %1047  ;;  %2293 = vst [vmem:[#allocation2 + $0x108] sm:$0xff] %v8826_v37  ;;  %6501 = vmatprep.mubr.f32.mxu1 %v8826_v37  ;;  %v1756_v22 = vsel %vm1725_vm4, %v1723_v53, %v1174_v40  ;;  %v2347_v40 = vld [vmem:[%s9755_s4 + $0x10] sm:$0xff]  ;;  %v2353_v31 = vld [vmem:[%s9755_s4 + $0x40] sm:$0xff] }
 0x274   : > { %6502 = vmatmul.mubr.f32.gmra.mrb[14].mxu1 %v8822_v56  ;;  %v1724_v34 = vsel %vm1692_vm3, %v1691_v14, %v1048_v8  ;;  %v6916_v4 = vpack.c.bf16 %v2348_v7, %v2347_v40  ;;  %v6928_v14 = vpack.c.bf16 %v2354_v61, %v2353_v31 }
 0x276   : > { %v1176_v47 = vpop.permute.xlu1 %1175 }
 0x277   : > { %v1556_v20 = vpop.permute.xlu0 %1555  ;;  %v1757_v5 = vsel %vm1725_vm4, %v1724_v34, %v1176_v47  ;;  %v7048_v47 = vpack.c.bf16 %v5504_v24, %v5503_v48  ;;  %v5451_v48 = vld [vmem:[%s9755_s4 + $0x100] sm:$0xff]  ;;  %v5452_v24 = vld [vmem:[%s9755_s4 + $0x108] sm:$0xff] }
 0x278   : > { %v1854_v44 = vsel %vm1824_vm7, %v1821_v55, %v1556_v20  ;;  %v2350_v55 = vld [vmem:[%s9755_s4 + $0x28] sm:$0xff]  ;;  %v5505_v20 = vld [vmem:[%s9755_s4 + $0x2b0] sm:$0xff] }
 0x279   : > { %6123 = vmatmul.mubr.msk.f32.gmra.mrb[28].mxu0 %vm1857_vm8, %v1854_v44  ;;  %v5506_v44 = vld [vmem:[%s9755_s4 + $0x2b8] sm:$0xff] }
 0x27a   : > { %v1304_v17 = vpop.permute.xlu1 %1303 }
 0x27b   : > { %v1302_v63 = vpop.permute.xlu0 %1301  ;;  %v1790_v13 = vsel %vm1758_vm5, %v1757_v5, %v1304_v17  ;;  %v6920_v17 = vpack.c.bf16 %v2350_v55, %v2349_v10 }
 0x27c   : > { %v1789_v25 = vsel %vm1758_vm5, %v1756_v22, %v1302_v63  ;;  %v7052_v63 = vpack.c.bf16 %v5506_v44, %v5505_v20 }
 0x27e   : > { %v1432_v19 = vpop.permute.xlu1 %1431 }
 0x27f   : > { %v1430_v54 = vpop.permute.xlu0 %1429  ;;  %v1823_v33 = vsel %vm1791_vm6, %v1790_v13, %v1432_v19  ;;  %v2355_v19 = vld [vmem:[%s9755_s4 + $0x50] sm:$0xff] }
 0x280   : > { %v1822_v46 = vsel %vm1791_vm6, %v1789_v25, %v1430_v54  ;;  %v2356_v54 = vld [vmem:[%s9755_s4 + $0x58] sm:$0xff] }
 0x281   : > { %v6932_v34 = vpack.c.bf16 %v2356_v54, %v2355_v19 }
 0x282   : > { %v1560_v16 = vpop.permute.xlu1 %1559 }
 0x283   : > { %v1558_v39 = vpop.permute.xlu0 %1557  ;;  %v1856_v45 = vsel %vm1824_vm7, %v1823_v33, %v1560_v16  ;;  %v2357_v33 = vld [vmem:[%s9755_s4 + $0x60] sm:$0xff] }
 0x284   : > { %v1855_v57 = vsel %vm1824_vm7, %v1822_v46, %v1558_v39  ;;  %v2358_v46 = vld [vmem:[%s9755_s4 + $0x68] sm:$0xff] }
 0x285   : > { %6125 = vmatprep.mubr.msk.f32.mxu0 %vm1857_vm8, %v1855_v57  ;;  %v6936_v39 = vpack.c.bf16 %v2358_v46, %v2357_v33  ;;  %v2314_v33 = vld [vmem:[#allocation2 + $0xf] sm:$0xff] }
 0x286   : > { %6126 = vmatmul.mubr.msk.f32.gmra.mrb[30].mxu0 %vm1857_vm8, %v1856_v45 }
 0x287   : > { %6160 = vmatprep.mubr.f32.mxu0 %v7442_v50 }
 0x28a   : > { %6161 = vmatmul.mubr.f32.vlgmr.msra.gmra.mrb[32].mxu0 %v7442_v50  ;;  %v5507_v50 = vld [vmem:[%s9755_s4 + $0x2c0] sm:$0xff] }
 0x28b   : > { %6163 = vmatprep.mubr.f32.mxu0 %v2363_v23  ;;  %v6106_v38 = vpop.f32.mrb[16].mxu0  ;;  %v5508_v23 = vld [vmem:[%s9755_s4 + $0x2c8] sm:$0xff] }
 0x28c   : > { %v2155_v58 = vmul.f32 %v8861_v52, %v6106_v38  ;;  %v2052_v2 = vpop.f32.mrb[17].mxu0  ;;  %v5509_v38 = vld [vmem:[%s9755_s4 + $0x2d0] sm:$0xff] }
 0x28d   : > { %v2154_v62 = vmul.f32 %v8861_v52, %v2052_v2  ;;  %v2359_v2 = vld [vmem:[%s9755_s4 + $0x70] sm:$0xff] }
 0x28e   : > { %6164 = vmatmul.mubr.f32.gmra.mrb[34].mxu0 %v2364_v60  ;;  %v2194_v28 = vadd.f32 %v8868_v29, %v2155_v58  ;;  %v7056_v60 = vpack.c.bf16 %v5508_v23, %v5507_v50  ;;  %v5510_v58 = vld [vmem:[%s9755_s4 + $0x2d8] sm:$0xff] }
 0x28f   : > { %6166 = vmatprep.mubr.f32.mxu0 %v2365_v49  ;;  %v2193_v32 = vadd.f32 %v8868_v29, %v2154_v62  ;;  %v2360_v49 = vld [vmem:[%s9755_s4 + $0x78] sm:$0xff]  ;;  %v7060_v62 = vpack.c.bf16 %v5510_v58, %v5509_v38 }
 0x290   : > { %v2226_v59 = vmax.f32 %v2194_v28, 0.0  ;;  %v6940_v28 = vpack.c.bf16 %v2360_v49, %v2359_v2  ;;  %v9037_v2 = vld [vmem:[#allocation2 + $0x2f] sm:$0xff] }
 0x291   : > { %v2225_v12 = vmax.f32 %v2193_v32, 0.0  ;;  %v5511_v32 = vld [vmem:[%s9755_s4 + $0x2e0] sm:$0xff]  ;;  %9766 = vst [vmem:[#allocation3_spill] sm:$0xff] %v9037_v2 }
 0x292   : > { %6167 = vmatmul.mubr.f32.gmra.mrb[36].mxu0 %v2366_v6  ;;  %2296 = vst [vmem:[#allocation2 + $0x130] sm:$0xff] %v2226_v59  ;;  %v5512_v6 = vld [vmem:[%s9755_s4 + $0x2e8] sm:$0xff] }
 0x293   : > { %6169 = vmatprep.mubr.f32.mxu0 %v8489_v21  ;;  %2295 = vst [vmem:[#allocation2 + $0x128] sm:$0xff] %v2225_v12  ;;  %6504 = vmatprep.mubr.f32.mxu1 %v2225_v12 }
 0x294   : > { %6505 = vmatmul.mubr.f32.gmra.mrb[16].mxu1 %v2226_v59 }
 0x296   : > { %6170 = vmatmul.mubr.f32.gmra.mrb[38].mxu0 %v8480_v3 }
 0x297   : > { %6172 = vmatprep.mubr.f32.mxu0 %v8587_v27 }
 0x29a   : > { %6173 = vmatmul.mubr.f32.gmra.mrb[40].mxu0 %v8580_v0 }
 0x29b   : > { %6175 = vmatprep.mubr.f32.mxu0 %v8698_v26 }
 0x29e   : > { %6176 = vmatmul.mubr.f32.gmra.mrb[42].mxu0 %v8693_v41 }
 0x29f   : > { %6178 = vmatprep.mubr.f32.mxu0 %v8746_v42 }
 0x2a2   : > { %6179 = vmatmul.mubr.f32.gmra.mrb[44].mxu0 %v8742_v43 }
 0x2a3   : > { %6181 = vmatprep.mubr.f32.mxu0 %v8790_v9  ;;  %v5500_v9 = vld [vmem:[%s9755_s4 + $0x288] sm:$0xff] }
 0x2a6   : > { %6182 = vmatmul.mubr.f32.gmra.mrb[46].mxu0 %v8786_v18  ;;  %v5499_v18 = vld [vmem:[%s9755_s4 + $0x280] sm:$0xff] }
 0x2a7   : > { %6184 = vmatprep.mubr.f32.mxu0 %v8826_v37  ;;  %v7040_v11 = vpack.c.bf16 %v5500_v9, %v5499_v18  ;;  %v2346_v37 = vld [vmem:[%s9755_s4 + $0x8] sm:$0xff] }
 0x2a8   : > { %v6912_v8 = vpack.c.bf16 %v2346_v37, %v2345_v1 }
 0x2a9   : > { %7041 = vmatprep.subr.bf16.mxu1 %v7040_v11 }
 0x2aa   : > { %6185 = vmatmul.mubr.f32.gmra.mrb[48].mxu0 %v8822_v56  ;;  %v7044_v56 = vpack.c.bf16 %v5502_v15, %v5501_v36  ;;  %7043 = vmatpush3.bf16.msra.mxu1 %v7040_v11 }
 0x2ab   : > { %6187 = vmatprep.mubr.f32.mxu0 %v2225_v12  ;;  %v6109_v3 = vpop.f32.mrb[18].mxu0  ;;  %6913 = vmatprep.subr.bf16.mxu0 %v6912_v8  ;;  %v5513_v12 = vld [vmem:[%s9755_s4 + $0x2f0] sm:$0xff] }
 0x2ac   : > { %v2157_v21 = vmul.f32 %v8861_v52, %v6109_v3  ;;  %v2062_v0 = vpop.f32.mrb[19].mxu0  ;;  %7045 = vmatprep.subr.bf16.mxu1 %v7044_v56  ;;  %6915 = vmatpush3.bf16.msra.mxu0 %v6912_v8  ;;  %v5514_v3 = vld [vmem:[%s9755_s4 + $0x2f8] sm:$0xff] }
 0x2ad   : > { %v2156_v27 = vmul.f32 %v8861_v52, %v2062_v0  ;;  %6917 = vmatprep.subr.bf16.mxu0 %v6916_v4  ;;  %v5515_v0 = vld [vmem:[%s9755_s4 + $0x300] sm:$0xff] }
 0x2ae   : > { %6188 = vmatmul.mubr.f32.gmra.mrb[50].mxu0 %v2226_v59  ;;  %v2196_v41 = vadd.f32 %v8868_v29, %v2157_v21  ;;  %7047 = vmatpush3.bf16.msra.mxu1 %v7044_v56  ;;  %v7064_v59 = vpack.c.bf16 %v5512_v6, %v5511_v32  ;;  %v7068_v21 = vpack.c.bf16 %v5514_v3, %v5513_v12  ;;  %v9053_v12 = vld [vmem:[#allocation2 + $0x67] sm:$0xff]  ;;  %v5517_v3 = vld [vmem:[%s9755_s4 + $0x310] sm:$0xff] }
 0x2af   : > { %v2195_v26 = vadd.f32 %v8868_v29, %v2156_v27  ;;  %7049 = vmatprep.subr.bf16.mxu1 %v7048_v47  ;;  %v5516_v27 = vld [vmem:[%s9755_s4 + $0x308] sm:$0xff]  ;;  %v6944_v56 = vpack.c.bf16 %v5452_v24, %v5451_v48  ;;  %v5461_v24 = vld [vmem:[%s9755_s4 + $0x150] sm:$0xff] }
 0x2b0   : > { %v2228_v43 = vmax.f32 %v2196_v41, 0.0  ;;  %6919 = vmatpush3.bf16.msra.mxu0 %v6916_v4  ;;  %v8994_v41 = vpack.c.bf16 %v5516_v27, %v5515_v0  ;;  %v9062_v0 = vld [vmem:[#allocation2 + $0x29] sm:$0xff]  ;;  %v5459_v27 = vld [vmem:[%s9755_s4 + $0x140] sm:$0xff] }
 0x2b1   : > { %v2227_v42 = vmax.f32 %v2195_v26, 0.0  ;;  %6921 = vmatprep.subr.bf16.mxu0 %v6920_v17  ;;  %v9086_v48 = vld [vmem:[#allocation2 + $0x49] sm:$0xff] }
 0x2b2   : > { %2298 = vst [vmem:[#allocation2 + $0x150] sm:$0xff] %v2228_v43  ;;  %7051 = vmatpush3.bf16.msra.mxu1 %v7048_v47 }
 0x2b3   : > { %2297 = vst [vmem:[#allocation2 + $0x148] sm:$0xff] %v2227_v42  ;;  %6190 = vmatprep.mubr.f32.mxu0 %v2227_v42  ;;  %6507 = vmatprep.mubr.f32.mxu1 %v2227_v42 }
 0x2b4   : > { %6191 = vmatmul.mubr.f32.gmra.mrb[52].mxu0 %v2228_v43  ;;  %6508 = vmatmul.mubr.f32.gmra.mrb[18].mxu1 %v2228_v43 }
 0x2b5   : > { %7053 = vmatprep.subr.bf16.mxu1 %v7052_v63  ;;  %6923 = vmatpush3.bf16.msra.mxu0 %v6920_v17 }
 0x2b6   : > { %7055 = vmatpush3.bf16.msra.mxu1 %v7052_v63  ;;  %6925 = vmatprep.subr.bf16.mxu0 %v6924_v30 }
 0x2b7   : > { %7057 = vmatprep.subr.bf16.mxu1 %v7056_v60 }
 0x2b9   : > { %6927 = vmatpush3.bf16.msra.mxu0 %v6924_v30 }
 0x2ba   : > { %6929 = vmatprep.subr.bf16.mxu0 %v6928_v14  ;;  %7059 = vmatpush3.bf16.msra.mxu1 %v7056_v60 }
 0x2bb   : > { %7061 = vmatprep.subr.bf16.mxu1 %v7060_v62 }
 0x2bd   : > { %6931 = vmatpush3.bf16.msra.mxu0 %v6928_v14 }
 0x2be   : > { %6933 = vmatprep.subr.bf16.mxu0 %v6932_v34  ;;  %7063 = vmatpush3.bf16.msra.mxu1 %v7060_v62  ;;  %v9041_v62 = vld [vmem:[#allocation2 + $0x47] sm:$0xff] }
 0x2bf   : > { %7065 = vmatprep.subr.bf16.mxu1 %v7064_v59 }
 0x2c1   : > { %6935 = vmatpush3.bf16.msra.mxu0 %v6932_v34 }
 0x2c2   : > { %6937 = vmatprep.subr.bf16.mxu0 %v6936_v39  ;;  %7067 = vmatpush3.bf16.msra.mxu1 %v7064_v59 }
 0x2c3   : > { %7069 = vmatprep.subr.bf16.mxu1 %v7068_v21 }
 0x2c5   : > { %6939 = vmatpush3.bf16.msra.mxu0 %v6936_v39  ;;  %v5456_v39 = vld [vmem:[%s9755_s4 + $0x128] sm:$0xff] }
 0x2c6   : > { %6941 = vmatprep.subr.bf16.mxu0 %v6940_v28  ;;  %7071 = vmatpush3.bf16.msra.mxu1 %v7068_v21  ;;  %v5518_v21 = vld [vmem:[%s9755_s4 + $0x318] sm:$0xff] }
 0x2c7   : > { %7073 = vmatprep.subr.bf16.mxu1 %v8994_v41 }
 0x2c9   : > { %6943 = vmatpush3.bf16.msra.mxu0 %v6940_v28  ;;  %v5457_v28 = vld [vmem:[%s9755_s4 + $0x130] sm:$0xff] }
 0x2ca   : > { %6945 = vmatprep.subr.bf16.mxu0 %v6944_v56 }
 0x2cb   : > { %v6112_v53 = vpop.f32.mrb[20].mxu0 }
 0x2cc   : > { %v2159_v22 = vmul.f32 %v8861_v52, %v6112_v53  ;;  %v2072_v5 = vpop.f32.mrb[21].mxu0 }
 0x2cd   : > { %v2158_v13 = vmul.f32 %v8861_v52, %v2072_v5  ;;  %v2313_v5 = vld [vmem:[#allocation2 + $0x7] sm:$0xff] }
 0x2ce   : > { %v2198_v25 = vadd.f32 %v8868_v29, %v2159_v22 }
 0x2cf   : > { %v2197_v16 = vadd.f32 %v8868_v29, %v2158_v13  ;;  %v5453_v13 = vld [vmem:[%s9755_s4 + $0x110] sm:$0xff] }
 0x2d0   : > { %v2230_v45 = vmax.f32 %v2198_v25, 0.0  ;;  %v5454_v25 = vld [vmem:[%s9755_s4 + $0x118] sm:$0xff] }
 0x2d1   : > { %v2229_v57 = vmax.f32 %v2197_v16, 0.0  ;;  %v6948_v46 = vpack.c.bf16 %v5454_v25, %v5453_v13  ;;  %v5455_v16 = vld [vmem:[%s9755_s4 + $0x120] sm:$0xff]  ;;  %v9159_v25 = vld [vmem:[#allocation2 + $0xa9] sm:$0xff] }
 0x2d2   : > { %2300 = vst [vmem:[#allocation2 + $0x170] sm:$0xff] %v2230_v45  ;;  %v6952_v60 = vpack.c.bf16 %v5456_v39, %v5455_v16  ;;  %v9168_v16 = vld [vmem:[#allocation2 + $0xef] sm:$0xff] }
 0x2d3   : > { %2299 = vst [vmem:[#allocation2 + $0x168] sm:$0xff] %v2229_v57  ;;  %6193 = vmatprep.mubr.f32.mxu0 %v2229_v57  ;;  %6510 = vmatprep.mubr.f32.mxu1 %v2229_v57  ;;  %v9031_v57 = vld [vmem:[#allocation2 + $0x27] sm:$0xff]  ;;  %v9170_v39 = vld [vmem:[#allocation2 + $0xb1] sm:$0xff] }
 0x2d4   : > { %6194 = vmatmul.mubr.f32.gmra.mrb[54].mxu0 %v2230_v45  ;;  %6511 = vmatmul.mubr.f32.gmra.mrb[20].mxu1 %v2230_v45 }
 0x2eb   : > { %v6115_v26 = vpop.f32.mrb[22].mxu0 }
 0x2ec   : > { %v2161_v43 = vmul.f32 %v8861_v52, %v6115_v26  ;;  %v2082_v42 = vpop.f32.mrb[23].mxu0  ;;  %v5460_v26 = vld [vmem:[%s9755_s4 + $0x148] sm:$0xff] }
 0x2ed   : > { %v2160_v18 = vmul.f32 %v8861_v52, %v2082_v42  ;;  %v9073_v42 = vld [vmem:[#allocation2 + $0x31] sm:$0xff] }
 0x2ee   : > { %v2200_v9 = vadd.f32 %v8868_v29, %v2161_v43  ;;  %v9071_v43 = vld [vmem:[#allocation2 + $0x6f] sm:$0xff] }
 0x2ef   : > { %v2199_v36 = vadd.f32 %v8868_v29, %v2160_v18  ;;  %v7076_v18 = vpack.c.bf16 %v5518_v21, %v5517_v3  ;;  %v9204_v3 = vld [vmem:[#allocation2 + $0xe9] sm:$0xff] }
 0x2f0   : > { %v2232_v11 = vmax.f32 %v2200_v9, 0.0  ;;  %v9076_v9 = vld [vmem:[#allocation2 + $0x87] sm:$0xff]  ;;  %v9207_v21 = vld [vmem:[#allocation2 + $0x12f] sm:$0xff] }
 0x2f1   : > { %v2231_v15 = vmax.f32 %v2199_v36, 0.0  ;;  %v5519_v36 = vld [vmem:[%s9755_s4 + $0x320] sm:$0xff] }
 0x2f2   : > { %2302 = vst [vmem:[#allocation2 + $0x190] sm:$0xff] %v2232_v11 }
 0x2f3   : > { %2301 = vst [vmem:[#allocation2 + $0x188] sm:$0xff] %v2231_v15  ;;  %6196 = vmatprep.mubr.f32.mxu0 %v2231_v15  ;;  %6513 = vmatprep.mubr.f32.mxu1 %v2231_v15  ;;  %v6960_v15 = vpack.c.bf16 %v5460_v26, %v5459_v27  ;;  %v9209_v27 = vld [vmem:[#allocation2 + $0xf1] sm:$0xff] }
 0x2f4   : > { %6197 = vmatmul.mubr.f32.gmra.mrb[56].mxu0 %v2232_v11  ;;  %6514 = vmatmul.mubr.f32.gmra.mrb[22].mxu1 %v2232_v11  ;;  %v5520_v11 = vld [vmem:[%s9755_s4 + $0x328] sm:$0xff] }
 0x30b   : > { %v6118_v1 = vpop.f32.mrb[24].mxu0 }
 0x30c   : > { %v2163_v37 = vmul.f32 %v8861_v52, %v6118_v1  ;;  %v2092_v40 = vpop.f32.mrb[25].mxu0  ;;  %v9096_v1 = vld [vmem:[#allocation2 + $0x8f] sm:$0xff] }
 0x30d   : > { %v2162_v8 = vmul.f32 %v8861_v52, %v2092_v40  ;;  %v7080_v40 = vpack.c.bf16 %v5520_v11, %v5519_v36  ;;  %v5531_v36 = vld [vmem:[%s9755_s4 + $0x380] sm:$0xff]  ;;  %v5532_v11 = vld [vmem:[%s9755_s4 + $0x388] sm:$0xff] }
 0x30e   : > { %v2202_v7 = vadd.f32 %v8868_v29, %v2163_v37  ;;  %v9098_v37 = vld [vmem:[#allocation2 + $0x51] sm:$0xff] }
 0x30f   : > { %v2201_v4 = vadd.f32 %v8868_v29, %v2162_v8  ;;  %v9101_v8 = vld [vmem:[#allocation2 + $0xa7] sm:$0xff] }
 0x310   : > { %v2234_v10 = vmax.f32 %v2202_v7, 0.0  ;;  %v5521_v7 = vld [vmem:[%s9755_s4 + $0x330] sm:$0xff] }
 0x311   : > { %v2233_v55 = vmax.f32 %v2201_v4, 0.0 }
 0x312   : > { %2304 = vst [vmem:[#allocation2 + $0x1b0] sm:$0xff] %v2234_v10 }
 0x313   : > { %2303 = vst [vmem:[#allocation2 + $0x1a8] sm:$0xff] %v2233_v55  ;;  %6199 = vmatprep.mubr.f32.mxu0 %v2233_v55  ;;  %6516 = vmatprep.mubr.f32.mxu1 %v2233_v55  ;;  %v5463_v55 = vld [vmem:[%s9755_s4 + $0x160] sm:$0xff] }
 0x314   : > { %6200 = vmatmul.mubr.f32.gmra.mrb[58].mxu0 %v2234_v10  ;;  %6517 = vmatmul.mubr.f32.gmra.mrb[24].mxu1 %v2234_v10  ;;  %v9111_v10 = vld [vmem:[#allocation2 + $0x69] sm:$0xff] }
 0x32b   : > { %v6121_v47 = vpop.f32.mrb[26].mxu0 }
 0x32c   : > { %v2165_v20 = vmul.f32 %v8861_v52, %v6121_v47  ;;  %v2102_v44 = vpop.f32.mrb[27].mxu0  ;;  %v5464_v47 = vld [vmem:[%s9755_s4 + $0x168] sm:$0xff] }
 0x32d   : > { %v2164_v17 = vmul.f32 %v8861_v52, %v2102_v44  ;;  %v9122_v44 = vld [vmem:[#allocation2 + $0x71] sm:$0xff] }
 0x32e   : > { %v2204_v63 = vadd.f32 %v8868_v29, %v2165_v20  ;;  %v9120_v20 = vld [vmem:[#allocation2 + $0xaf] sm:$0xff] }
 0x32f   : > { %v2203_v51 = vadd.f32 %v8868_v29, %v2164_v17 }
 0x330   : > { %v2236_v35 = vmax.f32 %v2204_v63, 0.0  ;;  %v9125_v63 = vld [vmem:[#allocation2 + $0xc7] sm:$0xff] }
 0x331   : > { %v2235_v30 = vmax.f32 %v2203_v51, 0.0  ;;  %v5523_v51 = vld [vmem:[%s9755_s4 + $0x340] sm:$0xff] }
 0x332   : > { %2306 = vst [vmem:[#allocation2 + $0x1d0] sm:$0xff] %v2236_v35 }
 0x333   : > { %2305 = vst [vmem:[#allocation2 + $0x1c8] sm:$0xff] %v2235_v30  ;;  %6202 = vmatprep.mubr.f32.mxu0 %v2235_v30  ;;  %6519 = vmatprep.mubr.f32.mxu1 %v2235_v30  ;;  %v6968_v30 = vpack.c.bf16 %v5464_v47, %v5463_v55  ;;  %v9243_v55 = vld [vmem:[#allocation2 + $0x187] sm:$0xff]  ;;  %v9245_v47 = vld [vmem:[#allocation2 + $0x131] sm:$0xff] }
 0x334   : > { %6203 = vmatmul.mubr.f32.gmra.mrb[60].mxu0 %v2236_v35  ;;  %6520 = vmatmul.mubr.f32.gmra.mrb[26].mxu1 %v2236_v35  ;;  %v5524_v35 = vld [vmem:[%s9755_s4 + $0x348] sm:$0xff] }
 0x34c   : > { %v6124_v31 = vpop.f32.mrb[28].mxu0 }
 0x34d   : > { %v2167_v61 = vmul.f32 %v8861_v52, %v6124_v31  ;;  %v2112_v14 = vpop.f32.mrb[29].mxu0  ;;  %v9135_v31 = vld [vmem:[#allocation2 + $0x89] sm:$0xff] }
 0x34e   : > { %v2166_v19 = vmul.f32 %v8861_v52, %v2112_v14  ;;  %v5466_v14 = vld [vmem:[%s9755_s4 + $0x178] sm:$0xff] }
 0x34f   : > { %v2206_v54 = vadd.f32 %v8868_v29, %v2167_v61  ;;  %v5465_v61 = vld [vmem:[%s9755_s4 + $0x170] sm:$0xff] }
 0x350   : > { %v2205_v53 = vadd.f32 %v8868_v29, %v2166_v19  ;;  %v9144_v19 = vld [vmem:[#allocation2 + $0xcf] sm:$0xff]  ;;  %v6972_v13 = vpack.c.bf16 %v5466_v14, %v5465_v61 }
 0x351   : > { %v2238_v34 = vmax.f32 %v2206_v54, 0.0  ;;  %v9146_v54 = vld [vmem:[#allocation2 + $0x91] sm:$0xff]  ;;  %v9261_v61 = vld [vmem:[#allocation2 + $0x169] sm:$0xff] }
 0x352   : > { %v2237_v22 = vmax.f32 %v2205_v53, 0.0  ;;  %v7088_v53 = vpack.c.bf16 %v5524_v35, %v5523_v51  ;;  %v9252_v51 = vld [vmem:[#allocation2 + $0x18f] sm:$0xff]  ;;  %v9255_v35 = vld [vmem:[#allocation2 + $0x1a7] sm:$0xff] }
 0x353   : > { %2308 = vst [vmem:[#allocation2 + $0x1f0] sm:$0xff] %v2238_v34  ;;  %v9264_v14 = vld [vmem:[#allocation2 + $0x1af] sm:$0xff] }
 0x354   : > { %2307 = vst [vmem:[#allocation2 + $0x1e8] sm:$0xff] %v2237_v22  ;;  %6205 = vmatprep.mubr.f32.mxu0 %v2237_v22  ;;  %6522 = vmatprep.mubr.f32.mxu1 %v2237_v22  ;;  %v5525_v22 = vld [vmem:[%s9755_s4 + $0x350] sm:$0xff] }
 0x355   : > { %6206 = vmatmul.mubr.f32.gmra.mrb[62].mxu0 %v2238_v34  ;;  %6523 = vmatmul.mubr.f32.gmra.mrb[28].mxu1 %v2238_v34  ;;  %v9149_v34 = vld [vmem:[#allocation2 + $0xe7] sm:$0xff] }
 0x356   : > { %6240 = vmatprep.mubr.f32.mxu0 %v2313_v5  ;;  %v5526_v5 = vld [vmem:[%s9755_s4 + $0x358] sm:$0xff] }
 0x359   : > { %v6127_v45 = vpop.f32.mrb[30].mxu0  ;;  %6241 = vmatmul.mubr.f32.vlgmr.msra.gmra.mrb[32].mxu0 %v2314_v33  ;;  %v5467_v33 = vld [vmem:[%s9755_s4 + $0x180] sm:$0xff] }
 0x35a   : > { %v2169_v50 = vmul.f32 %v8861_v52, %v6127_v45  ;;  %v2122_v23 = vpop.f32.mrb[31].mxu0  ;;  %6243 = vmatprep.mubr.f32.mxu0 %v9031_v57  ;;  %6947 = vmatpush3.bf16.msra.mxu0 %v6944_v56  ;;  %v5462_v56 = vld [vmem:[%s9755_s4 + $0x158] sm:$0xff]  ;;  %v7092_v45 = vpack.c.bf16 %v5526_v5, %v5525_v22  ;;  %v9273_v5 = vld [vmem:[#allocation2 + $0x189] sm:$0xff] }
 0x35b   : > { %v2168_v38 = vmul.f32 %v8861_v52, %v2122_v23  ;;  %6949 = vmatprep.subr.bf16.mxu0 %v6948_v46  ;;  %v5458_v52 = vld [vmem:[%s9755_s4 + $0x138] sm:$0xff]  ;;  %v6964_v4 = vpack.c.bf16 %v5462_v56, %v5461_v24  ;;  %v5527_v23 = vld [vmem:[%s9755_s4 + $0x360] sm:$0xff]  ;;  %v9225_v24 = vld [vmem:[#allocation2 + $0x14f] sm:$0xff]  ;;  %v9227_v56 = vpack.c.bf16 %v5532_v11, %v5531_v36 }
 0x35c   : > { %v2208_v58 = vadd.f32 %v8868_v29, %v2169_v50  ;;  %v6956_v59 = vpack.c.bf16 %v5458_v52, %v5457_v28  ;;  %v9173_v50 = vld [vmem:[#allocation2 + $0x107] sm:$0xff]  ;;  %v9190_v28 = vld [vmem:[#allocation2 + $0xd1] sm:$0xff] }
 0x35d   : > { %v2207_v49 = vadd.f32 %v8868_v29, %v2168_v38  ;;  %6244 = vmatmul.mubr.f32.gmra.mrb[34].mxu0 %v9037_v2  ;;  %v9050_v29 = vld [vmem:[#allocation2 + $0x4f] sm:$0xff]  ;;  %v5471_v2 = vld [vmem:[%s9755_s4 + $0x1a0] sm:$0xff] }
 0x35e   : > { %v2240_v32 = vmax.f32 %v2208_v58, 0.0  ;;  %6246 = vmatprep.mubr.f32.mxu0 %v9041_v62  ;;  %6951 = vmatpush3.bf16.msra.mxu0 %v6948_v46  ;;  %v5468_v46 = vld [vmem:[%s9755_s4 + $0x188] sm:$0xff]  ;;  %v9269_v22 = vld [vmem:[#allocation2 + $0x171] sm:$0xff] }
 0x35f   : > { %v2239_v6 = vmax.f32 %v2207_v49, 0.0  ;;  %6953 = vmatprep.subr.bf16.mxu0 %v6952_v60  ;;  %v5528_v38 = vld [vmem:[%s9755_s4 + $0x368] sm:$0xff]  ;;  %v2861_v36 = vld [vmem:[#allocation2 + $0x11] sm:$0xff] }
 0x360   : > { %2310 = vst [vmem:[#allocation2 + $0x210] sm:$0xff] %v2240_v32  ;;  %v9185_v58 = vld [vmem:[#allocation2 + $0xc9] sm:$0xff]  ;;  %v7096_v52 = vpack.c.bf16 %v5528_v38, %v5527_v23 }
 0x361   : > { %2309 = vst [vmem:[#allocation2 + $0x208] sm:$0xff] %v2239_v6  ;;  %6247 = vmatmul.mubr.f32.gmra.mrb[36].mxu0 %v9050_v29  ;;  %6525 = vmatprep.mubr.f32.mxu1 %v2239_v6  ;;  %v9188_v49 = vld [vmem:[#allocation2 + $0x10f] sm:$0xff] }
 0x362   : > { %6249 = vmatprep.mubr.f32.mxu0 %v9053_v12  ;;  %6526 = vmatmul.mubr.f32.gmra.mrb[30].mxu1 %v2240_v32  ;;  %v9193_v32 = vld [vmem:[#allocation2 + $0x127] sm:$0xff]  ;;  %v5529_v6 = vld [vmem:[%s9755_s4 + $0x370] sm:$0xff] }
 0x363   : > { %6560 = vmatprep.mubr.f32.mxu1 %v9062_v0  ;;  %6955 = vmatpush3.bf16.msra.mxu0 %v6952_v60  ;;  %v9181_v60 = vpack.c.bf16 %v5468_v46, %v5467_v33  ;;  %v9279_v33 = vld [vmem:[#allocation2 + $0x1e7] sm:$0xff]  ;;  %v9281_v46 = vld [vmem:[#allocation2 + $0x191] sm:$0xff] }
 0x364   : > { %6957 = vmatprep.subr.bf16.mxu0 %v6956_v59  ;;  %9768 = vst [vmem:[#allocation5_spill] sm:$0xff] %v9279_v33  ;;  %v2860_v23 = vld [vmem:[#allocation2 + $0x9] sm:$0xff] }
 0x365   : > { %6250 = vmatmul.mubr.f32.gmra.mrb[38].mxu0 %v9071_v43  ;;  %v9288_v38 = vld [vmem:[#allocation2 + $0x1ef] sm:$0xff] }
 0x366   : > { %6252 = vmatprep.mubr.f32.mxu0 %v9076_v9  ;;  %6561 = vmatmul.mubr.f32.vlgmr.msra.gmra.mrb[0].mxu1 %v9073_v42  ;;  %9769 = vst [vmem:[#allocation6_spill] sm:$0xff] %v9288_v38 }
 0x367   : > { %7075 = vmatpush3.bf16.msra.mxu1 %v8994_v41  ;;  %6563 = vmatprep.mubr.f32.mxu1 %v9086_v48  ;;  %v5522_v41 = vld [vmem:[%s9755_s4 + $0x338] sm:$0xff] }
 0x368   : > { %7077 = vmatprep.subr.bf16.mxu1 %v7076_v18  ;;  %6959 = vmatpush3.bf16.msra.mxu0 %v6956_v59  ;;  %v7084_v17 = vpack.c.bf16 %v5522_v41, %v5521_v7  ;;  %v5530_v59 = vld [vmem:[%s9755_s4 + $0x378] sm:$0xff]  ;;  %v9236_v41 = vld [vmem:[#allocation2 + $0x129] sm:$0xff] }
 0x369   : > { %6253 = vmatmul.mubr.f32.gmra.mrb[40].mxu0 %v9096_v1  ;;  %6961 = vmatprep.subr.bf16.mxu0 %v6960_v15  ;;  %v7100_v26 = vpack.c.bf16 %v5530_v59, %v5529_v6  ;;  %v9232_v7 = vld [vmem:[#allocation2 + $0x111] sm:$0xff] }
 0x36a   : > { %6255 = vmatprep.mubr.f32.mxu0 %v9101_v8  ;;  %6564 = vmatmul.mubr.f32.gmra.mrb[2].mxu1 %v9098_v37  ;;  %v5469_v6 = vld [vmem:[%s9755_s4 + $0x190] sm:$0xff]  ;;  %v5470_v59 = vld [vmem:[%s9755_s4 + $0x198] sm:$0xff] }
 0x36b   : > { %6566 = vmatprep.mubr.f32.mxu1 %v9111_v10  ;;  %7079 = vmatpush3.bf16.msra.mxu1 %v7076_v18  ;;  %v9212_v18 = vld [vmem:[#allocation2 + $0x147] sm:$0xff]  ;;  %v6980_v11 = vpack.c.bf16 %v5470_v59, %v5469_v6  ;;  %v9318_v59 = vld [vmem:[#allocation2 + $0x1f1] sm:$0xff] }
 0x36c   : > { %7081 = vmatprep.subr.bf16.mxu1 %v7080_v40  ;;  %6963 = vmatpush3.bf16.msra.mxu0 %v6960_v15  ;;  %v9222_v15 = vld [vmem:[#allocation2 + $0x109] sm:$0xff] }
 0x36d   : > { %6256 = vmatmul.mubr.f32.gmra.mrb[42].mxu0 %v9120_v20  ;;  %6965 = vmatprep.subr.bf16.mxu0 %v6964_v4 }
 0x36e   : > { %6258 = vmatprep.mubr.f32.mxu0 %v9125_v63  ;;  %6567 = vmatmul.mubr.f32.gmra.mrb[4].mxu1 %v9122_v44 }
 0x36f   : > { %6569 = vmatprep.mubr.f32.mxu1 %v9135_v31  ;;  %7083 = vmatpush3.bf16.msra.mxu1 %v7080_v40  ;;  %v9230_v40 = vld [vmem:[#allocation2 + $0x167] sm:$0xff] }
 0x370   : > { %7085 = vmatprep.subr.bf16.mxu1 %v7084_v17  ;;  %6967 = vmatpush3.bf16.msra.mxu0 %v6964_v4  ;;  %v9239_v4 = vld [vmem:[#allocation2 + $0x16f] sm:$0xff] }
 0x371   : > { %6259 = vmatmul.mubr.f32.gmra.mrb[44].mxu0 %v9144_v19  ;;  %6969 = vmatprep.subr.bf16.mxu0 %v6968_v30 }
 0x372   : > { %6261 = vmatprep.mubr.f32.mxu0 %v9149_v34  ;;  %6570 = vmatmul.mubr.f32.gmra.mrb[6].mxu1 %v9146_v54 }
 0x373   : > { %6572 = vmatprep.mubr.f32.mxu1 %v9159_v25  ;;  %7087 = vmatpush3.bf16.msra.mxu1 %v7084_v17  ;;  %v9249_v17 = vld [vmem:[#allocation2 + $0x149] sm:$0xff] }
 0x374   : > { %7089 = vmatprep.subr.bf16.mxu1 %v7088_v53  ;;  %6971 = vmatpush3.bf16.msra.mxu0 %v6968_v30  ;;  %v9257_v30 = vld [vmem:[#allocation2 + $0x151] sm:$0xff] }
 0x375   : > { %6262 = vmatmul.mubr.f32.gmra.mrb[46].mxu0 %v9168_v16  ;;  %6973 = vmatprep.subr.bf16.mxu0 %v6972_v13 }
 0x376   : > { %6264 = vmatprep.mubr.f32.mxu0 %v9173_v50  ;;  %6573 = vmatmul.mubr.f32.gmra.mrb[8].mxu1 %v9170_v39 }
 0x377   : > { %6575 = vmatprep.mubr.f32.mxu1 %v9185_v58  ;;  %7091 = vmatpush3.bf16.msra.mxu1 %v7088_v53  ;;  %v9267_v53 = vld [vmem:[#allocation2 + $0x1c7] sm:$0xff] }
 0x378   : > { %7093 = vmatprep.subr.bf16.mxu1 %v7092_v45  ;;  %6975 = vmatpush3.bf16.msra.mxu0 %v6972_v13  ;;  %v9276_v13 = vld [vmem:[#allocation2 + $0x1cf] sm:$0xff] }
 0x379   : > { %6265 = vmatmul.mubr.f32.gmra.mrb[48].mxu0 %v9188_v49  ;;  %6977 = vmatprep.subr.bf16.mxu0 %v9181_v60  ;;  %9767 = vst [vmem:[#allocation4_spill] sm:$0xff] %v9276_v13 }
 0x37a   : > { %6267 = vmatprep.mubr.f32.mxu0 %v9193_v32  ;;  %6576 = vmatmul.mubr.f32.gmra.mrb[10].mxu1 %v9190_v28 }
 0x37b   : > { %6578 = vmatprep.mubr.f32.mxu1 %v9204_v3  ;;  %7095 = vmatpush3.bf16.msra.mxu1 %v7092_v45  ;;  %v9285_v45 = vld [vmem:[#allocation2 + $0x1a9] sm:$0xff] }
 0x37c   : > { %7097 = vmatprep.subr.bf16.mxu1 %v7096_v52 }
 0x37d   : > { %6268 = vmatmul.mubr.f32.gmra.mrb[50].mxu0 %v9207_v21 }
 0x37e   : > { %6270 = vmatprep.mubr.f32.mxu0 %v9212_v18  ;;  %6579 = vmatmul.mubr.f32.gmra.mrb[12].mxu1 %v9209_v27 }
 0x37f   : > { %6581 = vmatprep.mubr.f32.mxu1 %v9222_v15  ;;  %7099 = vmatpush3.bf16.msra.mxu1 %v7096_v52  ;;  %v9291_v52 = vld [vmem:[#allocation2 + $0x1b1] sm:$0xff] }
 0x380   : > { %7101 = vmatprep.subr.bf16.mxu1 %v7100_v26 }
 0x381   : > { %6271 = vmatmul.mubr.f32.gmra.mrb[52].mxu0 %v9225_v24 }
 0x382   : > { %6273 = vmatprep.mubr.f32.mxu0 %v9230_v40  ;;  %6582 = vmatmul.mubr.f32.gmra.mrb[14].mxu1 %v9232_v7 }
 0x383   : > { %6584 = vmatprep.mubr.f32.mxu1 %v9236_v41  ;;  %7103 = vmatpush3.bf16.msra.mxu1 %v7100_v26  ;;  %v9300_v26 = vld [vmem:[#allocation2 + $0x1c9] sm:$0xff] }
 0x384   : > { %7105 = vmatprep.subr.bf16.mxu1 %v9227_v56 }
 0x385   : > { %6274 = vmatmul.mubr.f32.gmra.mrb[54].mxu0 %v9239_v4 }
 0x386   : > { %6276 = vmatprep.mubr.f32.mxu0 %v9243_v55  ;;  %6585 = vmatmul.mubr.f32.gmra.mrb[16].mxu1 %v9245_v47 }
 0x387   : > { %6587 = vmatprep.mubr.f32.mxu1 %v9249_v17 }
 0x389   : > { %6277 = vmatmul.mubr.f32.gmra.mrb[56].mxu0 %v9252_v51 }
 0x38a   : > { %6279 = vmatprep.mubr.f32.mxu0 %v9255_v35  ;;  %6588 = vmatmul.mubr.f32.gmra.mrb[18].mxu1 %v9257_v30 }
 0x38b   : > { %6590 = vmatprep.mubr.f32.mxu1 %v9261_v61 }
 0x38d   : > { %6280 = vmatmul.mubr.f32.gmra.mrb[58].mxu0 %v9264_v14 }
 0x38e   : > { %6282 = vmatprep.mubr.f32.mxu0 %v9267_v53  ;;  %6591 = vmatmul.mubr.f32.gmra.mrb[20].mxu1 %v9269_v22 }
 0x38f   : > { %6593 = vmatprep.mubr.f32.mxu1 %v9273_v5 }
 0x391   : > { %6283 = vmatmul.mubr.f32.gmra.mrb[60].mxu0 %v9276_v13  ;;  %v9328_v13 = vld [vmem:[#allocation2 + $0x209] sm:$0xff] }
 0x392   : > { %6285 = vmatprep.mubr.f32.mxu0 %v9279_v33  ;;  %6594 = vmatmul.mubr.f32.gmra.mrb[22].mxu1 %v9281_v46  ;;  %v5472_v33 = vld [vmem:[%s9755_s4 + $0x1a8] sm:$0xff] }
 0x393   : > { %6596 = vmatprep.mubr.f32.mxu1 %v9285_v45  ;;  %v6984_v6 = vpack.c.bf16 %v5472_v33, %v5471_v2  ;;  %v5475_v33 = vld [vmem:[%s9755_s4 + $0x1c0] sm:$0xff] }
 0x395   : > { %6286 = vmatmul.mubr.f32.gmra.mrb[62].mxu0 %v9288_v38  ;;  %v9303_v38 = vld [vmem:[#allocation2 + $0x1d1] sm:$0xff] }
 0x396   : > { %6597 = vmatmul.mubr.f32.gmra.mrb[24].mxu1 %v9291_v52  ;;  %6320 = vmatprep.mubr.f32.mxu0 %v2860_v23  ;;  %v9313_v23 = vld [vmem:[#allocation2 + $0x1e9] sm:$0xff] }
 0x397   : > { %6599 = vmatprep.mubr.f32.mxu1 %v9300_v26 }
 0x399   : > { %6321 = vmatmul.mubr.f32.vlgmr.msra.gmra.mrb[32].mxu0 %v2861_v36  ;;  %v5473_v36 = vld [vmem:[%s9755_s4 + $0x1b0] sm:$0xff] }
 0x39a   : > { %6323 = vmatprep.mubr.f32.mxu0 %v9062_v0  ;;  %6600 = vmatmul.mubr.f32.gmra.mrb[26].mxu1 %v9303_v38  ;;  %v5474_v0 = vld [vmem:[%s9755_s4 + $0x1b8] sm:$0xff] }
 0x39b   : > { %6602 = vmatprep.mubr.f32.mxu1 %v9313_v23  ;;  %6979 = vmatpush3.bf16.msra.mxu0 %v9181_v60  ;;  %v6988_v2 = vpack.c.bf16 %v5474_v0, %v5473_v36  ;;  %v5533_v60 = vld [vmem:[%s9755_s4 + $0x390] sm:$0xff]  ;;  %v5536_v36 = vld [vmem:[%s9755_s4 + $0x3a8] sm:$0xff] }
 0x39c   : > { %6981 = vmatprep.subr.bf16.mxu0 %v6980_v11 }
 0x39d   : > { %6324 = vmatmul.mubr.f32.gmra.mrb[34].mxu0 %v9073_v42  ;;  %v9332_v42 = vld [vmem:[#allocation2 + $0x211] sm:$0xff] }
 0x39e   : > { %6326 = vmatprep.mubr.f32.mxu0 %v9086_v48  ;;  %6603 = vmatmul.mubr.f32.gmra.mrb[28].mxu1 %v9318_v59  ;;  %v5534_v48 = vld [vmem:[%s9755_s4 + $0x398] sm:$0xff] }
 0x39f   : > { %6605 = vmatprep.mubr.f32.mxu1 %v9328_v13  ;;  %6983 = vmatpush3.bf16.msra.mxu0 %v6980_v11  ;;  %v7108_v11 = vpack.c.bf16 %v5534_v48, %v5533_v60  ;;  %v5538_v48 = vld [vmem:[%s9755_s4 + $0x3b8] sm:$0xff] }
 0x3a0   : > { %6985 = vmatprep.subr.bf16.mxu0 %v6984_v6 }
 0x3a1   : > { %6327 = vmatmul.mubr.f32.gmra.mrb[36].mxu0 %v9098_v37  ;;  %v5476_v37 = vld [vmem:[%s9755_s4 + $0x1c8] sm:$0xff] }
 0x3a2   : > { %6329 = vmatprep.mubr.f32.mxu0 %v9111_v10  ;;  %6606 = vmatmul.mubr.f32.gmra.mrb[30].mxu1 %v9332_v42  ;;  %v5535_v10 = vld [vmem:[%s9755_s4 + $0x3a0] sm:$0xff]  ;;  %v6992_v0 = vpack.c.bf16 %v5476_v37, %v5475_v33  ;;  %v5540_v37 = vld [vmem:[%s9755_s4 + $0x3c8] sm:$0xff] }
 0x3a3   : > { %6640 = vmatprep.mubr.f32.mxu1 %v9041_v62  ;;  %6987 = vmatpush3.bf16.msra.mxu0 %v6984_v6  ;;  %v5477_v6 = vld [vmem:[%s9755_s4 + $0x1d0] sm:$0xff]  ;;  %v7112_v60 = vpack.c.bf16 %v5536_v36, %v5535_v10 }
 0x3a4   : > { %6989 = vmatprep.subr.bf16.mxu0 %v6988_v2 }
 0x3a5   : > { %6330 = vmatmul.mubr.f32.gmra.mrb[38].mxu0 %v9122_v44  ;;  %v5478_v44 = vld [vmem:[%s9755_s4 + $0x1d8] sm:$0xff] }
 0x3a6   : > { %6332 = vmatprep.mubr.f32.mxu0 %v9135_v31  ;;  %6641 = vmatmul.mubr.f32.vlgmr.msra.gmra.mrb[0].mxu1 %v9050_v29  ;;  %v5537_v31 = vld [vmem:[%s9755_s4 + $0x3b0] sm:$0xff]  ;;  %v6996_v33 = vpack.c.bf16 %v5478_v44, %v5477_v6 }
 0x3a7   : > { %7107 = vmatpush3.bf16.msra.mxu1 %v9227_v56  ;;  %6643 = vmatprep.mubr.f32.mxu1 %v9053_v12  ;;  %v5479_v56 = vld [vmem:[%s9755_s4 + $0x1e0] sm:$0xff] }
 0x3a8   : > { %7109 = vmatprep.subr.bf16.mxu1 %v7108_v11  ;;  %6991 = vmatpush3.bf16.msra.mxu0 %v6988_v2  ;;  %v7116_v2 = vpack.c.bf16 %v5538_v48, %v5537_v31  ;;  %v5545_v31 = vld [vmem:[%s9755_s4 + $0x3f0] sm:$0xff]  ;;  %v5546_v48 = vld [vmem:[%s9755_s4 + $0x3f8] sm:$0xff] }
 0x3a9   : > { %6333 = vmatmul.mubr.f32.gmra.mrb[40].mxu0 %v9146_v54  ;;  %6993 = vmatprep.subr.bf16.mxu0 %v6992_v0  ;;  %v5480_v54 = vld [vmem:[%s9755_s4 + $0x1e8] sm:$0xff] }
 0x3aa   : > { %6335 = vmatprep.mubr.f32.mxu0 %v9159_v25  ;;  %6644 = vmatmul.mubr.f32.gmra.mrb[2].mxu1 %v9071_v43  ;;  %v5539_v25 = vld [vmem:[%s9755_s4 + $0x3c0] sm:$0xff]  ;;  %v7000_v10 = vpack.c.bf16 %v5480_v54, %v5479_v56  ;;  %v5548_v54 = vld [vmem:[%s9755_s4 + $0x408] sm:$0xff] }
 0x3ab   : > { %6646 = vmatprep.mubr.f32.mxu1 %v9076_v9  ;;  %7111 = vmatpush3.bf16.msra.mxu1 %v7108_v11  ;;  %v5481_v11 = vld [vmem:[%s9755_s4 + $0x1f0] sm:$0xff]  ;;  %v7120_v36 = vpack.c.bf16 %v5540_v37, %v5539_v25  ;;  %v5547_v56 = vld [vmem:[%s9755_s4 + $0x400] sm:$0xff]  ;;  %v9770_v25 = vld [vmem:[#allocation4_spill] sm:$0xff] }
 0x3ac   : > { %7113 = vmatprep.subr.bf16.mxu1 %v7112_v60  ;;  %6995 = vmatpush3.bf16.msra.mxu0 %v6992_v0  ;;  %v5542_v0 = vld [vmem:[%s9755_s4 + $0x3d8] sm:$0xff]  ;;  %v9771_v37 = vld [vmem:[#allocation5_spill] sm:$0xff] }
 0x3ad   : > { %6336 = vmatmul.mubr.f32.gmra.mrb[42].mxu0 %v9170_v39  ;;  %6997 = vmatprep.subr.bf16.mxu0 %v6996_v33  ;;  %v5482_v39 = vld [vmem:[%s9755_s4 + $0x1f8] sm:$0xff] }
 0x3ae   : > { %6338 = vmatprep.mubr.f32.mxu0 %v9185_v58  ;;  %6647 = vmatmul.mubr.f32.gmra.mrb[4].mxu1 %v9096_v1  ;;  %v5541_v58 = vld [vmem:[%s9755_s4 + $0x3d0] sm:$0xff]  ;;  %v7004_v6 = vpack.c.bf16 %v5482_v39, %v5481_v11  ;;  %v9773_v11 = vld [vmem:[#allocation6_spill] sm:$0xff]  ;;  %v9465_v39 = vld [vmem:[#allocation2 + $0x207] sm:$0xff] }
 0x3af   : > { %6649 = vmatprep.mubr.f32.mxu1 %v9101_v8  ;;  %7115 = vmatpush3.bf16.msra.mxu1 %v7112_v60  ;;  %v7124_v44 = vpack.c.bf16 %v5542_v0, %v5541_v58  ;;  %v5544_v60 = vld [vmem:[%s9755_s4 + $0x3e8] sm:$0xff]  ;;  %v5550_v0 = vld [vmem:[%s9755_s4 + $0x418] sm:$0xff] }
 0x3b0   : > { %7117 = vmatprep.subr.bf16.mxu1 %v7116_v2  ;;  %6999 = vmatpush3.bf16.msra.mxu0 %v6996_v33  ;;  %v7132_v33 = vpack.c.bf16 %v5546_v48, %v5545_v31  ;;  %v9469_v58 = vld [vmem:[#allocation2 + $0x20f] sm:$0xff]  ;;  %v5555_v48 = vld [vmem:[%s9755_s4 + $0x440] sm:$0xff] }
 0x3b1   : > { %6339 = vmatmul.mubr.f32.gmra.mrb[44].mxu0 %v9190_v28  ;;  %7001 = vmatprep.subr.bf16.mxu0 %v7000_v10  ;;  %v5543_v28 = vld [vmem:[%s9755_s4 + $0x3e0] sm:$0xff] }
 0x3b2   : > { %6341 = vmatprep.mubr.f32.mxu0 %v9204_v3  ;;  %6650 = vmatmul.mubr.f32.gmra.mrb[6].mxu1 %v9120_v20  ;;  %v7128_v3 = vpack.c.bf16 %v5544_v60, %v5543_v28  ;;  %v4394_v28 = vld [vmem:[#allocation2 + $0x68] sm:$0xff]  ;;  %v5553_v60 = vld [vmem:[%s9755_s4 + $0x430] sm:$0xff] }
 0x3b3   : > { %6652 = vmatprep.mubr.f32.mxu1 %v9125_v63  ;;  %7119 = vmatpush3.bf16.msra.mxu1 %v7116_v2  ;;  %v7136_v2 = vpack.c.bf16 %v5548_v54, %v5547_v56  ;;  %v5557_v54 = vld [vmem:[%s9755_s4 + $0x450] sm:$0xff] }
 0x3b4   : > { %7121 = vmatprep.subr.bf16.mxu1 %v7120_v36  ;;  %7003 = vmatpush3.bf16.msra.mxu0 %v7000_v10  ;;  %v9772_v10 = vld [vmem:[#allocation3_spill] sm:$0xff] }
 0x3b5   : > { %6342 = vmatmul.mubr.f32.gmra.mrb[46].mxu0 %v9209_v27  ;;  %7005 = vmatprep.subr.bf16.mxu0 %v7004_v6 }
 0x3b6   : > { %6344 = vmatprep.mubr.f32.mxu0 %v9222_v15  ;;  %6653 = vmatmul.mubr.f32.gmra.mrb[8].mxu1 %v9144_v19 }
 0x3b7   : > { %6655 = vmatprep.mubr.f32.mxu1 %v9149_v34  ;;  %7123 = vmatpush3.bf16.msra.mxu1 %v7120_v36  ;;  %v4116_v36 = vld [vmem:[#allocation2 + $0x227] sm:$0xff] }
 0x3b8   : > { %7125 = vmatprep.subr.bf16.mxu1 %v7124_v44  ;;  %7007 = vmatpush3.bf16.msra.mxu0 %v7004_v6  ;;  %v4393_v6 = vld [vmem:[#allocation2 + $0x50] sm:$0xff] }
 0x3b9   : > { %6345 = vmatmul.mubr.f32.gmra.mrb[48].mxu0 %v9232_v7 }
 0x3ba   : > { %6347 = vmatprep.mubr.f32.mxu0 %v9236_v41  ;;  %6656 = vmatmul.mubr.f32.gmra.mrb[10].mxu1 %v9168_v16 }
 0x3bb   : > { %6658 = vmatprep.mubr.f32.mxu1 %v9173_v50  ;;  %7127 = vmatpush3.bf16.msra.mxu1 %v7124_v44  ;;  %v5552_v44 = vld [vmem:[%s9755_s4 + $0x428] sm:$0xff] }
 0x3bc   : > { %7129 = vmatprep.subr.bf16.mxu1 %v7128_v3 }
 0x3bd   : > { %6348 = vmatmul.mubr.f32.gmra.mrb[50].mxu0 %v9245_v47 }
 0x3be   : > { %6350 = vmatprep.mubr.f32.mxu0 %v9249_v17  ;;  %6659 = vmatmul.mubr.f32.gmra.mrb[12].mxu1 %v9188_v49 }
 0x3bf   : > { %6661 = vmatprep.mubr.f32.mxu1 %v9193_v32  ;;  %7131 = vmatpush3.bf16.msra.mxu1 %v7128_v3  ;;  %v5554_v3 = vld [vmem:[%s9755_s4 + $0x438] sm:$0xff] }
 0x3c0   : > { %7133 = vmatprep.subr.bf16.mxu1 %v7132_v33  ;;  %v7148_v31 = vpack.c.bf16 %v5554_v3, %v5553_v60  ;;  %v4700_v60 = vld [vmem:[#allocation2 + $0x69] sm:$0xff] }
 0x3c1   : > { %6351 = vmatmul.mubr.f32.gmra.mrb[52].mxu0 %v9257_v30  ;;  %v4702_v3 = vld [vmem:[#allocation2 + $0x89] sm:$0xff] }
 0x3c2   : > { %6353 = vmatprep.mubr.f32.mxu0 %v9261_v61  ;;  %6662 = vmatmul.mubr.f32.gmra.mrb[14].mxu1 %v9207_v21 }
 0x3c3   : > { %6664 = vmatprep.mubr.f32.mxu1 %v9212_v18  ;;  %7135 = vmatpush3.bf16.msra.mxu1 %v7132_v33  ;;  %v5556_v33 = vld [vmem:[%s9755_s4 + $0x448] sm:$0xff] }
 0x3c4   : > { %7137 = vmatprep.subr.bf16.mxu1 %v7136_v2  ;;  %v7152_v56 = vpack.c.bf16 %v5556_v33, %v5555_v48  ;;  %v4706_v48 = vld [vmem:[#allocation2 + $0xc9] sm:$0xff]  ;;  %v4707_v33 = vld [vmem:[#allocation2 + $0xd1] sm:$0xff] }
 0x3c5   : > { %6354 = vmatmul.mubr.f32.gmra.mrb[54].mxu0 %v9269_v22 }
 0x3c6   : > { %6356 = vmatprep.mubr.f32.mxu0 %v9273_v5  ;;  %6665 = vmatmul.mubr.f32.gmra.mrb[16].mxu1 %v9225_v24 }
 0x3c7   : > { %6667 = vmatprep.mubr.f32.mxu1 %v9230_v40 }
 0x3c9   : > { %6357 = vmatmul.mubr.f32.gmra.mrb[56].mxu0 %v9281_v46 }
 0x3ca   : > { %6359 = vmatprep.mubr.f32.mxu0 %v9285_v45  ;;  %6668 = vmatmul.mubr.f32.gmra.mrb[18].mxu1 %v9239_v4 }
 0x3cb   : > { %6670 = vmatprep.mubr.f32.mxu1 %v9243_v55 }
 0x3cd   : > { %6360 = vmatmul.mubr.f32.gmra.mrb[58].mxu0 %v9291_v52 }
 0x3ce   : > { %6362 = vmatprep.mubr.f32.mxu0 %v9300_v26  ;;  %6671 = vmatmul.mubr.f32.gmra.mrb[20].mxu1 %v9252_v51 }
 0x3cf   : > { %6673 = vmatprep.mubr.f32.mxu1 %v9255_v35 }
 0x3d1   : > { %6363 = vmatmul.mubr.f32.gmra.mrb[60].mxu0 %v9303_v38 }
 0x3d2   : > { %6365 = vmatprep.mubr.f32.mxu0 %v9313_v23  ;;  %6674 = vmatmul.mubr.f32.gmra.mrb[22].mxu1 %v9264_v14 }
 0x3d3   : > { %6676 = vmatprep.mubr.f32.mxu1 %v9267_v53 }
 0x3d5   : > { %6366 = vmatmul.mubr.f32.gmra.mrb[62].mxu0 %v9318_v59 }
 0x3d6   : > { %6400 = vmatprep.mubr.f32.mxu0 %v9031_v57  ;;  %6677 = vmatmul.mubr.f32.gmra.mrb[24].mxu1 %v9770_v25  ;;  %v4117_v57 = vld [vmem:[#allocation2 + $0x22f] sm:$0xff] }
 0x3d7   : > { %6679 = vmatprep.mubr.f32.mxu1 %v9771_v37 }
 0x3d9   : > { %6401 = vmatmul.mubr.f32.vlgmr.msra.gmra.mrb[32].mxu0 %v9772_v10 }
 0x3da   : > { %6403 = vmatprep.mubr.f32.mxu0 %v9041_v62  ;;  %6680 = vmatmul.mubr.f32.gmra.mrb[26].mxu1 %v9773_v11  ;;  %v5549_v62 = vld [vmem:[%s9755_s4 + $0x410] sm:$0xff] }
 0x3db   : > { %6682 = vmatprep.mubr.f32.mxu1 %v9465_v39 }
 0x3dd   : > { %6404 = vmatmul.mubr.f32.gmra.mrb[34].mxu0 %v9050_v29  ;;  %v4392_v29 = vld [vmem:[#allocation2 + $0x48] sm:$0xff] }
 0x3de   : > { %6406 = vmatprep.mubr.f32.mxu0 %v9053_v12  ;;  %6683 = vmatmul.mubr.f32.gmra.mrb[28].mxu1 %v9469_v58  ;;  %v7140_v12 = vpack.c.bf16 %v5550_v0, %v5549_v62  ;;  %v5561_v0 = vld [vmem:[%s9755_s4 + $0x470] sm:$0xff] }
 0x3df   : > { %6685 = vmatprep.mubr.f32.mxu1 %v4116_v36  ;;  %v5559_v36 = vld [vmem:[%s9755_s4 + $0x460] sm:$0xff] }
 0x3e1   : > { %6407 = vmatmul.mubr.f32.gmra.mrb[36].mxu0 %v9071_v43  ;;  %v5551_v43 = vld [vmem:[%s9755_s4 + $0x420] sm:$0xff] }
 0x3e2   : > { %6409 = vmatprep.mubr.f32.mxu0 %v9076_v9  ;;  %6686 = vmatmul.mubr.f32.gmra.mrb[30].mxu1 %v4117_v57  ;;  %v7144_v9 = vpack.c.bf16 %v5552_v44, %v5551_v43  ;;  %v5560_v57 = vld [vmem:[%s9755_s4 + $0x468] sm:$0xff]  ;;  %v4407_v43 = vld [vmem:[#allocation2 + $0x130] sm:$0xff] }
 0x3e3   : > { %6720 = vmatprep.mubr.f32.mxu1 %v4392_v29  ;;  %v7160_v62 = vpack.c.bf16 %v5560_v57, %v5559_v36  ;;  %v5562_v29 = vld [vmem:[%s9755_s4 + $0x478] sm:$0xff]  ;;  %v4411_v44 = vld [vmem:[#allocation2 + $0x170] sm:$0xff] }
 0x3e5   : > { %6410 = vmatmul.mubr.f32.gmra.mrb[38].mxu0 %v9096_v1  ;;  %v4395_v1 = vld [vmem:[#allocation2 + $0x70] sm:$0xff] }
 0x3e6   : > { %6412 = vmatprep.mubr.f32.mxu0 %v9101_v8  ;;  %6721 = vmatmul.mubr.f32.vlgmr.msra.gmra.mrb[0].mxu1 %v4393_v6  ;;  %v4396_v8 = vld [vmem:[#allocation2 + $0x88] sm:$0xff] }
 0x3e7   : > { %7139 = vmatpush3.bf16.msra.mxu1 %v7136_v2  ;;  %6723 = vmatprep.mubr.f32.mxu1 %v4394_v28  ;;  %v5558_v2 = vld [vmem:[%s9755_s4 + $0x458] sm:$0xff]  ;;  %v4406_v6 = vld [vmem:[#allocation2 + $0x128] sm:$0xff] }
 0x3e8   : > { %7141 = vmatprep.subr.bf16.mxu1 %v7140_v12  ;;  %v7156_v10 = vpack.c.bf16 %v5558_v2, %v5557_v54  ;;  %v4418_v28 = vld [vmem:[#allocation2 + $0x1e8] sm:$0xff] }
 0x3e9   : > { %6413 = vmatmul.mubr.f32.gmra.mrb[40].mxu0 %v9120_v20  ;;  %v4397_v20 = vld [vmem:[#allocation2 + $0x90] sm:$0xff] }
 0x3ea   : > { %6415 = vmatprep.mubr.f32.mxu0 %v9125_v63  ;;  %6724 = vmatmul.mubr.f32.gmra.mrb[2].mxu1 %v4395_v1  ;;  %v4398_v63 = vld [vmem:[#allocation2 + $0xa8] sm:$0xff] }
 0x3eb   : > { %6726 = vmatprep.mubr.f32.mxu1 %v4396_v8  ;;  %7143 = vmatpush3.bf16.msra.mxu1 %v7140_v12  ;;  %v7164_v12 = vpack.c.bf16 %v5562_v29, %v5561_v0  ;;  %v7445_v1 = vld [vmem:[#allocation2 + $0x8] sm:$0xff]  ;;  %v4703_v8 = vld [vmem:[#allocation2 + $0x91] sm:$0xff] }
 0x3ec   : > { %7145 = vmatprep.subr.bf16.mxu1 %v7144_v9 }
 0x3ed   : > { %6416 = vmatmul.mubr.f32.gmra.mrb[42].mxu0 %v9144_v19  ;;  %v4399_v19 = vld [vmem:[#allocation2 + $0xb0] sm:$0xff] }
 0x3ee   : > { %6418 = vmatprep.mubr.f32.mxu0 %v9149_v34  ;;  %6727 = vmatmul.mubr.f32.gmra.mrb[4].mxu1 %v4397_v20  ;;  %v4400_v34 = vld [vmem:[#allocation2 + $0xc8] sm:$0xff]  ;;  %v4705_v20 = vld [vmem:[#allocation2 + $0xb1] sm:$0xff] }
 0x3ef   : > { %6729 = vmatprep.mubr.f32.mxu1 %v4398_v63  ;;  %7147 = vmatpush3.bf16.msra.mxu1 %v7144_v9  ;;  %v4421_v9 = vld [vmem:[#allocation2 + $0x210] sm:$0xff] }
 0x3f0   : > { %7149 = vmatprep.subr.bf16.mxu1 %v7148_v31  ;;  %v4708_v63 = vld [vmem:[#allocation2 + $0xe9] sm:$0xff] }
 0x3f1   : > { %6419 = vmatmul.mubr.f32.gmra.mrb[44].mxu0 %v9168_v16  ;;  %v4401_v16 = vld [vmem:[#allocation2 + $0xd0] sm:$0xff] }
 0x3f2   : > { %6421 = vmatprep.mubr.f32.mxu0 %v9173_v50  ;;  %6730 = vmatmul.mubr.f32.gmra.mrb[6].mxu1 %v4399_v19  ;;  %v4402_v50 = vld [vmem:[#allocation2 + $0xe8] sm:$0xff] }
 0x3f3   : > { %6732 = vmatprep.mubr.f32.mxu1 %v4400_v34  ;;  %7151 = vmatpush3.bf16.msra.mxu1 %v7148_v31  ;;  %v4704_v31 = vld [vmem:[#allocation2 + $0xa9] sm:$0xff] }
 0x3f4   : > { %7153 = vmatprep.subr.bf16.mxu1 %v7152_v56 }
 0x3f5   : > { %6422 = vmatmul.mubr.f32.gmra.mrb[46].mxu0 %v9188_v49  ;;  %v4403_v49 = vld [vmem:[#allocation2 + $0xf0] sm:$0xff] }
 0x3f6   : > { %6424 = vmatprep.mubr.f32.mxu0 %v9193_v32  ;;  %6733 = vmatmul.mubr.f32.gmra.mrb[8].mxu1 %v4401_v16  ;;  %v4404_v32 = vld [vmem:[#allocation2 + $0x108] sm:$0xff] }
 0x3f7   : > { %6735 = vmatprep.mubr.f32.mxu1 %v4402_v50  ;;  %7155 = vmatpush3.bf16.msra.mxu1 %v7152_v56 }
 0x3f8   : > { %7157 = vmatprep.subr.bf16.mxu1 %v7156_v10 }
 0x3f9   : > { %6425 = vmatmul.mubr.f32.gmra.mrb[48].mxu0 %v9207_v21  ;;  %v4405_v21 = vld [vmem:[#allocation2 + $0x110] sm:$0xff] }
 0x3fa   : > { %6427 = vmatprep.mubr.f32.mxu0 %v9212_v18  ;;  %6736 = vmatmul.mubr.f32.gmra.mrb[10].mxu1 %v4403_v49  ;;  %v4408_v18 = vld [vmem:[#allocation2 + $0x148] sm:$0xff] }
 0x3fb   : > { %6738 = vmatprep.mubr.f32.mxu1 %v4404_v32  ;;  %7159 = vmatpush3.bf16.msra.mxu1 %v7156_v10 }
 0x3fc   : > { %7161 = vmatprep.subr.bf16.mxu1 %v7160_v62 }
 0x3fd   : > { %6428 = vmatmul.mubr.f32.gmra.mrb[50].mxu0 %v9225_v24  ;;  %v4409_v24 = vld [vmem:[#allocation2 + $0x150] sm:$0xff] }
 0x3fe   : > { %6430 = vmatprep.mubr.f32.mxu0 %v9230_v40  ;;  %6739 = vmatmul.mubr.f32.gmra.mrb[12].mxu1 %v4405_v21  ;;  %v4410_v40 = vld [vmem:[#allocation2 + $0x168] sm:$0xff]  ;;  %v9614_v21 = vld [vmem:[%s9756_s5] ss:$0 sm:$0xff] }
 0x3ff   : > { %6741 = vmatprep.mubr.f32.mxu1 %v4406_v6  ;;  %7163 = vmatpush3.bf16.msra.mxu1 %v7160_v62 }
 0x400   : > { %7165 = vmatprep.subr.bf16.mxu1 %v7164_v12 }
 0x401   : > { %6431 = vmatmul.mubr.f32.gmra.mrb[52].mxu0 %v9239_v4  ;;  %v4412_v4 = vld [vmem:[#allocation2 + $0x188] sm:$0xff] }
 0x402   : > { %6433 = vmatprep.mubr.f32.mxu0 %v9243_v55  ;;  %6742 = vmatmul.mubr.f32.gmra.mrb[14].mxu1 %v4407_v43  ;;  %v4413_v55 = vld [vmem:[#allocation2 + $0x190] sm:$0xff] }
 0x403   : > { %6744 = vmatprep.mubr.f32.mxu1 %v4408_v18  ;;  %7167 = vmatpush3.bf16.msra.mxu1 %v7164_v12  ;;  %v9619_v18 = vld [vmem:[%s9757_s6] ss:$0 sm:$0xff] }
 0x405   : > { %6434 = vmatmul.mubr.f32.gmra.mrb[54].mxu0 %v9252_v51  ;;  %v4414_v51 = vld [vmem:[#allocation2 + $0x1a8] sm:$0xff] }
 0x406   : > { %6436 = vmatprep.mubr.f32.mxu0 %v9255_v35  ;;  %6745 = vmatmul.mubr.f32.gmra.mrb[16].mxu1 %v4409_v24  ;;  %v4415_v35 = vld [vmem:[#allocation2 + $0x1b0] sm:$0xff] }
 0x407   : > { %6747 = vmatprep.mubr.f32.mxu1 %v4410_v40 }
 0x409   : > { %6437 = vmatmul.mubr.f32.gmra.mrb[56].mxu0 %v9264_v14  ;;  %v4416_v14 = vld [vmem:[#allocation2 + $0x1c8] sm:$0xff] }
 0x40a   : > { %6439 = vmatprep.mubr.f32.mxu0 %v9267_v53  ;;  %6748 = vmatmul.mubr.f32.gmra.mrb[18].mxu1 %v4411_v44  ;;  %v4417_v53 = vld [vmem:[#allocation2 + $0x1d0] sm:$0xff] }
 0x40b   : > { %6750 = vmatprep.mubr.f32.mxu1 %v4412_v4 }
 0x40d   : > { %6440 = vmatmul.mubr.f32.gmra.mrb[58].mxu0 %v9770_v25  ;;  %v4419_v25 = vld [vmem:[#allocation2 + $0x1f0] sm:$0xff] }
 0x40e   : > { %6442 = vmatprep.mubr.f32.mxu0 %v9771_v37  ;;  %6751 = vmatmul.mubr.f32.gmra.mrb[20].mxu1 %v4413_v55  ;;  %v4420_v37 = vld [vmem:[#allocation2 + $0x208] sm:$0xff] }
 0x40f   : > { %6753 = vmatprep.mubr.f32.mxu1 %v4414_v51 }
 0x411   : > { %6443 = vmatmul.mubr.f32.gmra.mrb[60].mxu0 %v9773_v11  ;;  %v4698_v11 = vld [vmem:[#allocation2 + $0x49] sm:$0xff] }
 0x412   : > { %6445 = vmatprep.mubr.f32.mxu0 %v9465_v39  ;;  %6754 = vmatmul.mubr.f32.gmra.mrb[22].mxu1 %v4415_v35  ;;  %v4699_v39 = vld [vmem:[#allocation2 + $0x51] sm:$0xff] }
 0x413   : > { %6756 = vmatprep.mubr.f32.mxu1 %v4416_v14 }
 0x415   : > { %6446 = vmatmul.mubr.f32.gmra.mrb[62].mxu0 %v9469_v58  ;;  %v4701_v58 = vld [vmem:[#allocation2 + $0x71] sm:$0xff] }
 0x416   : > { %6757 = vmatmul.mubr.f32.gmra.mrb[24].mxu1 %v4417_v53 }
 0x417   : > { %6759 = vmatprep.mubr.f32.mxu1 %v4418_v28 }
 0x41a   : > { %6760 = vmatmul.mubr.f32.gmra.mrb[26].mxu1 %v4419_v25 }
 0x41b   : > { %6762 = vmatprep.mubr.f32.mxu1 %v4420_v37 }
 0x41e   : > { %6763 = vmatmul.mubr.f32.gmra.mrb[28].mxu1 %v4421_v9 }
 0x41f   : > { %6765 = vmatprep.mubr.f32.mxu1 %v7445_v1 }
 0x422   : > { %6766 = vmatmul.mubr.f32.gmra.mrb[30].mxu1 %v7445_v1 }
 0x423   : > { %6800 = vmatprep.mubr.f32.mxu1 %v4698_v11 }
 0x426   : > { %6801 = vmatmul.mubr.f32.vlgmr.msra.gmra.mrb[0].mxu1 %v4699_v39 }
 0x427   : > { %6803 = vmatprep.mubr.f32.mxu1 %v4700_v60 }
 0x42a   : > { %6804 = vmatmul.mubr.f32.gmra.mrb[2].mxu1 %v4701_v58 }
 0x42b   : > { %6806 = vmatprep.mubr.f32.mxu1 %v4702_v3 }
 0x42e   : > { %6807 = vmatmul.mubr.f32.gmra.mrb[4].mxu1 %v4703_v8 }
 0x42f   : > { %6809 = vmatprep.mubr.f32.mxu1 %v4704_v31 }
 0x432   : > { %6810 = vmatmul.mubr.f32.gmra.mrb[6].mxu1 %v4705_v20 }
 0x433   : > { %6812 = vmatprep.mubr.f32.mxu1 %v4706_v48 }
 0x436   : > { %6813 = vmatmul.mubr.f32.gmra.mrb[8].mxu1 %v4707_v33 }
 0x437   : > { %6815 = vmatprep.mubr.f32.mxu1 %v4708_v63 }
 0x43a   : > { %6816 = vmatmul.mubr.f32.gmra.mrb[10].mxu1 %v9209_v27  ;;  %v4728_v27 = vld [vmem:[#allocation2 + $0x229] sm:$0xff] }
 0x43b   : > { %6818 = vmatprep.mubr.f32.mxu1 %v9222_v15  ;;  %v4729_v15 = vld [vmem:[#allocation2 + $0x231] sm:$0xff] }
 0x43e   : > { %6819 = vmatmul.mubr.f32.gmra.mrb[12].mxu1 %v9232_v7 }
 0x43f   : > { %6821 = vmatprep.mubr.f32.mxu1 %v9236_v41 }
 0x442   : > { %6822 = vmatmul.mubr.f32.gmra.mrb[14].mxu1 %v9245_v47 }
 0x443   : > { %6824 = vmatprep.mubr.f32.mxu1 %v9249_v17 }
 0x446   : > { %6825 = vmatmul.mubr.f32.gmra.mrb[16].mxu1 %v9257_v30 }
 0x447   : > { %6827 = vmatprep.mubr.f32.mxu1 %v9261_v61 }
 0x44a   : > { %6828 = vmatmul.mubr.f32.gmra.mrb[18].mxu1 %v9269_v22 }
 0x44b   : > { %6830 = vmatprep.mubr.f32.mxu1 %v9273_v5 }
 0x44e   : > { %6831 = vmatmul.mubr.f32.gmra.mrb[20].mxu1 %v9281_v46 }
 0x44f   : > { %6833 = vmatprep.mubr.f32.mxu1 %v9285_v45 }
 0x452   : > { %6834 = vmatmul.mubr.f32.gmra.mrb[22].mxu1 %v9291_v52 }
 0x453   : > { %6836 = vmatprep.mubr.f32.mxu1 %v9300_v26 }
 0x456   : > { %6837 = vmatmul.mubr.f32.gmra.mrb[24].mxu1 %v9303_v38 }
 0x457   : > { %6839 = vmatprep.mubr.f32.mxu1 %v9313_v23 }
 0x45a   : > { %6840 = vmatmul.mubr.f32.gmra.mrb[26].mxu1 %v9318_v59 }
 0x45b   : > { %6842 = vmatprep.mubr.f32.mxu1 %v9328_v13 }
 0x45e   : > { %6843 = vmatmul.mubr.f32.gmra.mrb[28].mxu1 %v9332_v42 }
 0x45f   : > { %6845 = vmatprep.mubr.f32.mxu1 %v4728_v27 }
 0x462   : > { %6846 = vmatmul.mubr.f32.gmra.mrb[30].mxu1 %v4729_v15 }
 0x4ac   : > { %v6402_v7 = vpop.f32.mrb[32].mxu0 }
 0x4ad   : > { %v3282_v41 = vpop.f32.mrb[33].mxu0 }
 0x4b0   : > { %v6405_v47 = vpop.f32.mrb[34].mxu0 }
 0x4b1   : > { %v3292_v17 = vpop.f32.mrb[35].mxu0 }
 0x4b4   : > { %v6408_v30 = vpop.f32.mrb[36].mxu0 }
 0x4b5   : > { %v3302_v61 = vpop.f32.mrb[37].mxu0 }
 0x4b8   : > { %v6411_v22 = vpop.f32.mrb[38].mxu0 }
 0x4b9   : > { %v9561_v5 = vpop.f32.mrb[39].mxu0 }
 0x4bc   : > { %v9563_v46 = vpop.f32.mrb[40].mxu0 }
 0x4bd   : > { %v9565_v45 = vpop.f32.mrb[41].mxu0 }
 0x4c0   : > { %v9567_v13 = vpop.f32.mrb[42].mxu0 }
 0x4c1   : > { %v9569_v38 = vpop.f32.mrb[43].mxu0 }
 0x4c4   : > { %v9571_v52 = vpop.f32.mrb[44].mxu0 }
 0x4c5   : > { %v9573_v26 = vpop.f32.mrb[45].mxu0 }
 0x4c8   : > { %v9575_v23 = vpop.f32.mrb[46].mxu0 }
 0x4c9   : > { %v9577_v59 = vpop.f32.mrb[47].mxu0 }
 0x4cc   : > { %v9579_v42 = vpop.f32.mrb[48].mxu0 }
 0x4cd   : > { %v9581_v56 = vpop.f32.mrb[49].mxu0 }
 0x4d0   : > { %v9583_v19 = vpop.f32.mrb[50].mxu0 }
 0x4d1   : > { %v9585_v54 = vpop.f32.mrb[51].mxu0 }
 0x4d4   : > { %v9587_v2 = vpop.f32.mrb[52].mxu0 }
 0x4d5   : > { %v9589_v34 = vpop.f32.mrb[53].mxu0 }
 0x4d8   : > { %v9591_v10 = vpop.f32.mrb[54].mxu0 }
 0x4d9   : > { %v9593_v16 = vpop.f32.mrb[55].mxu0 }
 0x4dc   : > { %v9595_v36 = vpop.f32.mrb[56].mxu0 }
 0x4dd   : > { %v9597_v57 = vpop.f32.mrb[57].mxu0 }
 0x4e0   : > { %v9599_v50 = vpop.f32.mrb[58].mxu0 }
 0x4e1   : > { %v9601_v62 = vpop.f32.mrb[59].mxu0 }
 0x4e4   : > { %v9603_v49 = vpop.f32.mrb[60].mxu0 }
 0x4e5   : > { %v9605_v0 = vpop.f32.mrb[61].mxu0 }
 0x4e8   : > { %v9607_v29 = vpop.f32.mrb[62].mxu0 }
 0x4e9   : > { %v9609_v32 = vpop.f32.mrb[63].mxu0 }
 0x4f9   : > { %v6802_v12 = vpop.f32.mrb[0].mxu1 }
 0x4fa   : > { %v7168_v6 = vadd.f32 %v6802_v12, %v6402_v7  ;;  %v4813_v43 = vpop.f32.mrb[1].mxu1 }
 0x4fb   : > { %v7169_v24 = vadd.f32 %v4813_v43, %v3282_v41 }
 0x4fc   : > { %v5012_v40 = vmul.f32 %v7168_v6, %v9614_v21 }
 0x4fd   : > { %v5011_v44 = vmul.f32 %v7169_v24, %v9614_v21  ;;  %v6805_v4 = vpop.f32.mrb[2].mxu1 }
 0x4fe   : > { %v5051_v55 = vadd.f32 %v9619_v18, %v5012_v40  ;;  %v7170_v51 = vadd.f32 %v6805_v4, %v6405_v47  ;;  %v4823_v35 = vpop.f32.mrb[3].mxu1 }
 0x4ff   : > { %v5050_v14 = vadd.f32 %v9619_v18, %v5011_v44  ;;  %v7171_v53 = vadd.f32 %v4823_v35, %v3292_v17 }
 0x500   : > { %v5083_v28 = vmax.f32 %v5051_v55, 0.0  ;;  %v5014_v25 = vmul.f32 %v7170_v51, %v9614_v21 }
 0x501   : > { %v5082_v37 = vmax.f32 %v5050_v14, 0.0  ;;  %v5013_v9 = vmul.f32 %v7171_v53, %v9614_v21  ;;  %v6808_v1 = vpop.f32.mrb[4].mxu1 }
 0x502   : > { %5115 = vst [vmem:[%s9628_s14 + $0x8] sm:$0xff] %v5083_v28  ;;  %v5053_v11 = vadd.f32 %v9619_v18, %v5014_v25  ;;  %v7172_v39 = vadd.f32 %v6808_v1, %v6408_v30  ;;  %v4833_v60 = vpop.f32.mrb[5].mxu1 }
 0x503   : > { %5114 = vst [vmem:[%s9628_s14] sm:$0xff] %v5082_v37  ;;  %v5052_v58 = vadd.f32 %v9619_v18, %v5013_v9  ;;  %v7173_v3 = vadd.f32 %v4833_v60, %v3302_v61 }
 0x504   : > { %v5085_v8 = vmax.f32 %v5053_v11, 0.0  ;;  %v5016_v31 = vmul.f32 %v7172_v39, %v9614_v21 }
 0x505   : > { %v5084_v20 = vmax.f32 %v5052_v58, 0.0  ;;  %v5015_v48 = vmul.f32 %v7173_v3, %v9614_v21  ;;  %v6811_v33 = vpop.f32.mrb[6].mxu1 }
 0x506   : > { %5117 = vst [vmem:[%s9628_s14 + $0x18] sm:$0xff] %v5085_v8  ;;  %v5055_v63 = vadd.f32 %v9619_v18, %v5016_v31  ;;  %v7174_v27 = vadd.f32 %v6811_v33, %v6411_v22  ;;  %v4843_v15 = vpop.f32.mrb[7].mxu1 }
 0x507   : > { %5116 = vst [vmem:[%s9628_s14 + $0x10] sm:$0xff] %v5084_v20  ;;  %v5054_v7 = vadd.f32 %v9619_v18, %v5015_v48  ;;  %v7175_v41 = vadd.f32 %v4843_v15, %v9561_v5 }
 0x508   : > { %v5087_v47 = vmax.f32 %v5055_v63, 0.0  ;;  %v5018_v17 = vmul.f32 %v7174_v27, %v9614_v21 }
 0x509   : > { %v5086_v30 = vmax.f32 %v5054_v7, 0.0  ;;  %v5017_v61 = vmul.f32 %v7175_v41, %v9614_v21  ;;  %v6814_v12 = vpop.f32.mrb[8].mxu1 }
 0x50a   : > { %5119 = vst [vmem:[%s9628_s14 + $0x28] sm:$0xff] %v5087_v47  ;;  %v5057_v6 = vadd.f32 %v9619_v18, %v5018_v17  ;;  %v7176_v22 = vadd.f32 %v6814_v12, %v9563_v46  ;;  %v4853_v43 = vpop.f32.mrb[9].mxu1 }
 0x50b   : > { %5118 = vst [vmem:[%s9628_s14 + $0x20] sm:$0xff] %v5086_v30  ;;  %v5056_v24 = vadd.f32 %v9619_v18, %v5017_v61  ;;  %v7177_v5 = vadd.f32 %v4853_v43, %v9565_v45 }
 0x50c   : > { %v5089_v40 = vmax.f32 %v5057_v6, 0.0  ;;  %v5020_v44 = vmul.f32 %v7176_v22, %v9614_v21 }
 0x50d   : > { %v5088_v4 = vmax.f32 %v5056_v24, 0.0  ;;  %v5019_v55 = vmul.f32 %v7177_v5, %v9614_v21  ;;  %v6817_v51 = vpop.f32.mrb[10].mxu1 }
 0x50e   : > { %5121 = vst [vmem:[%s9628_s14 + $0x38] sm:$0xff] %v5089_v40  ;;  %v5059_v35 = vadd.f32 %v9619_v18, %v5020_v44  ;;  %v7178_v46 = vadd.f32 %v6817_v51, %v9567_v13  ;;  %v4863_v14 = vpop.f32.mrb[11].mxu1 }
 0x50f   : > { %5120 = vst [vmem:[%s9628_s14 + $0x30] sm:$0xff] %v5088_v4  ;;  %v5058_v53 = vadd.f32 %v9619_v18, %v5019_v55  ;;  %v7179_v45 = vadd.f32 %v4863_v14, %v9569_v38 }
 0x510   : > { %v5091_v28 = vmax.f32 %v5059_v35, 0.0  ;;  %v5022_v25 = vmul.f32 %v7178_v46, %v9614_v21 }
 0x511   : > { %v5090_v37 = vmax.f32 %v5058_v53, 0.0  ;;  %v5021_v9 = vmul.f32 %v7179_v45, %v9614_v21  ;;  %v6820_v1 = vpop.f32.mrb[12].mxu1 }
 0x512   : > { %5123 = vst [vmem:[%s9628_s14 + $0x48] sm:$0xff] %v5091_v28  ;;  %v5061_v11 = vadd.f32 %v9619_v18, %v5022_v25  ;;  %v7180_v13 = vadd.f32 %v6820_v1, %v9571_v52  ;;  %v4873_v39 = vpop.f32.mrb[13].mxu1 }
 0x513   : > { %5122 = vst [vmem:[%s9628_s14 + $0x40] sm:$0xff] %v5090_v37  ;;  %v5060_v60 = vadd.f32 %v9619_v18, %v5021_v9  ;;  %v7181_v38 = vadd.f32 %v4873_v39, %v9573_v26 }
 0x514   : > { %v5093_v58 = vmax.f32 %v5061_v11, 0.0  ;;  %v5024_v3 = vmul.f32 %v7180_v13, %v9614_v21 }
 0x515   : > { %v5092_v8 = vmax.f32 %v5060_v60, 0.0  ;;  %v5023_v31 = vmul.f32 %v7181_v38, %v9614_v21  ;;  %v6823_v20 = vpop.f32.mrb[14].mxu1 }
 0x516   : > { %5125 = vst [vmem:[%s9628_s14 + $0x58] sm:$0xff] %v5093_v58  ;;  %v5063_v48 = vadd.f32 %v9619_v18, %v5024_v3  ;;  %v7182_v52 = vadd.f32 %v6823_v20, %v9575_v23  ;;  %v4883_v33 = vpop.f32.mrb[15].mxu1 }
 0x517   : > { %5124 = vst [vmem:[%s9628_s14 + $0x50] sm:$0xff] %v5092_v8  ;;  %v5062_v63 = vadd.f32 %v9619_v18, %v5023_v31  ;;  %v7183_v26 = vadd.f32 %v4883_v33, %v9577_v59 }
 0x518   : > { %v5095_v27 = vmax.f32 %v5063_v48, 0.0  ;;  %v5026_v15 = vmul.f32 %v7182_v52, %v9614_v21 }
 0x519   : > { %v5094_v7 = vmax.f32 %v5062_v63, 0.0  ;;  %v5025_v41 = vmul.f32 %v7183_v26, %v9614_v21  ;;  %v6826_v47 = vpop.f32.mrb[16].mxu1 }
 0x51a   : > { %5127 = vst [vmem:[%s9628_s14 + $0x68] sm:$0xff] %v5095_v27  ;;  %v5065_v17 = vadd.f32 %v9619_v18, %v5026_v15  ;;  %v7184_v23 = vadd.f32 %v6826_v47, %v9579_v42  ;;  %v4893_v30 = vpop.f32.mrb[17].mxu1 }
 0x51b   : > { %5126 = vst [vmem:[%s9628_s14 + $0x60] sm:$0xff] %v5094_v7  ;;  %v5064_v61 = vadd.f32 %v9619_v18, %v5025_v41  ;;  %v7185_v59 = vadd.f32 %v4893_v30, %v9581_v56 }
 0x51c   : > { %v5097_v12 = vmax.f32 %v5065_v17, 0.0  ;;  %v5028_v6 = vmul.f32 %v7184_v23, %v9614_v21 }
 0x51d   : > { %v5096_v22 = vmax.f32 %v5064_v61, 0.0  ;;  %v5027_v43 = vmul.f32 %v7185_v59, %v9614_v21  ;;  %v6829_v24 = vpop.f32.mrb[18].mxu1 }
 0x51e   : > { %5129 = vst [vmem:[%s9628_s14 + $0x78] sm:$0xff] %v5097_v12  ;;  %v5067_v5 = vadd.f32 %v9619_v18, %v5028_v6  ;;  %v7186_v42 = vadd.f32 %v6829_v24, %v9583_v19  ;;  %v4903_v40 = vpop.f32.mrb[19].mxu1 }
 0x51f   : > { %5128 = vst [vmem:[%s9628_s14 + $0x70] sm:$0xff] %v5096_v22  ;;  %v5066_v44 = vadd.f32 %v9619_v18, %v5027_v43  ;;  %v7187_v56 = vadd.f32 %v4903_v40, %v9585_v54 }
 0x520   : > { %v5099_v4 = vmax.f32 %v5067_v5, 0.0  ;;  %v5030_v55 = vmul.f32 %v7186_v42, %v9614_v21 }
 0x521   : > { %v5098_v51 = vmax.f32 %v5066_v44, 0.0  ;;  %v5029_v35 = vmul.f32 %v7187_v56, %v9614_v21  ;;  %v6832_v46 = vpop.f32.mrb[20].mxu1 }
 0x522   : > { %5131 = vst [vmem:[%s9628_s14 + $0x88] sm:$0xff] %v5099_v4  ;;  %v5069_v14 = vadd.f32 %v9619_v18, %v5030_v55  ;;  %v7188_v19 = vadd.f32 %v6832_v46, %v9587_v2  ;;  %v4913_v53 = vpop.f32.mrb[21].mxu1 }
 0x523   : > { %5130 = vst [vmem:[%s9628_s14 + $0x80] sm:$0xff] %v5098_v51  ;;  %v5068_v45 = vadd.f32 %v9619_v18, %v5029_v35  ;;  %v7189_v54 = vadd.f32 %v4913_v53, %v9589_v34 }
 0x524   : > { %v5101_v28 = vmax.f32 %v5069_v14, 0.0  ;;  %v5032_v25 = vmul.f32 %v7188_v19, %v9614_v21 }
 0x525   : > { %v5100_v37 = vmax.f32 %v5068_v45, 0.0  ;;  %v5031_v9 = vmul.f32 %v7189_v54, %v9614_v21  ;;  %v6835_v1 = vpop.f32.mrb[22].mxu1 }
 0x526   : > { %5133 = vst [vmem:[%s9628_s14 + $0x98] sm:$0xff] %v5101_v28  ;;  %v5071_v11 = vadd.f32 %v9619_v18, %v5032_v25  ;;  %v7190_v2 = vadd.f32 %v6835_v1, %v9591_v10  ;;  %v4923_v13 = vpop.f32.mrb[23].mxu1 }
 0x527   : > { %5132 = vst [vmem:[%s9628_s14 + $0x90] sm:$0xff] %v5100_v37  ;;  %v5070_v39 = vadd.f32 %v9619_v18, %v5031_v9  ;;  %v7191_v34 = vadd.f32 %v4923_v13, %v9593_v16 }
 0x528   : > { %v5103_v60 = vmax.f32 %v5071_v11, 0.0  ;;  %v5034_v38 = vmul.f32 %v7190_v2, %v9614_v21 }
 0x529   : > { %v5102_v58 = vmax.f32 %v5070_v39, 0.0  ;;  %v5033_v3 = vmul.f32 %v7191_v34, %v9614_v21  ;;  %v6838_v8 = vpop.f32.mrb[24].mxu1 }
 0x52a   : > { %5135 = vst [vmem:[%s9628_s14 + $0xa8] sm:$0xff] %v5103_v60  ;;  %v5073_v31 = vadd.f32 %v9619_v18, %v5034_v38  ;;  %v7192_v10 = vadd.f32 %v6838_v8, %v9595_v36  ;;  %v4933_v20 = vpop.f32.mrb[25].mxu1 }
 0x52b   : > { %5134 = vst [vmem:[%s9628_s14 + $0xa0] sm:$0xff] %v5102_v58  ;;  %v5072_v48 = vadd.f32 %v9619_v18, %v5033_v3  ;;  %v7193_v16 = vadd.f32 %v4933_v20, %v9597_v57 }
 0x52c   : > { %v5105_v52 = vmax.f32 %v5073_v31, 0.0  ;;  %v5036_v33 = vmul.f32 %v7192_v10, %v9614_v21 }
 0x52d   : > { %v5104_v63 = vmax.f32 %v5072_v48, 0.0  ;;  %v5035_v26 = vmul.f32 %v7193_v16, %v9614_v21  ;;  %v6841_v27 = vpop.f32.mrb[26].mxu1 }
 0x52e   : > { %5137 = vst [vmem:[%s9628_s14 + $0xb8] sm:$0xff] %v5105_v52  ;;  %v5075_v15 = vadd.f32 %v9619_v18, %v5036_v33  ;;  %v7194_v36 = vadd.f32 %v6841_v27, %v9599_v50  ;;  %v4943_v7 = vpop.f32.mrb[27].mxu1 }
 0x52f   : > { %5136 = vst [vmem:[%s9628_s14 + $0xb0] sm:$0xff] %v5104_v63  ;;  %v5074_v41 = vadd.f32 %v9619_v18, %v5035_v26  ;;  %v7195_v57 = vadd.f32 %v4943_v7, %v9601_v62 }
 0x530   : > { %v5107_v47 = vmax.f32 %v5075_v15, 0.0  ;;  %v5038_v17 = vmul.f32 %v7194_v36, %v9614_v21 }
 0x531   : > { %v5106_v23 = vmax.f32 %v5074_v41, 0.0  ;;  %v5037_v30 = vmul.f32 %v7195_v57, %v9614_v21  ;;  %v6844_v61 = vpop.f32.mrb[28].mxu1 }
 0x532   : > { %5139 = vst [vmem:[%s9628_s14 + $0xc8] sm:$0xff] %v5107_v47  ;;  %v5077_v59 = vadd.f32 %v9619_v18, %v5038_v17  ;;  %v7196_v50 = vadd.f32 %v6844_v61, %v9603_v49  ;;  %v4953_v12 = vpop.f32.mrb[29].mxu1 }
 0x533   : > { %5138 = vst [vmem:[%s9628_s14 + $0xc0] sm:$0xff] %v5106_v23  ;;  %v5076_v6 = vadd.f32 %v9619_v18, %v5037_v30  ;;  %v7197_v62 = vadd.f32 %v4953_v12, %v9605_v0 }
 0x534   : > { %v5109_v22 = vmax.f32 %v5077_v59, 0.0  ;;  %v5040_v43 = vmul.f32 %v7196_v50, %v9614_v21 }
 0x535   : > { %v5108_v24 = vmax.f32 %v5076_v6, 0.0  ;;  %v5039_v5 = vmul.f32 %v7197_v62, %v9614_v21  ;;  %v6847_v42 = vpop.f32.mrb[30].mxu1 }
 0x536   : > { %5141 = vst [vmem:[%s9628_s14 + $0xd8] sm:$0xff] %v5109_v22  ;;  %v5079_v40 = vadd.f32 %v9619_v18, %v5040_v43  ;;  %v7198_v49 = vadd.f32 %v6847_v42, %v9607_v29  ;;  %v4963_v44 = vpop.f32.mrb[31].mxu1 }
 0x537   : > { %5140 = vst [vmem:[%s9628_s14 + $0xd0] sm:$0xff] %v5108_v24  ;;  %v5078_v0 = vadd.f32 %v9619_v18, %v5039_v5  ;;  %v7199_v56 = vadd.f32 %v4963_v44, %v9609_v32 }
 0x538   : > { %v5111_v4 = vmax.f32 %v5079_v40, 0.0  ;;  %v5042_v55 = vmul.f32 %v7198_v49, %v9614_v21 }
 0x539   : > { %v5110_v51 = vmax.f32 %v5078_v0, 0.0  ;;  %v5041_v35 = vmul.f32 %v7199_v56, %v9614_v21 }
 0x53a   : > { %5143 = vst [vmem:[%s9628_s14 + $0xe8] sm:$0xff] %v5111_v4  ;;  %v5081_v46 = vadd.f32 %v9619_v18, %v5042_v55 }
 0x53b   : > { %5142 = vst [vmem:[%s9628_s14 + $0xe0] sm:$0xff] %v5110_v51  ;;  %v5080_v14 = vadd.f32 %v9619_v18, %v5041_v35 }
 0x53c   : > { %v5113_v29 = vmax.f32 %v5081_v46, 0.0 }
 0x53d   : > { %v5112_v19 = vmax.f32 %v5080_v14, 0.0 }
 0x53e   : > { %5145 = vst [vmem:[%s9628_s14 + $0xf8] sm:$0xff] %v5113_v29 }
 0x53f   : > { %5144 = vst [vmem:[%s9628_s14 + $0xf0] sm:$0xff] %v5112_v19 }
 0x540 PF: > { %s17_s24 = sadd.s32 1, %s7452_s24  }
 0x541   : > { %p14_p4 = scmp.ge.s32.totalorder %s17_s24, 4  }
 0x543   :  { %16 = sbr.rel (!%p14_p4) target bundleno = 1 (0x1), region = 90 }

</bundles_post_ra>
